<compile_context>
chip_gen: v5e
topology: v5e:2x2
jax: 0.10.0
libtpu: 0.0.40
codegen_flags: <defaults>
</compile_context>

<pallas_src>
import functools
import math

import jax
import jax.numpy as jnp
from jax import lax
from jax.experimental import pallas as pl
from jax.experimental.pallas import tpu as pltpu


DTYPE = jnp.bfloat16          # weights/activations; accumulation is f32
# Conservative across generations (v5e/v6e have 128 MiB physical, v7x has 64).
# Re-derive per chip for production shapes; shrink tk / tf first on v7x.
VMEM_LIMIT_BYTES = 48 * 1024 * 1024


def _cparams(dims):
    return pltpu.CompilerParams(dimension_semantics=dims,
                                vmem_limit_bytes=VMEM_LIMIT_BYTES)


# ------------------------------ helpers --------------------------------------

def _pick_tile(dim, pref):
    """Full dim if it is small (single legal block); otherwise the preferred tile."""
    return dim if dim <= pref else pref


def _pad_axis(a, axis, mult):
    """Zero-pad `axis` of `a` up to a multiple of `mult`."""
    pad = (-a.shape[axis]) % mult
    if pad == 0:
        return a
    widths = [(0, 0)] * a.ndim
    widths[axis] = (0, pad)
    return jnp.pad(a, widths)


def _q_tile(lq, pref=128):
    """Largest multiple-of-8 divisor of lq that is <= pref (no padding needed)."""
    if lq <= pref:
        return lq
    t = pref - (pref % 8)
    while t >= 8:
        if lq % t == 0:
            return t
        t -= 8
    return lq


# --------------------------- tiled linear kernel ------------------------------

def _matmul_kernel(x_ref, w_ref, b_ref, *rest, activation, has_residual):
    if has_residual:
        res_ref, o_ref, acc_ref = rest
    else:
        o_ref, acc_ref = rest

    k = pl.program_id(2)

    @pl.when(k == 0)
    def _():
        acc_ref[...] = jnp.zeros_like(acc_ref)

    # bf16 x bf16 -> f32 accumulate (full-rate MXU on v5e/v6e/v7x).
    acc_ref[...] += jnp.dot(x_ref[...], w_ref[...],
                            preferred_element_type=jnp.float32)

    @pl.when(k == pl.num_programs(2) - 1)
    def _():
        y = acc_ref[...] + b_ref[...].astype(jnp.float32)
        if activation == "relu":
            y = jnp.maximum(y, 0.0)
        if has_residual:
            y = y + res_ref[...].astype(jnp.float32)
        o_ref[...] = y.astype(o_ref.dtype)


def linear(x, w, b, *, activation=None, residual=None, tm=256, tn=256, tk=256):
    """y = act(x @ w + b) (+ residual).  x:[M,K] w:[K,N] b:[N] residual:[M,N].

    v5e: prefer tn=128 (native 128x128 MXU); v6e: tn/tk multiples of 256 and
    tm up to 512; v7x: shrink tk first when VMEM-bound (64 MiB physical).
    """
    M, K = x.shape
    N = w.shape[1]
    tm_, tn_, tk_ = _pick_tile(M, tm), _pick_tile(N, tn), _pick_tile(K, tk)

    xp = _pad_axis(_pad_axis(x, 0, tm_), 1, tk_)
    wp = _pad_axis(_pad_axis(w, 0, tk_), 1, tn_)
    bp = _pad_axis(b.reshape(1, N), 1, tn_)

    inputs = [xp, wp, bp]
    in_specs = [
        pl.BlockSpec((tm_, tk_), lambda i, j, k: (i, k)),
        pl.BlockSpec((tk_, tn_), lambda i, j, k: (k, j)),
        pl.BlockSpec((1, tn_), lambda i, j, k: (0, j)),
    ]
    if residual is not None:
        rp = _pad_axis(_pad_axis(residual, 0, tm_), 1, tn_)
        inputs.append(rp)
        in_specs.append(pl.BlockSpec((tm_, tn_), lambda i, j, k: (i, j)))

    Mp, Kp = xp.shape
    Np = wp.shape[1]
    out = pl.pallas_call(
        functools.partial(_matmul_kernel, activation=activation,
                          has_residual=residual is not None),
        out_shape=jax.ShapeDtypeStruct((Mp, Np), x.dtype),
        grid=(Mp // tm_, Np // tn_, Kp // tk_),
        in_specs=in_specs,
        out_specs=pl.BlockSpec((tm_, tn_), lambda i, j, k: (i, j)),
        scratch_shapes=[pltpu.VMEM((tm_, tn_), jnp.float32)],
        compiler_params=_cparams(("parallel", "parallel", "arbitrary")),
    )(*inputs)
    return out[:M, :N] if (Mp, Np) != (M, N) else out


# ----------------------- fused LayerNorm + linear kernel ----------------------

def _ln_matmul_kernel(x_ref, g_ref, bb_ref, w_ref, b_ref, o_ref, xn_ref,
                      *, activation, eps):
    # LayerNorm is computed once per row tile (j == 0) and cached in VMEM so the
    # VPU/XLU/EUP work is not repeated for every output-column tile.
    @pl.when(pl.program_id(1) == 0)
    def _():
        x = x_ref[...].astype(jnp.float32)
        mu = jnp.mean(x, axis=-1, keepdims=True)
        var = jnp.mean(jnp.square(x - mu), axis=-1, keepdims=True)
        xn = (x - mu) * lax.rsqrt(var + eps)
        xn = xn * g_ref[...].astype(jnp.float32) + bb_ref[...].astype(jnp.float32)
        xn_ref[...] = xn.astype(xn_ref.dtype)

    y = jnp.dot(xn_ref[...], w_ref[...], preferred_element_type=jnp.float32)
    y = y + b_ref[...].astype(jnp.float32)
    if activation == "relu":
        y = jnp.maximum(y, 0.0)
    o_ref[...] = y.astype(o_ref.dtype)


def ln_linear(x, gamma, beta, w, b, *, activation=None, eps=1e-6, tm=256, tn=256):
    """y = act(LayerNorm(x) @ w + b).  LN over the full K row (K kept unsplit)."""
    M, K = x.shape
    N = w.shape[1]
    tm_, tn_ = _pick_tile(M, tm), _pick_tile(N, tn)

    xp = _pad_axis(x, 0, tm_)
    wp = _pad_axis(w, 1, tn_)
    bp = _pad_axis(b.reshape(1, N), 1, tn_)
    Mp = xp.shape[0]
    Np = wp.shape[1]

    out = pl.pallas_call(
        functools.partial(_ln_matmul_kernel, activation=activation, eps=eps),
        out_shape=jax.ShapeDtypeStruct((Mp, Np), x.dtype),
        grid=(Mp // tm_, Np // tn_),
        in_specs=[
            pl.BlockSpec((tm_, K), lambda i, j: (i, 0)),
            pl.BlockSpec((1, K), lambda i, j: (0, 0)),
            pl.BlockSpec((1, K), lambda i, j: (0, 0)),
            pl.BlockSpec((K, tn_), lambda i, j: (0, j)),
            pl.BlockSpec((1, tn_), lambda i, j: (0, j)),
        ],
        out_specs=pl.BlockSpec((tm_, tn_), lambda i, j: (i, j)),
        scratch_shapes=[pltpu.VMEM((tm_, K), x.dtype)],     # cached normalized rows
        compiler_params=_cparams(("parallel", "arbitrary")),
    )(xp, gamma.reshape(1, K), beta.reshape(1, K), wp, bp)
    return out[:M, :N] if (Mp, Np) != (M, N) else out


# -------- fused FFN sublayer (LN -> w1 -> relu -> w2 -> +x), d_ff tiled --------

def _ffn_kernel(x_ref, g_ref, bb_ref, w1_ref, b1_ref, w2_ref, b2_ref, o_ref,
                xn_ref, acc_ref, *, eps):
    f = pl.program_id(1)

    @pl.when(f == 0)
    def _():
        x = x_ref[...].astype(jnp.float32)
        mu = jnp.mean(x, axis=-1, keepdims=True)
        var = jnp.mean(jnp.square(x - mu), axis=-1, keepdims=True)
        xn = (x - mu) * lax.rsqrt(var + eps)
        xn = xn * g_ref[...].astype(jnp.float32) + bb_ref[...].astype(jnp.float32)
        xn_ref[...] = xn.astype(xn_ref.dtype)
        acc_ref[...] = jnp.zeros_like(acc_ref)

    # One d_ff slab: (tm, tf) intermediate never leaves VMEM.
    h = jnp.dot(xn_ref[...], w1_ref[...], preferred_element_type=jnp.float32)
    h = jnp.maximum(h + b1_ref[...].astype(jnp.float32), 0.0)
    acc_ref[...] += jnp.dot(h.astype(w2_ref.dtype), w2_ref[...],
                            preferred_element_type=jnp.float32)

    @pl.when(f == pl.num_programs(1) - 1)
    def _():
        y = acc_ref[...] + b2_ref[...].astype(jnp.float32) \
            + x_ref[...].astype(jnp.float32)               # residual fused
        o_ref[...] = y.astype(o_ref.dtype)


def ffn_residual(x2d, gamma, beta, w1, b1, w2, b2, *, eps=1e-6, tm=256, tf=512):
    """x + FFN(LayerNorm(x)); d_ff is tiled so only (D,tf)/(tf,D) weight slabs
    are resident in VMEM (fits v7x's 64 MiB at realistic d_model/d_ff)."""
    M, D = x2d.shape
    F = w1.shape[1]
    tm_, tf_ = _pick_tile(M, tm), _pick_tile(F, tf)

    xp = _pad_axis(x2d, 0, tm_)
    w1p = _pad_axis(w1, 1, tf_)
    b1p = _pad_axis(b1.reshape(1, F), 1, tf_)
    w2p = _pad_axis(w2, 0, tf_)
    Mp = xp.shape[0]
    Fp = w1p.shape[1]

    out = pl.pallas_call(
        functools.partial(_ffn_kernel, eps=eps),
        out_shape=jax.ShapeDtypeStruct((Mp, D), x2d.dtype),
        grid=(Mp // tm_, Fp // tf_),
        in_specs=[
            pl.BlockSpec((tm_, D), lambda i, f: (i, 0)),
            pl.BlockSpec((1, D), lambda i, f: (0, 0)),
            pl.BlockSpec((1, D), lambda i, f: (0, 0)),
            pl.BlockSpec((D, tf_), lambda i, f: (0, f)),
            pl.BlockSpec((1, tf_), lambda i, f: (0, f)),
            pl.BlockSpec((tf_, D), lambda i, f: (f, 0)),
            pl.BlockSpec((1, D), lambda i, f: (0, 0)),
        ],
        out_specs=pl.BlockSpec((tm_, D), lambda i, f: (i, 0)),
        scratch_shapes=[pltpu.VMEM((tm_, D), x2d.dtype),      # cached LN rows
                        pltpu.VMEM((tm_, D), jnp.float32)],   # f32 accumulator
        compiler_params=_cparams(("parallel", "arbitrary")),
    )(xp, gamma.reshape(1, D), beta.reshape(1, D), w1p, b1p, w2p,
      b2.reshape(1, D))
    return out[:M] if Mp != M else out


# ------------------------- standalone LayerNorm (final norms) -----------------

def _layernorm_kernel(x_ref, g_ref, b_ref, o_ref, *, eps):
    x = x_ref[...].astype(jnp.float32)
    mu = jnp.mean(x, axis=-1, keepdims=True)
    var = jnp.mean(jnp.square(x - mu), axis=-1, keepdims=True)
    y = (x - mu) * lax.rsqrt(var + eps)
    y = y * g_ref[...].astype(jnp.float32) + b_ref[...].astype(jnp.float32)
    o_ref[...] = y.astype(o_ref.dtype)


def layernorm(x2d, gamma, beta, eps=1e-6, tm=512):
    M, D = x2d.shape
    tm_ = _pick_tile(M, tm)
    xp = _pad_axis(x2d, 0, tm_)
    Mp = xp.shape[0]
    out = pl.pallas_call(
        functools.partial(_layernorm_kernel, eps=eps),
        out_shape=jax.ShapeDtypeStruct((Mp, D), x2d.dtype),
        grid=(Mp // tm_,),
        in_specs=[
            pl.BlockSpec((tm_, D), lambda i: (i, 0)),
            pl.BlockSpec((1, D), lambda i: (0, 0)),
            pl.BlockSpec((1, D), lambda i: (0, 0)),
        ],
        out_specs=pl.BlockSpec((tm_, D), lambda i: (i, 0)),
        compiler_params=_cparams(("parallel",)),
    )(xp, gamma.reshape(1, D), beta.reshape(1, D))
    return out[:M] if Mp != M else out


# --------------------------- attention kernel ---------------------------------

def _mha_kernel(q_ref, k_ref, v_ref, bias_ref, o_ref, *, num_heads, scale):
    # q_ref: (1, tq, D) bf16; k_ref/v_ref: (1, Lk, D) bf16;
    # bias_ref: (1, 1|tq, Lk) additive f32 mask.  Output written lane-dense (tq, D).
    D = q_ref.shape[-1]
    dk = D // num_heads
    bias = bias_ref[0]                                   # (1|tq, Lk) f32

    outs = []
    for h in range(num_heads):                           # static head loop (no transposes)
        lo, hi = h * dk, (h + 1) * dk
        qh = q_ref[0, :, lo:hi]                          # (tq, dk) bf16
        kh = k_ref[0, :, lo:hi]                          # (Lk, dk) bf16
        vh = v_ref[0, :, lo:hi]                          # (Lk, dk) bf16
        # Q K^T via dot_general contracting dk on both sides (no XLU transpose).
        s = lax.dot_general(qh, kh, (((1,), (1,)), ((), ())),
                            preferred_element_type=jnp.float32) * scale   # (tq, Lk)
        s = s + bias                                     # additive mask (broadcasts)
        s = s - jnp.max(s, axis=-1, keepdims=True)
        p = jnp.exp(s)
        p = p * pl.reciprocal(jnp.sum(p, axis=-1, keepdims=True), approx=True)
        outs.append(lax.dot_general(p.astype(vh.dtype), vh,
                                    (((1,), (0,)), ((), ())),
                                    preferred_element_type=jnp.float32))  # (tq, dk)
    # Single lane-dense store of all heads (tq, D) — no masked partial stores.
    o_ref[0] = jnp.concatenate(outs, axis=-1).astype(o_ref.dtype)


def sdpa(q_arr, k_arr, v_arr, bias, *, num_heads, d_model,
         q_blk, k_blk, v_blk, tq_pref=128):
    """Scaled dot-product attention over packed projections.

    q_arr:[B,Lq,*], k_arr/v_arr:[B,Lk,*]; q/k/v live at lane-block
    {q,k,v}_blk * d_model of their arrays (so the packed QKV / KV projection
    output can be bound directly with no XLA-side slice or transpose).
    bias:[B,1|Lq,Lk] additive f32 mask.  Returns [B,Lq,d_model] lane-dense.
    """
    # TODO(synk): for long Lk, add an 'arbitrary' KV grid axis with online
    # softmax (flash-style m/l/acc scratch) instead of full-Lk scores.
    B, Lq, _ = q_arr.shape
    Lk = k_arr.shape[1]
    Mq = bias.shape[1]
    dk = d_model // num_heads
    scale = 1.0 / math.sqrt(dk)
    tq = _q_tile(Lq, tq_pref)

    if Mq == 1:
        bias_spec = pl.BlockSpec((1, 1, Lk), lambda b, qi: (b, 0, 0))
    else:
        bias_spec = pl.BlockSpec((1, tq, Lk), lambda b, qi: (b, qi, 0))

    return pl.pallas_call(
        functools.partial(_mha_kernel, num_heads=num_heads, scale=scale),
        out_shape=jax.ShapeDtypeStruct((B, Lq, d_model), q_arr.dtype),
        grid=(B, Lq // tq),
        in_specs=[
            pl.BlockSpec((1, tq, d_model), lambda b, qi: (b, qi, q_blk)),
            pl.BlockSpec((1, Lk, d_model), lambda b, qi: (b, 0, k_blk)),
            pl.BlockSpec((1, Lk, d_model), lambda b, qi: (b, 0, v_blk)),
            bias_spec,
        ],
        out_specs=pl.BlockSpec((1, tq, d_model), lambda b, qi: (b, qi, 0)),
        compiler_params=_cparams(("parallel", "parallel")),
    )(q_arr, k_arr, v_arr, bias)


# ----------------------------- model glue (JAX) -------------------------------

def self_attention_block(x, bias, p, ln_g, ln_b, num_heads):
    """x + Wo @ MHA(LN(x), LN(x), LN(x), mask) — fused QKV projection."""
    B, L, D = x.shape
    x2 = x.reshape(B * L, D)
    qkv = ln_linear(x2, ln_g, ln_b, p["w_qkv"], p["b_qkv"])   # [B*L, 3D] packed
    qkv3 = qkv.reshape(B, L, 3 * D)

    if D % 128 == 0:
        # Bind the packed projection three times with lane-block offsets 0/1/2.
        o = sdpa(qkv3, qkv3, qkv3, bias, num_heads=num_heads, d_model=D,
                 q_blk=0, k_blk=1, v_blk=2)
    else:
        q3, k3, v3 = qkv3[..., :D], qkv3[..., D:2 * D], qkv3[..., 2 * D:]
        o = sdpa(q3, k3, v3, bias, num_heads=num_heads, d_model=D,
                 q_blk=0, k_blk=0, v_blk=0)

    y = linear(o.reshape(B * L, D), p["wo"], p["bo"], residual=x2)
    return y.reshape(B, L, D)


def cross_attention_block(x, memory, bias, p, ln_g, ln_b, num_heads):
    """x + Wo @ MHA(LN(x), memory, memory, mask) — fused KV projection."""
    B, Lq, D = x.shape
    Lk = memory.shape[1]
    x2 = x.reshape(B * Lq, D)
    m2 = memory.reshape(B * Lk, D)

    q3 = ln_linear(x2, ln_g, ln_b, p["wq"], p["bq"]).reshape(B, Lq, D)
    kv3 = linear(m2, p["w_kv"], p["b_kv"]).reshape(B, Lk, 2 * D)

    if D % 128 == 0:
        o = sdpa(q3, kv3, kv3, bias, num_heads=num_heads, d_model=D,
                 q_blk=0, k_blk=0, v_blk=1)
    else:
        k3, v3 = kv3[..., :D], kv3[..., D:]
        o = sdpa(q3, k3, v3, bias, num_heads=num_heads, d_model=D,
                 q_blk=0, k_blk=0, v_blk=0)

    y = linear(o.reshape(B * Lq, D), p["wo"], p["bo"], residual=x2)
    return y.reshape(B, Lq, D)


def ffn_block(x, ln_g, ln_b, p):
    B, L, D = x.shape
    y = ffn_residual(x.reshape(B * L, D), ln_g, ln_b,
                     p["w1"], p["b1"], p["w2"], p["b2"])
    return y.reshape(B, L, D)


def ln3d(x, g, b):
    B, L, D = x.shape
    return layernorm(x.reshape(B * L, D), g, b).reshape(B, L, D)


def encoder_layer(x, src_bias, p, num_heads):
    x = self_attention_block(x, src_bias, p["self_attn"], p["ln1_g"], p["ln1_b"], num_heads)
    x = ffn_block(x, p["ln2_g"], p["ln2_b"], p["ffn"])
    return x


def decoder_layer(x, memory, src_bias, trg_bias, p, num_heads):
    x = self_attention_block(x, trg_bias, p["self_attn"], p["ln1_g"], p["ln1_b"], num_heads)
    x = cross_attention_block(x, memory, src_bias, p["cross_attn"],
                              p["ln2_g"], p["ln2_b"], num_heads)
    x = ffn_block(x, p["ln3_g"], p["ln3_b"], p["ffn"])
    return x


def positional_encoding(length, d_model):
    pos = jnp.arange(length, dtype=jnp.float32)[:, None]
    div = jnp.exp(jnp.arange(0, d_model, 2, dtype=jnp.float32) *
                  (-math.log(10000.0) / d_model))
    pe = jnp.zeros((length, d_model), jnp.float32)
    pe = pe.at[:, 0::2].set(jnp.sin(pos * div))
    pe = pe.at[:, 1::2].set(jnp.cos(pos * div))
    return pe


def embed(tokens, table, d_model):
    x = jnp.take(table, tokens, axis=0).astype(jnp.float32) * math.sqrt(d_model)
    x = x + positional_encoding(tokens.shape[1], d_model)[None, :, :]
    return x.astype(table.dtype)


def transformer_forward(params, src, trg, src_mask, trg_mask, num_heads):
    d_model = params["src_emb"].shape[1]
    # Precompute additive attention biases once (no per-element compare+select
    # on the score tensor inside the kernels).
    src_bias = ((src_mask.astype(jnp.float32) - 1.0) * 1e9)
    trg_bias = ((trg_mask.astype(jnp.float32) - 1.0) * 1e9)

    # encode(src, src_mask)
    x = embed(src, params["src_emb"], d_model)
    for lp in params["enc_layers"]:
        x = encoder_layer(x, src_bias, lp, num_heads)
    memory = ln3d(x, params["enc_ln_g"], params["enc_ln_b"])

    # decode(trg, memory, src_mask, trg_mask)
    y = embed(trg, params["trg_emb"], d_model)
    for lp in params["dec_layers"]:
        y = decoder_layer(y, memory, src_bias, trg_bias, lp, num_heads)
    y = ln3d(y, params["dec_ln_g"], params["dec_ln_b"])
    # NOTE: Transformer.forward returns decoder output; the generator is not applied.
    return y


# ----------------------------- param init -------------------------------------

def _mk(key, shape):
    return (jax.random.normal(key, shape, jnp.float32) * 0.02).astype(DTYPE)


def _self_attn_params(key, d_model):
    kq, kk, kv, ko = jax.random.split(key, 4)
    return {
        "w_qkv": jnp.concatenate([_mk(kq, (d_model, d_model)),
                                  _mk(kk, (d_model, d_model)),
                                  _mk(kv, (d_model, d_model))], axis=1),
        "b_qkv": jnp.zeros((3 * d_model,), DTYPE),
        "wo": _mk(ko, (d_model, d_model)),
        "bo": jnp.zeros((d_model,), DTYPE),
    }


def _cross_attn_params(key, d_model):
    kq, kk, kv, ko = jax.random.split(key, 4)
    return {
        "wq": _mk(kq, (d_model, d_model)),
        "bq": jnp.zeros((d_model,), DTYPE),
        "w_kv": jnp.concatenate([_mk(kk, (d_model, d_model)),
                                 _mk(kv, (d_model, d_model))], axis=1),
        "b_kv": jnp.zeros((2 * d_model,), DTYPE),
        "wo": _mk(ko, (d_model, d_model)),
        "bo": jnp.zeros((d_model,), DTYPE),
    }


def _ffn_params(key, d_model, d_ff):
    k1, k2 = jax.random.split(key)
    return {
        "w1": _mk(k1, (d_model, d_ff)),
        "b1": jnp.zeros((d_ff,), DTYPE),
        "w2": _mk(k2, (d_ff, d_model)),
        "b2": jnp.zeros((d_model,), DTYPE),
    }


def _ln_pair(d_model):
    return jnp.ones((d_model,), DTYPE), jnp.zeros((d_model,), DTYPE)


def init_params(key, vocab, d_model, d_ff, n_layers):
    keys = jax.random.split(key, 3 + 2 * n_layers)
    enc_layers, dec_layers = [], []
    for i in range(n_layers):
        ka, kf = jax.random.split(keys[3 + i])
        g1, b1 = _ln_pair(d_model)
        g2, b2 = _ln_pair(d_model)
        enc_layers.append({
            "self_attn": _self_attn_params(ka, d_model),
            "ffn": _ffn_params(kf, d_model, d_ff),
            "ln1_g": g1, "ln1_b": b1, "ln2_g": g2, "ln2_b": b2,
        })
    for i in range(n_layers):
        ka, kc, kf = jax.random.split(keys[3 + n_layers + i], 3)
        g1, b1 = _ln_pair(d_model)
        g2, b2 = _ln_pair(d_model)
        g3, b3 = _ln_pair(d_model)
        dec_layers.append({
            "self_attn": _self_attn_params(ka, d_model),
            "cross_attn": _cross_attn_params(kc, d_model),
            "ffn": _ffn_params(kf, d_model, d_ff),
            "ln1_g": g1, "ln1_b": b1, "ln2_g": g2, "ln2_b": b2,
            "ln3_g": g3, "ln3_b": b3,
        })
    eg, eb = _ln_pair(d_model)
    dg, db = _ln_pair(d_model)
    return {
        "src_emb": _mk(keys[0], (vocab, d_model)),
        "trg_emb": _mk(keys[1], (vocab, d_model)),
        "enc_layers": enc_layers,
        "dec_layers": dec_layers,
        "enc_ln_g": eg, "enc_ln_b": eb,
        "dec_ln_g": dg, "dec_ln_b": db,
        # generator exists in __init__ but is unused in forward().
        "gen_w": _mk(keys[2], (d_model, 16)),
        "gen_b": jnp.zeros((16,), DTYPE),
    }


# ----------------------------- main --------------------------------------------

if __name__ == "__main__":
    B, S, T = 2, 8, 8
    D_MODEL, N_HEADS, D_FF, VOCAB, N_LAYERS = 128, 4, 256, 16, 2

    key = jax.random.PRNGKey(0)
    kp, ks, kt = jax.random.split(key, 3)

    params = init_params(kp, VOCAB, D_MODEL, D_FF, N_LAYERS)

    src = jax.random.randint(ks, (B, S), 0, VOCAB, dtype=jnp.int32)
    trg = jax.random.randint(kt, (B, T), 0, VOCAB, dtype=jnp.int32)

    # src_mask: [B, 1, S] all-visible pad mask; trg_mask: [B, T, T] causal mask.
    src_mask = jnp.ones((B, 1, S), jnp.float32)
    trg_mask = jnp.tril(jnp.ones((T, T), jnp.float32))[None, :, :].repeat(B, axis=0)

    fwd = jax.jit(functools.partial(transformer_forward, num_heads=N_HEADS))
    out = fwd(params, src, trg, src_mask, trg_mask)
    jax.block_until_ready(out)

    assert out.shape == (B, T, D_MODEL) and out.dtype == DTYPE
    assert bool(jnp.all(jnp.isfinite(out.astype(jnp.float32))))
    print("KERNEL_OK")
</pallas_src>

<mosaic_0001>
module attributes {stable_mosaic.version = 11 : i64} {
  func.func @_ln_matmul_kernel(%arg0: i32, %arg1: i32, %arg2: memref<16x128xbf16, #tpu.memory_space<vmem>>, %arg3: memref<1x128xbf16, #tpu.memory_space<vmem>>, %arg4: memref<1x128xbf16, #tpu.memory_space<vmem>>, %arg5: memref<128x256xbf16, #tpu.memory_space<vmem>>, %arg6: memref<1x256xbf16, #tpu.memory_space<vmem>>, %arg7: memref<16x256xbf16, #tpu.memory_space<vmem>>, %arg8: memref<16x128xbf16, #tpu.memory_space<vmem>>) attributes {dimension_semantics = [#tpu.dimension_semantics<parallel>, #tpu.dimension_semantics<arbitrary>], iteration_bounds = array<i64: 1, 2>, scalar_prefetch = 0 : i64, scratch_operands = 1 : i64, tpu.core_type = #tpu.core_type<tc>, window_params = [{transform_indices = @transform_0, window_bounds = array<i64: 16, 128>}, {pipeline_mode = #tpu.pipeline_mode<synchronous>, transform_indices = @transform_1, window_bounds = array<i64: 1, 128>}, {pipeline_mode = #tpu.pipeline_mode<synchronous>, transform_indices = @transform_2, window_bounds = array<i64: 1, 128>}, {transform_indices = @transform_3, window_bounds = array<i64: 128, 256>}, {transform_indices = @transform_4, window_bounds = array<i64: 1, 256>}, {transform_indices = @transform_5, window_bounds = array<i64: 16, 256>}]} {
    %c0_i32 = arith.constant 0 : i32
    %0 = arith.cmpi eq, %arg1, %c0_i32 : i32
    %1 = arith.extui %0 : i1 to i32
    %c0_i32_0 = arith.constant 0 : i32
    %2 = arith.cmpi ne, %1, %c0_i32_0 : i32
    scf.if %2 {
      %c0_8 = arith.constant 0 : index
      %c0_9 = arith.constant 0 : index
      %12 = vector.load %arg2[%c0_8, %c0_9] : memref<16x128xbf16, #tpu.memory_space<vmem>>, vector<16x128xbf16>
      %13 = arith.extf %12 : vector<16x128xbf16> to vector<16x128xf32>
      %cst_10 = arith.constant dense<0.000000e+00> : vector<16xf32>
      %14 = vector.multi_reduction <add>, %13, %cst_10 [1] : vector<16x128xf32> to vector<16xf32>
      %15 = vector.shape_cast %14 : vector<16xf32> to vector<16x1xf32>
      %cst_11 = arith.constant 1.280000e+02 : f32
      %16 = vector.broadcast %cst_11 : f32 to vector<16x1xf32>
      %17 = arith.divf %15, %16 : vector<16x1xf32>
      %18 = vector.broadcast %17 : vector<16x1xf32> to vector<16x128xf32>
      %19 = arith.subf %13, %18 : vector<16x128xf32>
      %20 = arith.mulf %19, %19 : vector<16x128xf32>
      %cst_12 = arith.constant dense<0.000000e+00> : vector<16xf32>
      %21 = vector.multi_reduction <add>, %20, %cst_12 [1] : vector<16x128xf32> to vector<16xf32>
      %22 = vector.shape_cast %21 : vector<16xf32> to vector<16x1xf32>
      %cst_13 = arith.constant 1.280000e+02 : f32
      %23 = vector.broadcast %cst_13 : f32 to vector<16x1xf32>
      %24 = arith.divf %22, %23 : vector<16x1xf32>
      %25 = vector.broadcast %17 : vector<16x1xf32> to vector<16x128xf32>
      %26 = arith.subf %13, %25 : vector<16x128xf32>
      %cst_14 = arith.constant 9.99999997E-7 : f32
      %27 = vector.broadcast %cst_14 : f32 to vector<16x1xf32>
      %28 = arith.addf %24, %27 : vector<16x1xf32>
      %29 = math.rsqrt %28 : vector<16x1xf32>
      %30 = vector.broadcast %29 : vector<16x1xf32> to vector<16x128xf32>
      %31 = arith.mulf %26, %30 : vector<16x128xf32>
      %c0_15 = arith.constant 0 : index
      %c0_16 = arith.constant 0 : index
      %32 = vector.load %arg3[%c0_15, %c0_16] : memref<1x128xbf16, #tpu.memory_space<vmem>>, vector<1x128xbf16>
      %33 = arith.extf %32 : vector<1x128xbf16> to vector<1x128xf32>
      %34 = vector.broadcast %33 : vector<1x128xf32> to vector<16x128xf32>
      %35 = arith.mulf %31, %34 : vector<16x128xf32>
      %c0_17 = arith.constant 0 : index
      %c0_18 = arith.constant 0 : index
      %36 = vector.load %arg4[%c0_17, %c0_18] : memref<1x128xbf16, #tpu.memory_space<vmem>>, vector<1x128xbf16>
      %37 = arith.extf %36 : vector<1x128xbf16> to vector<1x128xf32>
      %38 = vector.broadcast %37 : vector<1x128xf32> to vector<16x128xf32>
      %39 = arith.addf %35, %38 : vector<16x128xf32>
      %40 = arith.truncf %39 : vector<16x128xf32> to vector<16x128xbf16>
      %c0_19 = arith.constant 0 : index
      %c0_20 = arith.constant 0 : index
      %41 = vector.load %arg8[%c0_19, %c0_20] : memref<16x128xbf16, #tpu.memory_space<vmem>>, vector<16x128xbf16>
      tpu.vector_store %arg8[%c0_19, %c0_20], %40 {strides = array<i32>} : memref<16x128xbf16, #tpu.memory_space<vmem>>, vector<16x128xbf16>,
    } else {
    }
    %c0 = arith.constant 0 : index
    %c0_1 = arith.constant 0 : index
    %3 = vector.load %arg8[%c0, %c0_1] : memref<16x128xbf16, #tpu.memory_space<vmem>>, vector<16x128xbf16>
    %c0_2 = arith.constant 0 : index
    %c0_3 = arith.constant 0 : index
    %4 = vector.load %arg5[%c0_2, %c0_3] : memref<128x256xbf16, #tpu.memory_space<vmem>>, vector<128x256xbf16>
    %cst = arith.constant dense<0.000000e+00> : vector<16x256xf32>
    %5 = tpu.matmul %3, %4, %cst {dimension_numbers = #tpu.dot_dimension_numbers<[1], [0], [0], [1], [0, 0, 1, 1], [], []>} : vector<16x128xbf16>, vector<128x256xbf16>, vector<16x256xf32> -> vector<16x256xf32>
    %c0_4 = arith.constant 0 : index
    %c0_5 = arith.constant 0 : index
    %6 = vector.load %arg6[%c0_4, %c0_5] : memref<1x256xbf16, #tpu.memory_space<vmem>>, vector<1x256xbf16>
    %7 = arith.extf %6 : vector<1x256xbf16> to vector<1x256xf32>
    %8 = vector.broadcast %7 : vector<1x256xf32> to vector<16x256xf32>
    %9 = arith.addf %5, %8 : vector<16x256xf32>
    %10 = arith.truncf %9 : vector<16x256xf32> to vector<16x256xbf16>
    %c0_6 = arith.constant 0 : index
    %c0_7 = arith.constant 0 : index
    %11 = vector.load %arg7[%c0_6, %c0_7] : memref<16x256xbf16, #tpu.memory_space<vmem>>, vector<16x256xbf16>
    tpu.vector_store %arg7[%c0_6, %c0_7], %10 {strides = array<i32>} : memref<16x256xbf16, #tpu.memory_space<vmem>>, vector<16x256xbf16>,
    return
  }
  func.func @transform_0(%arg0: i32, %arg1: i32) -> (i32, i32) {
    %c0_i32 = arith.constant 0 : i32
    %c0_i32_0 = arith.constant 0 : i32
    return %arg0, %c0_i32 : i32, i32
  }
  func.func @transform_1(%arg0: i32, %arg1: i32) -> (i32, i32) {
    %c0_i32 = arith.constant 0 : i32
    %c0_i32_0 = arith.constant 0 : i32
    %c0_i32_1 = arith.constant 0 : i32
    return %c0_i32, %c0_i32_0 : i32, i32
  }
  func.func @transform_2(%arg0: i32, %arg1: i32) -> (i32, i32) {
    %c0_i32 = arith.constant 0 : i32
    %c0_i32_0 = arith.constant 0 : i32
    %c0_i32_1 = arith.constant 0 : i32
    return %c0_i32, %c0_i32_0 : i32, i32
  }
  func.func @transform_3(%arg0: i32, %arg1: i32) -> (i32, i32) {
    %c0_i32 = arith.constant 0 : i32
    %c0_i32_0 = arith.constant 0 : i32
    return %c0_i32, %arg1 : i32, i32
  }
  func.func @transform_4(%arg0: i32, %arg1: i32) -> (i32, i32) {
    %c0_i32 = arith.constant 0 : i32
    %c0_i32_0 = arith.constant 0 : i32
    return %c0_i32, %arg1 : i32, i32
  }
  func.func @transform_5(%arg0: i32, %arg1: i32) -> (i32, i32) {
    %c0_i32 = arith.constant 0 : i32
    return %arg0, %arg1 : i32, i32
  }
}

module attributes {stable_mosaic.version = 11 : i64} {
  func.func @_mha_kernel(%arg0: i32, %arg1: i32, %arg2: memref<1x8x128xbf16, #tpu.memory_space<vmem>>, %arg3: memref<1x8x128xbf16, #tpu.memory_space<vmem>>, %arg4: memref<1x8x128xbf16, #tpu.memory_space<vmem>>, %arg5: memref<1x1x8xf32, #tpu.memory_space<vmem>>, %arg6: memref<1x8x128xbf16, #tpu.memory_space<vmem>>) attributes {dimension_semantics = [#tpu.dimension_semantics<parallel>, #tpu.dimension_semantics<parallel>], iteration_bounds = array<i64: 2, 1>, scalar_prefetch = 0 : i64, scratch_operands = 0 : i64, tpu.core_type = #tpu.core_type<tc>, window_params = [{transform_indices = @transform_0, window_bounds = array<i64: 1, 8, 128>}, {transform_indices = @transform_1, window_bounds = array<i64: 1, 8, 128>}, {transform_indices = @transform_2, window_bounds = array<i64: 1, 8, 128>}, {transform_indices = @transform_3, window_bounds = array<i64: 1, 1, 8>}, {transform_indices = @transform_4, window_bounds = array<i64: 1, 8, 128>}]} {
    %c0 = arith.constant 0 : index
    %c0_0 = arith.constant 0 : index
    %c0_1 = arith.constant 0 : index
    %0 = vector.load %arg5[%c0, %c0_0, %c0_1] : memref<1x1x8xf32, #tpu.memory_space<vmem>>, vector<1x1x8xf32>
    %1 = vector.shape_cast %0 : vector<1x1x8xf32> to vector<1x8xf32>
    %c0_2 = arith.constant 0 : index
    %c0_3 = arith.constant 0 : index
    %c0_4 = arith.constant 0 : index
    %2 = vector.load %arg2[%c0_2, %c0_3, %c0_4] : memref<1x8x128xbf16, #tpu.memory_space<vmem>>, vector<1x8x32xbf16>
    %3 = vector.shape_cast %2 : vector<1x8x32xbf16> to vector<8x32xbf16>
    %c0_5 = arith.constant 0 : index
    %c0_6 = arith.constant 0 : index
    %c0_7 = arith.constant 0 : index
    %4 = vector.load %arg3[%c0_5, %c0_6, %c0_7] : memref<1x8x128xbf16, #tpu.memory_space<vmem>>, vector<1x8x32xbf16>
    %5 = vector.shape_cast %4 : vector<1x8x32xbf16> to vector<8x32xbf16>
    %c0_8 = arith.constant 0 : index
    %c0_9 = arith.constant 0 : index
    %c0_10 = arith.constant 0 : index
    %6 = vector.load %arg4[%c0_8, %c0_9, %c0_10] : memref<1x8x128xbf16, #tpu.memory_space<vmem>>, vector<1x8x32xbf16>
    %7 = vector.shape_cast %6 : vector<1x8x32xbf16> to vector<8x32xbf16>
    %cst = arith.constant dense<0.000000e+00> : vector<8x8xf32>
    %8 = tpu.matmul %3, %5, %cst {dimension_numbers = #tpu.dot_dimension_numbers<[1], [1], [0], [0], [0, 0, 1, 0], [], []>} : vector<8x32xbf16>, vector<8x32xbf16>, vector<8x8xf32> -> vector<8x8xf32>
    %cst_11 = arith.constant 0.176776692 : f32
    %9 = vector.broadcast %cst_11 : f32 to vector<8x8xf32>
    %10 = arith.mulf %8, %9 : vector<8x8xf32>
    %11 = vector.broadcast %1 : vector<1x8xf32> to vector<8x8xf32>
    %12 = arith.addf %10, %11 : vector<8x8xf32>
    %cst_12 = arith.constant dense<0xFF800000> : vector<8xf32>
    %13 = vector.multi_reduction <maximumf>, %12, %cst_12 [1] : vector<8x8xf32> to vector<8xf32>
    %14 = vector.shape_cast %13 : vector<8xf32> to vector<8x1xf32>
    %15 = vector.broadcast %14 : vector<8x1xf32> to vector<8x8xf32>
    %16 = arith.subf %12, %15 : vector<8x8xf32>
    %17 = math.exp %16 : vector<8x8xf32>
    %cst_13 = arith.constant dense<0.000000e+00> : vector<8xf32>
    %18 = vector.multi_reduction <add>, %17, %cst_13 [1] : vector<8x8xf32> to vector<8xf32>
    %19 = vector.shape_cast %18 : vector<8xf32> to vector<8x1xf32>
    %20 = tpu.reciprocal %19 {approx = true} : vector<8x1xf32> -> vector<8x1xf32>
    %21 = vector.broadcast %20 : vector<8x1xf32> to vector<8x8xf32>
    %22 = arith.mulf %17, %21 : vector<8x8xf32>
    %23 = arith.truncf %22 : vector<8x8xf32> to vector<8x8xbf16>
    %cst_14 = arith.constant dense<0.000000e+00> : vector<8x32xf32>
    %24 = tpu.matmul %23, %7, %cst_14 {dimension_numbers = #tpu.dot_dimension_numbers<[1], [0], [0], [1], [0, 0, 1, 1], [], []>} : vector<8x8xbf16>, vector<8x32xbf16>, vector<8x32xf32> -> vector<8x32xf32>
    %c0_15 = arith.constant 0 : index
    %c0_16 = arith.constant 0 : index
    %c32 = arith.constant 32 : index
    %25 = vector.load %arg2[%c0_15, %c0_16, %c32] : memref<1x8x128xbf16, #tpu.memory_space<vmem>>, vector<1x8x32xbf16>
    %26 = vector.shape_cast %25 : vector<1x8x32xbf16> to vector<8x32xbf16>
    %c0_17 = arith.constant 0 : index
    %c0_18 = arith.constant 0 : index
    %c32_19 = arith.constant 32 : index
    %27 = vector.load %arg3[%c0_17, %c0_18, %c32_19] : memref<1x8x128xbf16, #tpu.memory_space<vmem>>, vector<1x8x32xbf16>
    %28 = vector.shape_cast %27 : vector<1x8x32xbf16> to vector<8x32xbf16>
    %c0_20 = arith.constant 0 : index
    %c0_21 = arith.constant 0 : index
    %c32_22 = arith.constant 32 : index
    %29 = vector.load %arg4[%c0_20, %c0_21, %c32_22] : memref<1x8x128xbf16, #tpu.memory_space<vmem>>, vector<1x8x32xbf16>
    %30 = vector.shape_cast %29 : vector<1x8x32xbf16> to vector<8x32xbf16>
    %cst_23 = arith.constant dense<0.000000e+00> : vector<8x8xf32>
    %31 = tpu.matmul %26, %28, %cst_23 {dimension_numbers = #tpu.dot_dimension_numbers<[1], [1], [0], [0], [0, 0, 1, 0], [], []>} : vector<8x32xbf16>, vector<8x32xbf16>, vector<8x8xf32> -> vector<8x8xf32>
    %cst_24 = arith.constant 0.176776692 : f32
    %32 = vector.broadcast %cst_24 : f32 to vector<8x8xf32>
    %33 = arith.mulf %31, %32 : vector<8x8xf32>
    %34 = vector.broadcast %1 : vector<1x8xf32> to vector<8x8xf32>
    %35 = arith.addf %33, %34 : vector<8x8xf32>
    %cst_25 = arith.constant dense<0xFF800000> : vector<8xf32>
    %36 = vector.multi_reduction <maximumf>, %35, %cst_25 [1] : vector<8x8xf32> to vector<8xf32>
    %37 = vector.shape_cast %36 : vector<8xf32> to vector<8x1xf32>
    %38 = vector.broadcast %37 : vector<8x1xf32> to vector<8x8xf32>
    %39 = arith.subf %35, %38 : vector<8x8xf32>
    %40 = math.exp %39 : vector<8x8xf32>
    %cst_26 = arith.constant dense<0.000000e+00> : vector<8xf32>
    %41 = vector.multi_reduction <add>, %40, %cst_26 [1] : vector<8x8xf32> to vector<8xf32>
    %42 = vector.shape_cast %41 : vector<8xf32> to vector<8x1xf32>
    %43 = tpu.reciprocal %42 {approx = true} : vector<8x1xf32> -> vector<8x1xf32>
    %44 = vector.broadcast %43 : vector<8x1xf32> to vector<8x8xf32>
    %45 = arith.mulf %40, %44 : vector<8x8xf32>
    %46 = arith.truncf %45 : vector<8x8xf32> to vector<8x8xbf16>
    %cst_27 = arith.constant dense<0.000000e+00> : vector<8x32xf32>
    %47 = tpu.matmul %46, %30, %cst_27 {dimension_numbers = #tpu.dot_dimension_numbers<[1], [0], [0], [1], [0, 0, 1, 1], [], []>} : vector<8x8xbf16>, vector<8x32xbf16>, vector<8x32xf32> -> vector<8x32xf32>
    %c0_28 = arith.constant 0 : index
    %c0_29 = arith.constant 0 : index
    %c64 = arith.constant 64 : index
    %48 = vector.load %arg2[%c0_28, %c0_29, %c64] : memref<1x8x128xbf16, #tpu.memory_space<vmem>>, vector<1x8x32xbf16>
    %49 = vector.shape_cast %48 : vector<1x8x32xbf16> to vector<8x32xbf16>
    %c0_30 = arith.constant 0 : index
    %c0_31 = arith.constant 0 : index
    %c64_32 = arith.constant 64 : index
    %50 = vector.load %arg3[%c0_30, %c0_31, %c64_32] : memref<1x8x128xbf16, #tpu.memory_space<vmem>>, vector<1x8x32xbf16>
    %51 = vector.shape_cast %50 : vector<1x8x32xbf16> to vector<8x32xbf16>
    %c0_33 = arith.constant 0 : index
    %c0_34 = arith.constant 0 : index
    %c64_35 = arith.constant 64 : index
    %52 = vector.load %arg4[%c0_33, %c0_34, %c64_35] : memref<1x8x128xbf16, #tpu.memory_space<vmem>>, vector<1x8x32xbf16>
    %53 = vector.shape_cast %52 : vector<1x8x32xbf16> to vector<8x32xbf16>
    %cst_36 = arith.constant dense<0.000000e+00> : vector<8x8xf32>
    %54 = tpu.matmul %49, %51, %cst_36 {dimension_numbers = #tpu.dot_dimension_numbers<[1], [1], [0], [0], [0, 0, 1, 0], [], []>} : vector<8x32xbf16>, vector<8x32xbf16>, vector<8x8xf32> -> vector<8x8xf32>
    %cst_37 = arith.constant 0.176776692 : f32
    %55 = vector.broadcast %cst_37 : f32 to vector<8x8xf32>
    %56 = arith.mulf %54, %55 : vector<8x8xf32>
    %57 = vector.broadcast %1 : vector<1x8xf32> to vector<8x8xf32>
    %58 = arith.addf %56, %57 : vector<8x8xf32>
    %cst_38 = arith.constant dense<0xFF800000> : vector<8xf32>
    %59 = vector.multi_reduction <maximumf>, %58, %cst_38 [1] : vector<8x8xf32> to vector<8xf32>
    %60 = vector.shape_cast %59 : vector<8xf32> to vector<8x1xf32>
    %61 = vector.broadcast %60 : vector<8x1xf32> to vector<8x8xf32>
    %62 = arith.subf %58, %61 : vector<8x8xf32>
    %63 = math.exp %62 : vector<8x8xf32>
    %cst_39 = arith.constant dense<0.000000e+00> : vector<8xf32>
    %64 = vector.multi_reduction <add>, %63, %cst_39 [1] : vector<8x8xf32> to vector<8xf32>
    %65 = vector.shape_cast %64 : vector<8xf32> to vector<8x1xf32>
    %66 = tpu.reciprocal %65 {approx = true} : vector<8x1xf32> -> vector<8x1xf32>
    %67 = vector.broadcast %66 : vector<8x1xf32> to vector<8x8xf32>
    %68 = arith.mulf %63, %67 : vector<8x8xf32>
    %69 = arith.truncf %68 : vector<8x8xf32> to vector<8x8xbf16>
    %cst_40 = arith.constant dense<0.000000e+00> : vector<8x32xf32>
    %70 = tpu.matmul %69, %53, %cst_40 {dimension_numbers = #tpu.dot_dimension_numbers<[1], [0], [0], [1], [0, 0, 1, 1], [], []>} : vector<8x8xbf16>, vector<8x32xbf16>, vector<8x32xf32> -> vector<8x32xf32>
    %c0_41 = arith.constant 0 : index
    %c0_42 = arith.constant 0 : index
    %c96 = arith.constant 96 : index
    %71 = vector.load %arg2[%c0_41, %c0_42, %c96] : memref<1x8x128xbf16, #tpu.memory_space<vmem>>, vector<1x8x32xbf16>
    %72 = vector.shape_cast %71 : vector<1x8x32xbf16> to vector<8x32xbf16>
    %c0_43 = arith.constant 0 : index
    %c0_44 = arith.constant 0 : index
    %c96_45 = arith.constant 96 : index
    %73 = vector.load %arg3[%c0_43, %c0_44, %c96_45] : memref<1x8x128xbf16, #tpu.memory_space<vmem>>, vector<1x8x32xbf16>
    %74 = vector.shape_cast %73 : vector<1x8x32xbf16> to vector<8x32xbf16>
    %c0_46 = arith.constant 0 : index
    %c0_47 = arith.constant 0 : index
    %c96_48 = arith.constant 96 : index
    %75 = vector.load %arg4[%c0_46, %c0_47, %c96_48] : memref<1x8x128xbf16, #tpu.memory_space<vmem>>, vector<1x8x32xbf16>
    %76 = vector.shape_cast %75 : vector<1x8x32xbf16> to vector<8x32xbf16>
    %cst_49 = arith.constant dense<0.000000e+00> : vector<8x8xf32>
    %77 = tpu.matmul %72, %74, %cst_49 {dimension_numbers = #tpu.dot_dimension_numbers<[1], [1], [0], [0], [0, 0, 1, 0], [], []>} : vector<8x32xbf16>, vector<8x32xbf16>, vector<8x8xf32> -> vector<8x8xf32>
    %cst_50 = arith.constant 0.176776692 : f32
    %78 = vector.broadcast %cst_50 : f32 to vector<8x8xf32>
    %79 = arith.mulf %77, %78 : vector<8x8xf32>
    %80 = vector.broadcast %1 : vector<1x8xf32> to vector<8x8xf32>
    %81 = arith.addf %79, %80 : vector<8x8xf32>
    %cst_51 = arith.constant dense<0xFF800000> : vector<8xf32>
    %82 = vector.multi_reduction <maximumf>, %81, %cst_51 [1] : vector<8x8xf32> to vector<8xf32>
    %83 = vector.shape_cast %82 : vector<8xf32> to vector<8x1xf32>
    %84 = vector.broadcast %83 : vector<8x1xf32> to vector<8x8xf32>
    %85 = arith.subf %81, %84 : vector<8x8xf32>
    %86 = math.exp %85 : vector<8x8xf32>
    %cst_52 = arith.constant dense<0.000000e+00> : vector<8xf32>
    %87 = vector.multi_reduction <add>, %86, %cst_52 [1] : vector<8x8xf32> to vector<8xf32>
    %88 = vector.shape_cast %87 : vector<8xf32> to vector<8x1xf32>
    %89 = tpu.reciprocal %88 {approx = true} : vector<8x1xf32> -> vector<8x1xf32>
    %90 = vector.broadcast %89 : vector<8x1xf32> to vector<8x8xf32>
    %91 = arith.mulf %86, %90 : vector<8x8xf32>
    %92 = arith.truncf %91 : vector<8x8xf32> to vector<8x8xbf16>
    %cst_53 = arith.constant dense<0.000000e+00> : vector<8x32xf32>
    %93 = tpu.matmul %92, %76, %cst_53 {dimension_numbers = #tpu.dot_dimension_numbers<[1], [0], [0], [1], [0, 0, 1, 1], [], []>} : vector<8x8xbf16>, vector<8x32xbf16>, vector<8x32xf32> -> vector<8x32xf32>
    %94 = tpu.concatenate %24, %47, %70, %93 in 1 : vector<8x32xf32>, vector<8x32xf32>, vector<8x32xf32>, vector<8x32xf32> -> vector<8x128xf32>
    %95 = arith.truncf %94 : vector<8x128xf32> to vector<8x128xbf16>
    %c0_54 = arith.constant 0 : index
    %c0_55 = arith.constant 0 : index
    %c0_56 = arith.constant 0 : index
    %96 = vector.load %arg6[%c0_54, %c0_55, %c0_56] : memref<1x8x128xbf16, #tpu.memory_space<vmem>>, vector<1x8x128xbf16>
    %97 = vector.shape_cast %96 : vector<1x8x128xbf16> to vector<8x128xbf16>
    %98 = vector.shape_cast %95 : vector<8x128xbf16> to vector<1x8x128xbf16>
    tpu.vector_store %arg6[%c0_54, %c0_55, %c0_56], %98 {strides = array<i32>} : memref<1x8x128xbf16, #tpu.memory_space<vmem>>, vector<1x8x128xbf16>,
    return
  }
  func.func @transform_0(%arg0: i32, %arg1: i32) -> (i32, i32, i32) {
    %c0_i32 = arith.constant 0 : i32
    %c0_i32_0 = arith.constant 0 : i32
    return %arg0, %arg1, %c0_i32 : i32, i32, i32
  }
  func.func @transform_1(%arg0: i32, %arg1: i32) -> (i32, i32, i32) {
    %c0_i32 = arith.constant 0 : i32
    %c1_i32 = arith.constant 1 : i32
    %c0_i32_0 = arith.constant 0 : i32
    return %arg0, %c0_i32, %c1_i32 : i32, i32, i32
  }
  func.func @transform_2(%arg0: i32, %arg1: i32) -> (i32, i32, i32) {
    %c0_i32 = arith.constant 0 : i32
    %c2_i32 = arith.constant 2 : i32
    %c0_i32_0 = arith.constant 0 : i32
    return %arg0, %c0_i32, %c2_i32 : i32, i32, i32
  }
  func.func @transform_3(%arg0: i32, %arg1: i32) -> (i32, i32, i32) {
    %c0_i32 = arith.constant 0 : i32
    %c0_i32_0 = arith.constant 0 : i32
    %c0_i32_1 = arith.constant 0 : i32
    return %arg0, %c0_i32, %c0_i32_0 : i32, i32, i32
  }
  func.func @transform_4(%arg0: i32, %arg1: i32) -> (i32, i32, i32) {
    %c0_i32 = arith.constant 0 : i32
    %c0_i32_0 = arith.constant 0 : i32
    return %arg0, %arg1, %c0_i32 : i32, i32, i32
  }
}

module attributes {stable_mosaic.version = 11 : i64} {
  func.func @_matmul_kernel(%arg0: i32, %arg1: i32, %arg2: i32, %arg3: memref<16x128xbf16, #tpu.memory_space<vmem>>, %arg4: memref<128x128xbf16, #tpu.memory_space<vmem>>, %arg5: memref<1x128xbf16, #tpu.memory_space<vmem>>, %arg6: memref<16x128xbf16, #tpu.memory_space<vmem>>, %arg7: memref<16x128xbf16, #tpu.memory_space<vmem>>, %arg8: memref<16x128xf32, #tpu.memory_space<vmem>>) attributes {dimension_semantics = [#tpu.dimension_semantics<parallel>, #tpu.dimension_semantics<parallel>, #tpu.dimension_semantics<arbitrary>], iteration_bounds = array<i64: 1, 1, 1>, scalar_prefetch = 0 : i64, scratch_operands = 1 : i64, tpu.core_type = #tpu.core_type<tc>, window_params = [{transform_indices = @transform_0, window_bounds = array<i64: 16, 128>}, {transform_indices = @transform_1, window_bounds = array<i64: 128, 128>}, {transform_indices = @transform_2, window_bounds = array<i64: 1, 128>}, {transform_indices = @transform_3, window_bounds = array<i64: 16, 128>}, {transform_indices = @transform_4, window_bounds = array<i64: 16, 128>}]} {
    %c0_i32 = arith.constant 0 : i32
    %0 = arith.cmpi eq, %arg2, %c0_i32 : i32
    %1 = arith.extui %0 : i1 to i32
    %c0_i32_0 = arith.constant 0 : i32
    %2 = arith.cmpi ne, %1, %c0_i32_0 : i32
    scf.if %2 {
      %cst_10 = arith.constant 0.000000e+00 : f32
      %12 = vector.broadcast %cst_10 : f32 to vector<16x128xf32>
      %c0_11 = arith.constant 0 : index
      %c0_12 = arith.constant 0 : index
      %13 = vector.load %arg8[%c0_11, %c0_12] : memref<16x128xf32, #tpu.memory_space<vmem>>, vector<16x128xf32>
      tpu.vector_store %arg8[%c0_11, %c0_12], %12 {strides = array<i32>} : memref<16x128xf32, #tpu.memory_space<vmem>>, vector<16x128xf32>,
    } else {
    }
    %c0 = arith.constant 0 : index
    %c0_1 = arith.constant 0 : index
    %3 = vector.load %arg8[%c0, %c0_1] : memref<16x128xf32, #tpu.memory_space<vmem>>, vector<16x128xf32>
    %c0_2 = arith.constant 0 : index
    %c0_3 = arith.constant 0 : index
    %4 = vector.load %arg3[%c0_2, %c0_3] : memref<16x128xbf16, #tpu.memory_space<vmem>>, vector<16x128xbf16>
    %c0_4 = arith.constant 0 : index
    %c0_5 = arith.constant 0 : index
    %5 = vector.load %arg4[%c0_4, %c0_5] : memref<128x128xbf16, #tpu.memory_space<vmem>>, vector<128x128xbf16>
    %cst = arith.constant dense<0.000000e+00> : vector<16x128xf32>
    %6 = tpu.matmul %4, %5, %cst {dimension_numbers = #tpu.dot_dimension_numbers<[1], [0], [0], [1], [0, 0, 1, 1], [], []>} : vector<16x128xbf16>, vector<128x128xbf16>, vector<16x128xf32> -> vector<16x128xf32>
    %7 = arith.addf %3, %6 : vector<16x128xf32>
    %c0_6 = arith.constant 0 : index
    %c0_7 = arith.constant 0 : index
    %8 = vector.load %arg8[%c0_6, %c0_7] : memref<16x128xf32, #tpu.memory_space<vmem>>, vector<16x128xf32>
    tpu.vector_store %arg8[%c0_6, %c0_7], %7 {strides = array<i32>} : memref<16x128xf32, #tpu.memory_space<vmem>>, vector<16x128xf32>,
    %c0_i32_8 = arith.constant 0 : i32
    %9 = arith.cmpi eq, %arg2, %c0_i32_8 : i32
    %10 = arith.extui %9 : i1 to i32
    %c0_i32_9 = arith.constant 0 : i32
    %11 = arith.cmpi ne, %10, %c0_i32_9 : i32
    scf.if %11 {
      %c0_10 = arith.constant 0 : index
      %c0_11 = arith.constant 0 : index
      %12 = vector.load %arg8[%c0_10, %c0_11] : memref<16x128xf32, #tpu.memory_space<vmem>>, vector<16x128xf32>
      %c0_12 = arith.constant 0 : index
      %c0_13 = arith.constant 0 : index
      %13 = vector.load %arg5[%c0_12, %c0_13] : memref<1x128xbf16, #tpu.memory_space<vmem>>, vector<1x128xbf16>
      %14 = arith.extf %13 : vector<1x128xbf16> to vector<1x128xf32>
      %15 = vector.broadcast %14 : vector<1x128xf32> to vector<16x128xf32>
      %16 = arith.addf %12, %15 : vector<16x128xf32>
      %c0_14 = arith.constant 0 : index
      %c0_15 = arith.constant 0 : index
      %17 = vector.load %arg6[%c0_14, %c0_15] : memref<16x128xbf16, #tpu.memory_space<vmem>>, vector<16x128xbf16>
      %18 = arith.extf %17 : vector<16x128xbf16> to vector<16x128xf32>
      %19 = arith.addf %16, %18 : vector<16x128xf32>
      %20 = arith.truncf %19 : vector<16x128xf32> to vector<16x128xbf16>
      %c0_16 = arith.constant 0 : index
      %c0_17 = arith.constant 0 : index
      %21 = vector.load %arg7[%c0_16, %c0_17] : memref<16x128xbf16, #tpu.memory_space<vmem>>, vector<16x128xbf16>
      tpu.vector_store %arg7[%c0_16, %c0_17], %20 {strides = array<i32>} : memref<16x128xbf16, #tpu.memory_space<vmem>>, vector<16x128xbf16>,
    } else {
    }
    return
  }
  func.func @transform_0(%arg0: i32, %arg1: i32, %arg2: i32) -> (i32, i32) {
    %c0_i32 = arith.constant 0 : i32
    return %arg0, %arg2 : i32, i32
  }
  func.func @transform_1(%arg0: i32, %arg1: i32, %arg2: i32) -> (i32, i32) {
    %c0_i32 = arith.constant 0 : i32
    return %arg2, %arg1 : i32, i32
  }
  func.func @transform_2(%arg0: i32, %arg1: i32, %arg2: i32) -> (i32, i32) {
    %c0_i32 = arith.constant 0 : i32
    %c0_i32_0 = arith.constant 0 : i32
    return %c0_i32, %arg1 : i32, i32
  }
  func.func @transform_3(%arg0: i32, %arg1: i32, %arg2: i32) -> (i32, i32) {
    %c0_i32 = arith.constant 0 : i32
    return %arg0, %arg1 : i32, i32
  }
  func.func @transform_4(%arg0: i32, %arg1: i32, %arg2: i32) -> (i32, i32) {
    %c0_i32 = arith.constant 0 : i32
    return %arg0, %arg1 : i32, i32
  }
}

module attributes {stable_mosaic.version = 11 : i64} {
  func.func @_ffn_kernel(%arg0: i32, %arg1: i32, %arg2: memref<16x128xbf16, #tpu.memory_space<vmem>>, %arg3: memref<1x128xbf16, #tpu.memory_space<vmem>>, %arg4: memref<1x128xbf16, #tpu.memory_space<vmem>>, %arg5: memref<128x256xbf16, #tpu.memory_space<vmem>>, %arg6: memref<1x256xbf16, #tpu.memory_space<vmem>>, %arg7: memref<256x128xbf16, #tpu.memory_space<vmem>>, %arg8: memref<1x128xbf16, #tpu.memory_space<vmem>>, %arg9: memref<16x128xbf16, #tpu.memory_space<vmem>>, %arg10: memref<16x128xbf16, #tpu.memory_space<vmem>>, %arg11: memref<16x128xf32, #tpu.memory_space<vmem>>) attributes {dimension_semantics = [#tpu.dimension_semantics<parallel>, #tpu.dimension_semantics<arbitrary>], iteration_bounds = array<i64: 1, 1>, scalar_prefetch = 0 : i64, scratch_operands = 2 : i64, tpu.core_type = #tpu.core_type<tc>, window_params = [{transform_indices = @transform_0, window_bounds = array<i64: 16, 128>}, {pipeline_mode = #tpu.pipeline_mode<synchronous>, transform_indices = @transform_1, window_bounds = array<i64: 1, 128>}, {pipeline_mode = #tpu.pipeline_mode<synchronous>, transform_indices = @transform_2, window_bounds = array<i64: 1, 128>}, {transform_indices = @transform_3, window_bounds = array<i64: 128, 256>}, {transform_indices = @transform_4, window_bounds = array<i64: 1, 256>}, {transform_indices = @transform_5, window_bounds = array<i64: 256, 128>}, {pipeline_mode = #tpu.pipeline_mode<synchronous>, transform_indices = @transform_6, window_bounds = array<i64: 1, 128>}, {transform_indices = @transform_7, window_bounds = array<i64: 16, 128>}]} {
    %c0_i32 = arith.constant 0 : i32
    %0 = arith.cmpi eq, %arg1, %c0_i32 : i32
    %1 = arith.extui %0 : i1 to i32
    %c0_i32_0 = arith.constant 0 : i32
    %2 = arith.cmpi ne, %1, %c0_i32_0 : i32
    scf.if %2 {
      %c0_16 = arith.constant 0 : index
      %c0_17 = arith.constant 0 : index
      %21 = vector.load %arg2[%c0_16, %c0_17] : memref<16x128xbf16, #tpu.memory_space<vmem>>, vector<16x128xbf16>
      %22 = arith.extf %21 : vector<16x128xbf16> to vector<16x128xf32>
      %cst_18 = arith.constant dense<0.000000e+00> : vector<16xf32>
      %23 = vector.multi_reduction <add>, %22, %cst_18 [1] : vector<16x128xf32> to vector<16xf32>
      %24 = vector.shape_cast %23 : vector<16xf32> to vector<16x1xf32>
      %cst_19 = arith.constant 1.280000e+02 : f32
      %25 = vector.broadcast %cst_19 : f32 to vector<16x1xf32>
      %26 = arith.divf %24, %25 : vector<16x1xf32>
      %27 = vector.broadcast %26 : vector<16x1xf32> to vector<16x128xf32>
      %28 = arith.subf %22, %27 : vector<16x128xf32>
      %29 = arith.mulf %28, %28 : vector<16x128xf32>
      %cst_20 = arith.constant dense<0.000000e+00> : vector<16xf32>
      %30 = vector.multi_reduction <add>, %29, %cst_20 [1] : vector<16x128xf32> to vector<16xf32>
      %31 = vector.shape_cast %30 : vector<16xf32> to vector<16x1xf32>
      %cst_21 = arith.constant 1.280000e+02 : f32
      %32 = vector.broadcast %cst_21 : f32 to vector<16x1xf32>
      %33 = arith.divf %31, %32 : vector<16x1xf32>
      %34 = vector.broadcast %26 : vector<16x1xf32> to vector<16x128xf32>
      %35 = arith.subf %22, %34 : vector<16x128xf32>
      %cst_22 = arith.constant 9.99999997E-7 : f32
      %36 = vector.broadcast %cst_22 : f32 to vector<16x1xf32>
      %37 = arith.addf %33, %36 : vector<16x1xf32>
      %38 = math.rsqrt %37 : vector<16x1xf32>
      %39 = vector.broadcast %38 : vector<16x1xf32> to vector<16x128xf32>
      %40 = arith.mulf %35, %39 : vector<16x128xf32>
      %c0_23 = arith.constant 0 : index
      %c0_24 = arith.constant 0 : index
      %41 = vector.load %arg3[%c0_23, %c0_24] : memref<1x128xbf16, #tpu.memory_space<vmem>>, vector<1x128xbf16>
      %42 = arith.extf %41 : vector<1x128xbf16> to vector<1x128xf32>
      %43 = vector.broadcast %42 : vector<1x128xf32> to vector<16x128xf32>
      %44 = arith.mulf %40, %43 : vector<16x128xf32>
      %c0_25 = arith.constant 0 : index
      %c0_26 = arith.constant 0 : index
      %45 = vector.load %arg4[%c0_25, %c0_26] : memref<1x128xbf16, #tpu.memory_space<vmem>>, vector<1x128xbf16>
      %46 = arith.extf %45 : vector<1x128xbf16> to vector<1x128xf32>
      %47 = vector.broadcast %46 : vector<1x128xf32> to vector<16x128xf32>
      %48 = arith.addf %44, %47 : vector<16x128xf32>
      %49 = arith.truncf %48 : vector<16x128xf32> to vector<16x128xbf16>
      %c0_27 = arith.constant 0 : index
      %c0_28 = arith.constant 0 : index
      %50 = vector.load %arg10[%c0_27, %c0_28] : memref<16x128xbf16, #tpu.memory_space<vmem>>, vector<16x128xbf16>
      tpu.vector_store %arg10[%c0_27, %c0_28], %49 {strides = array<i32>} : memref<16x128xbf16, #tpu.memory_space<vmem>>, vector<16x128xbf16>,
      %cst_29 = arith.constant 0.000000e+00 : f32
      %51 = vector.broadcast %cst_29 : f32 to vector<16x128xf32>
      %c0_30 = arith.constant 0 : index
      %c0_31 = arith.constant 0 : index
      %52 = vector.load %arg11[%c0_30, %c0_31] : memref<16x128xf32, #tpu.memory_space<vmem>>, vector<16x128xf32>
      tpu.vector_store %arg11[%c0_30, %c0_31], %51 {strides = array<i32>} : memref<16x128xf32, #tpu.memory_space<vmem>>, vector<16x128xf32>,
    } else {
    }
    %c0 = arith.constant 0 : index
    %c0_1 = arith.constant 0 : index
    %3 = vector.load %arg10[%c0, %c0_1] : memref<16x128xbf16, #tpu.memory_space<vmem>>, vector<16x128xbf16>
    %c0_2 = arith.constant 0 : index
    %c0_3 = arith.constant 0 : index
    %4 = vector.load %arg5[%c0_2, %c0_3] : memref<128x256xbf16, #tpu.memory_space<vmem>>, vector<128x256xbf16>
    %cst = arith.constant dense<0.000000e+00> : vector<16x256xf32>
    %5 = tpu.matmul %3, %4, %cst {dimension_numbers = #tpu.dot_dimension_numbers<[1], [0], [0], [1], [0, 0, 1, 1], [], []>} : vector<16x128xbf16>, vector<128x256xbf16>, vector<16x256xf32> -> vector<16x256xf32>
    %c0_4 = arith.constant 0 : index
    %c0_5 = arith.constant 0 : index
    %6 = vector.load %arg6[%c0_4, %c0_5] : memref<1x256xbf16, #tpu.memory_space<vmem>>, vector<1x256xbf16>
    %7 = arith.extf %6 : vector<1x256xbf16> to vector<1x256xf32>
    %8 = vector.broadcast %7 : vector<1x256xf32> to vector<16x256xf32>
    %9 = arith.addf %5, %8 : vector<16x256xf32>
    %cst_6 = arith.constant 0.000000e+00 : f32
    %10 = vector.broadcast %cst_6 : f32 to vector<16x256xf32>
    %11 = arith.maximumf %9, %10 : vector<16x256xf32>
    %c0_7 = arith.constant 0 : index
    %c0_8 = arith.constant 0 : index
    %12 = vector.load %arg11[%c0_7, %c0_8] : memref<16x128xf32, #tpu.memory_space<vmem>>, vector<16x128xf32>
    %13 = arith.truncf %11 : vector<16x256xf32> to vector<16x256xbf16>
    %c0_9 = arith.constant 0 : index
    %c0_10 = arith.constant 0 : index
    %14 = vector.load %arg7[%c0_9, %c0_10] : memref<256x128xbf16, #tpu.memory_space<vmem>>, vector<256x128xbf16>
    %cst_11 = arith.constant dense<0.000000e+00> : vector<16x128xf32>
    %15 = tpu.matmul %13, %14, %cst_11 {dimension_numbers = #tpu.dot_dimension_numbers<[1], [0], [0], [1], [0, 0, 1, 1], [], []>} : vector<16x256xbf16>, vector<256x128xbf16>, vector<16x128xf32> -> vector<16x128xf32>
    %16 = arith.addf %12, %15 : vector<16x128xf32>
    %c0_12 = arith.constant 0 : index
    %c0_13 = arith.constant 0 : index
    %17 = vector.load %arg11[%c0_12, %c0_13] : memref<16x128xf32, #tpu.memory_space<vmem>>, vector<16x128xf32>
    tpu.vector_store %arg11[%c0_12, %c0_13], %16 {strides = array<i32>} : memref<16x128xf32, #tpu.memory_space<vmem>>, vector<16x128xf32>,
    %c0_i32_14 = arith.constant 0 : i32
    %18 = arith.cmpi eq, %arg1, %c0_i32_14 : i32
    %19 = arith.extui %18 : i1 to i32
    %c0_i32_15 = arith.constant 0 : i32
    %20 = arith.cmpi ne, %19, %c0_i32_15 : i32
    scf.if %20 {
      %c0_16 = arith.constant 0 : index
      %c0_17 = arith.constant 0 : index
      %21 = vector.load %arg11[%c0_16, %c0_17] : memref<16x128xf32, #tpu.memory_space<vmem>>, vector<16x128xf32>
      %c0_18 = arith.constant 0 : index
      %c0_19 = arith.constant 0 : index
      %22 = vector.load %arg8[%c0_18, %c0_19] : memref<1x128xbf16, #tpu.memory_space<vmem>>, vector<1x128xbf16>
      %23 = arith.extf %22 : vector<1x128xbf16> to vector<1x128xf32>
      %24 = vector.broadcast %23 : vector<1x128xf32> to vector<16x128xf32>
      %25 = arith.addf %21, %24 : vector<16x128xf32>
      %c0_20 = arith.constant 0 : index
      %c0_21 = arith.constant 0 : index
      %26 = vector.load %arg2[%c0_20, %c0_21] : memref<16x128xbf16, #tpu.memory_space<vmem>>, vector<16x128xbf16>
      %27 = arith.extf %26 : vector<16x128xbf16> to vector<16x128xf32>
      %28 = arith.addf %25, %27 : vector<16x128xf32>
      %29 = arith.truncf %28 : vector<16x128xf32> to vector<16x128xbf16>
      %c0_22 = arith.constant 0 : index
      %c0_23 = arith.constant 0 : index
      %30 = vector.load %arg9[%c0_22, %c0_23] : memref<16x128xbf16, #tpu.memory_space<vmem>>, vector<16x128xbf16>
      tpu.vector_store %arg9[%c0_22, %c0_23], %29 {strides = array<i32>} : memref<16x128xbf16, #tpu.memory_space<vmem>>, vector<16x128xbf16>,
    } else {
    }
    return
  }
  func.func @transform_0(%arg0: i32, %arg1: i32) -> (i32, i32) {
    %c0_i32 = arith.constant 0 : i32
    %c0_i32_0 = arith.constant 0 : i32
    return %arg0, %c0_i32 : i32, i32
  }
  func.func @transform_1(%arg0: i32, %arg1: i32) -> (i32, i32) {
    %c0_i32 = arith.constant 0 : i32
    %c0_i32_0 = arith.constant 0 : i32
    %c0_i32_1 = arith.constant 0 : i32
    return %c0_i32, %c0_i32_0 : i32, i32
  }
  func.func @transform_2(%arg0: i32, %arg1: i32) -> (i32, i32) {
    %c0_i32 = arith.constant 0 : i32
    %c0_i32_0 = arith.constant 0 : i32
    %c0_i32_1 = arith.constant 0 : i32
    return %c0_i32, %c0_i32_0 : i32, i32
  }
  func.func @transform_3(%arg0: i32, %arg1: i32) -> (i32, i32) {
    %c0_i32 = arith.constant 0 : i32
    %c0_i32_0 = arith.constant 0 : i32
    return %c0_i32, %arg1 : i32, i32
  }
  func.func @transform_4(%arg0: i32, %arg1: i32) -> (i32, i32) {
    %c0_i32 = arith.constant 0 : i32
    %c0_i32_0 = arith.constant 0 : i32
    return %c0_i32, %arg1 : i32, i32
  }
  func.func @transform_5(%arg0: i32, %arg1: i32) -> (i32, i32) {
    %c0_i32 = arith.constant 0 : i32
    %c0_i32_0 = arith.constant 0 : i32
    return %arg1, %c0_i32 : i32, i32
  }
  func.func @transform_6(%arg0: i32, %arg1: i32) -> (i32, i32) {
    %c0_i32 = arith.constant 0 : i32
    %c0_i32_0 = arith.constant 0 : i32
    %c0_i32_1 = arith.constant 0 : i32
    return %c0_i32, %c0_i32_0 : i32, i32
  }
  func.func @transform_7(%arg0: i32, %arg1: i32) -> (i32, i32) {
    %c0_i32 = arith.constant 0 : i32
    %c0_i32_0 = arith.constant 0 : i32
    return %arg0, %c0_i32 : i32, i32
  }
}

module attributes {stable_mosaic.version = 11 : i64} {
  func.func @_layernorm_kernel(%arg0: i32, %arg1: memref<16x128xbf16, #tpu.memory_space<vmem>>, %arg2: memref<1x128xbf16, #tpu.memory_space<vmem>>, %arg3: memref<1x128xbf16, #tpu.memory_space<vmem>>, %arg4: memref<16x128xbf16, #tpu.memory_space<vmem>>) attributes {dimension_semantics = [#tpu.dimension_semantics<parallel>], iteration_bounds = array<i64: 1>, scalar_prefetch = 0 : i64, scratch_operands = 0 : i64, tpu.core_type = #tpu.core_type<tc>, window_params = [{transform_indices = @transform_0, window_bounds = array<i64: 16, 128>}, {pipeline_mode = #tpu.pipeline_mode<synchronous>, transform_indices = @transform_1, window_bounds = array<i64: 1, 128>}, {pipeline_mode = #tpu.pipeline_mode<synchronous>, transform_indices = @transform_2, window_bounds = array<i64: 1, 128>}, {transform_indices = @transform_3, window_bounds = array<i64: 16, 128>}]} {
    %c0 = arith.constant 0 : index
    %c0_0 = arith.constant 0 : index
    %0 = vector.load %arg1[%c0, %c0_0] : memref<16x128xbf16, #tpu.memory_space<vmem>>, vector<16x128xbf16>
    %1 = arith.extf %0 : vector<16x128xbf16> to vector<16x128xf32>
    %cst = arith.constant dense<0.000000e+00> : vector<16xf32>
    %2 = vector.multi_reduction <add>, %1, %cst [1] : vector<16x128xf32> to vector<16xf32>
    %3 = vector.shape_cast %2 : vector<16xf32> to vector<16x1xf32>
    %cst_1 = arith.constant 1.280000e+02 : f32
    %4 = vector.broadcast %cst_1 : f32 to vector<16x1xf32>
    %5 = arith.divf %3, %4 : vector<16x1xf32>
    %6 = vector.broadcast %5 : vector<16x1xf32> to vector<16x128xf32>
    %7 = arith.subf %1, %6 : vector<16x128xf32>
    %8 = arith.mulf %7, %7 : vector<16x128xf32>
    %cst_2 = arith.constant dense<0.000000e+00> : vector<16xf32>
    %9 = vector.multi_reduction <add>, %8, %cst_2 [1] : vector<16x128xf32> to vector<16xf32>
    %10 = vector.shape_cast %9 : vector<16xf32> to vector<16x1xf32>
    %cst_3 = arith.constant 1.280000e+02 : f32
    %11 = vector.broadcast %cst_3 : f32 to vector<16x1xf32>
    %12 = arith.divf %10, %11 : vector<16x1xf32>
    %13 = vector.broadcast %5 : vector<16x1xf32> to vector<16x128xf32>
    %14 = arith.subf %1, %13 : vector<16x128xf32>
    %cst_4 = arith.constant 9.99999997E-7 : f32
    %15 = vector.broadcast %cst_4 : f32 to vector<16x1xf32>
    %16 = arith.addf %12, %15 : vector<16x1xf32>
    %17 = math.rsqrt %16 : vector<16x1xf32>
    %18 = vector.broadcast %17 : vector<16x1xf32> to vector<16x128xf32>
    %19 = arith.mulf %14, %18 : vector<16x128xf32>
    %c0_5 = arith.constant 0 : index
    %c0_6 = arith.constant 0 : index
    %20 = vector.load %arg2[%c0_5, %c0_6] : memref<1x128xbf16, #tpu.memory_space<vmem>>, vector<1x128xbf16>
    %21 = arith.extf %20 : vector<1x128xbf16> to vector<1x128xf32>
    %22 = vector.broadcast %21 : vector<1x128xf32> to vector<16x128xf32>
    %23 = arith.mulf %19, %22 : vector<16x128xf32>
    %c0_7 = arith.constant 0 : index
    %c0_8 = arith.constant 0 : index
    %24 = vector.load %arg3[%c0_7, %c0_8] : memref<1x128xbf16, #tpu.memory_space<vmem>>, vector<1x128xbf16>
    %25 = arith.extf %24 : vector<1x128xbf16> to vector<1x128xf32>
    %26 = vector.broadcast %25 : vector<1x128xf32> to vector<16x128xf32>
    %27 = arith.addf %23, %26 : vector<16x128xf32>
    %28 = arith.truncf %27 : vector<16x128xf32> to vector<16x128xbf16>
    %c0_9 = arith.constant 0 : index
    %c0_10 = arith.constant 0 : index
    %29 = vector.load %arg4[%c0_9, %c0_10] : memref<16x128xbf16, #tpu.memory_space<vmem>>, vector<16x128xbf16>
    tpu.vector_store %arg4[%c0_9, %c0_10], %28 {strides = array<i32>} : memref<16x128xbf16, #tpu.memory_space<vmem>>, vector<16x128xbf16>,
    return
  }
  func.func @transform_0(%arg0: i32) -> (i32, i32) {
    %c0_i32 = arith.constant 0 : i32
    %c0_i32_0 = arith.constant 0 : i32
    return %arg0, %c0_i32 : i32, i32
  }
  func.func @transform_1(%arg0: i32) -> (i32, i32) {
    %c0_i32 = arith.constant 0 : i32
    %c0_i32_0 = arith.constant 0 : i32
    %c0_i32_1 = arith.constant 0 : i32
    return %c0_i32, %c0_i32_0 : i32, i32
  }
  func.func @transform_2(%arg0: i32) -> (i32, i32) {
    %c0_i32 = arith.constant 0 : i32
    %c0_i32_0 = arith.constant 0 : i32
    %c0_i32_1 = arith.constant 0 : i32
    return %c0_i32, %c0_i32_0 : i32, i32
  }
  func.func @transform_3(%arg0: i32) -> (i32, i32) {
    %c0_i32 = arith.constant 0 : i32
    %c0_i32_0 = arith.constant 0 : i32
    return %arg0, %c0_i32 : i32, i32
  }
}

module attributes {stable_mosaic.version = 11 : i64} {
  func.func @_mha_kernel(%arg0: i32, %arg1: i32, %arg2: memref<1x8x128xbf16, #tpu.memory_space<vmem>>, %arg3: memref<1x8x128xbf16, #tpu.memory_space<vmem>>, %arg4: memref<1x8x128xbf16, #tpu.memory_space<vmem>>, %arg5: memref<1x8x8xf32, #tpu.memory_space<vmem>>, %arg6: memref<1x8x128xbf16, #tpu.memory_space<vmem>>) attributes {dimension_semantics = [#tpu.dimension_semantics<parallel>, #tpu.dimension_semantics<parallel>], iteration_bounds = array<i64: 2, 1>, scalar_prefetch = 0 : i64, scratch_operands = 0 : i64, tpu.core_type = #tpu.core_type<tc>, window_params = [{transform_indices = @transform_0, window_bounds = array<i64: 1, 8, 128>}, {transform_indices = @transform_1, window_bounds = array<i64: 1, 8, 128>}, {transform_indices = @transform_2, window_bounds = array<i64: 1, 8, 128>}, {transform_indices = @transform_3, window_bounds = array<i64: 1, 8, 8>}, {transform_indices = @transform_4, window_bounds = array<i64: 1, 8, 128>}]} {
    %c0 = arith.constant 0 : index
    %c0_0 = arith.constant 0 : index
    %c0_1 = arith.constant 0 : index
    %0 = vector.load %arg5[%c0, %c0_0, %c0_1] : memref<1x8x8xf32, #tpu.memory_space<vmem>>, vector<1x8x8xf32>
    %1 = vector.shape_cast %0 : vector<1x8x8xf32> to vector<8x8xf32>
    %c0_2 = arith.constant 0 : index
    %c0_3 = arith.constant 0 : index
    %c0_4 = arith.constant 0 : index
    %2 = vector.load %arg2[%c0_2, %c0_3, %c0_4] : memref<1x8x128xbf16, #tpu.memory_space<vmem>>, vector<1x8x32xbf16>
    %3 = vector.shape_cast %2 : vector<1x8x32xbf16> to vector<8x32xbf16>
    %c0_5 = arith.constant 0 : index
    %c0_6 = arith.constant 0 : index
    %c0_7 = arith.constant 0 : index
    %4 = vector.load %arg3[%c0_5, %c0_6, %c0_7] : memref<1x8x128xbf16, #tpu.memory_space<vmem>>, vector<1x8x32xbf16>
    %5 = vector.shape_cast %4 : vector<1x8x32xbf16> to vector<8x32xbf16>
    %c0_8 = arith.constant 0 : index
    %c0_9 = arith.constant 0 : index
    %c0_10 = arith.constant 0 : index
    %6 = vector.load %arg4[%c0_8, %c0_9, %c0_10] : memref<1x8x128xbf16, #tpu.memory_space<vmem>>, vector<1x8x32xbf16>
    %7 = vector.shape_cast %6 : vector<1x8x32xbf16> to vector<8x32xbf16>
    %cst = arith.constant dense<0.000000e+00> : vector<8x8xf32>
    %8 = tpu.matmul %3, %5, %cst {dimension_numbers = #tpu.dot_dimension_numbers<[1], [1], [0], [0], [0, 0, 1, 0], [], []>} : vector<8x32xbf16>, vector<8x32xbf16>, vector<8x8xf32> -> vector<8x8xf32>
    %cst_11 = arith.constant 0.176776692 : f32
    %9 = vector.broadcast %cst_11 : f32 to vector<8x8xf32>
    %10 = arith.mulf %8, %9 : vector<8x8xf32>
    %11 = arith.addf %10, %1 : vector<8x8xf32>
    %cst_12 = arith.constant dense<0xFF800000> : vector<8xf32>
    %12 = vector.multi_reduction <maximumf>, %11, %cst_12 [1] : vector<8x8xf32> to vector<8xf32>
    %13 = vector.shape_cast %12 : vector<8xf32> to vector<8x1xf32>
    %14 = vector.broadcast %13 : vector<8x1xf32> to vector<8x8xf32>
    %15 = arith.subf %11, %14 : vector<8x8xf32>
    %16 = math.exp %15 : vector<8x8xf32>
    %cst_13 = arith.constant dense<0.000000e+00> : vector<8xf32>
    %17 = vector.multi_reduction <add>, %16, %cst_13 [1] : vector<8x8xf32> to vector<8xf32>
    %18 = vector.shape_cast %17 : vector<8xf32> to vector<8x1xf32>
    %19 = tpu.reciprocal %18 {approx = true} : vector<8x1xf32> -> vector<8x1xf32>
    %20 = vector.broadcast %19 : vector<8x1xf32> to vector<8x8xf32>
    %21 = arith.mulf %16, %20 : vector<8x8xf32>
    %22 = arith.truncf %21 : vector<8x8xf32> to vector<8x8xbf16>
    %cst_14 = arith.constant dense<0.000000e+00> : vector<8x32xf32>
    %23 = tpu.matmul %22, %7, %cst_14 {dimension_numbers = #tpu.dot_dimension_numbers<[1], [0], [0], [1], [0, 0, 1, 1], [], []>} : vector<8x8xbf16>, vector<8x32xbf16>, vector<8x32xf32> -> vector<8x32xf32>
    %c0_15 = arith.constant 0 : index
    %c0_16 = arith.constant 0 : index
    %c32 = arith.constant 32 : index
    %24 = vector.load %arg2[%c0_15, %c0_16, %c32] : memref<1x8x128xbf16, #tpu.memory_space<vmem>>, vector<1x8x32xbf16>
    %25 = vector.shape_cast %24 : vector<1x8x32xbf16> to vector<8x32xbf16>
    %c0_17 = arith.constant 0 : index
    %c0_18 = arith.constant 0 : index
    %c32_19 = arith.constant 32 : index
    %26 = vector.load %arg3[%c0_17, %c0_18, %c32_19] : memref<1x8x128xbf16, #tpu.memory_space<vmem>>, vector<1x8x32xbf16>
    %27 = vector.shape_cast %26 : vector<1x8x32xbf16> to vector<8x32xbf16>
    %c0_20 = arith.constant 0 : index
    %c0_21 = arith.constant 0 : index
    %c32_22 = arith.constant 32 : index
    %28 = vector.load %arg4[%c0_20, %c0_21, %c32_22] : memref<1x8x128xbf16, #tpu.memory_space<vmem>>, vector<1x8x32xbf16>
    %29 = vector.shape_cast %28 : vector<1x8x32xbf16> to vector<8x32xbf16>
    %cst_23 = arith.constant dense<0.000000e+00> : vector<8x8xf32>
    %30 = tpu.matmul %25, %27, %cst_23 {dimension_numbers = #tpu.dot_dimension_numbers<[1], [1], [0], [0], [0, 0, 1, 0], [], []>} : vector<8x32xbf16>, vector<8x32xbf16>, vector<8x8xf32> -> vector<8x8xf32>
    %cst_24 = arith.constant 0.176776692 : f32
    %31 = vector.broadcast %cst_24 : f32 to vector<8x8xf32>
    %32 = arith.mulf %30, %31 : vector<8x8xf32>
    %33 = arith.addf %32, %1 : vector<8x8xf32>
    %cst_25 = arith.constant dense<0xFF800000> : vector<8xf32>
    %34 = vector.multi_reduction <maximumf>, %33, %cst_25 [1] : vector<8x8xf32> to vector<8xf32>
    %35 = vector.shape_cast %34 : vector<8xf32> to vector<8x1xf32>
    %36 = vector.broadcast %35 : vector<8x1xf32> to vector<8x8xf32>
    %37 = arith.subf %33, %36 : vector<8x8xf32>
    %38 = math.exp %37 : vector<8x8xf32>
    %cst_26 = arith.constant dense<0.000000e+00> : vector<8xf32>
    %39 = vector.multi_reduction <add>, %38, %cst_26 [1] : vector<8x8xf32> to vector<8xf32>
    %40 = vector.shape_cast %39 : vector<8xf32> to vector<8x1xf32>
    %41 = tpu.reciprocal %40 {approx = true} : vector<8x1xf32> -> vector<8x1xf32>
    %42 = vector.broadcast %41 : vector<8x1xf32> to vector<8x8xf32>
    %43 = arith.mulf %38, %42 : vector<8x8xf32>
    %44 = arith.truncf %43 : vector<8x8xf32> to vector<8x8xbf16>
    %cst_27 = arith.constant dense<0.000000e+00> : vector<8x32xf32>
    %45 = tpu.matmul %44, %29, %cst_27 {dimension_numbers = #tpu.dot_dimension_numbers<[1], [0], [0], [1], [0, 0, 1, 1], [], []>} : vector<8x8xbf16>, vector<8x32xbf16>, vector<8x32xf32> -> vector<8x32xf32>
    %c0_28 = arith.constant 0 : index
    %c0_29 = arith.constant 0 : index
    %c64 = arith.constant 64 : index
    %46 = vector.load %arg2[%c0_28, %c0_29, %c64] : memref<1x8x128xbf16, #tpu.memory_space<vmem>>, vector<1x8x32xbf16>
    %47 = vector.shape_cast %46 : vector<1x8x32xbf16> to vector<8x32xbf16>
    %c0_30 = arith.constant 0 : index
    %c0_31 = arith.constant 0 : index
    %c64_32 = arith.constant 64 : index
    %48 = vector.load %arg3[%c0_30, %c0_31, %c64_32] : memref<1x8x128xbf16, #tpu.memory_space<vmem>>, vector<1x8x32xbf16>
    %49 = vector.shape_cast %48 : vector<1x8x32xbf16> to vector<8x32xbf16>
    %c0_33 = arith.constant 0 : index
    %c0_34 = arith.constant 0 : index
    %c64_35 = arith.constant 64 : index
    %50 = vector.load %arg4[%c0_33, %c0_34, %c64_35] : memref<1x8x128xbf16, #tpu.memory_space<vmem>>, vector<1x8x32xbf16>
    %51 = vector.shape_cast %50 : vector<1x8x32xbf16> to vector<8x32xbf16>
    %cst_36 = arith.constant dense<0.000000e+00> : vector<8x8xf32>
    %52 = tpu.matmul %47, %49, %cst_36 {dimension_numbers = #tpu.dot_dimension_numbers<[1], [1], [0], [0], [0, 0, 1, 0], [], []>} : vector<8x32xbf16>, vector<8x32xbf16>, vector<8x8xf32> -> vector<8x8xf32>
    %cst_37 = arith.constant 0.176776692 : f32
    %53 = vector.broadcast %cst_37 : f32 to vector<8x8xf32>
    %54 = arith.mulf %52, %53 : vector<8x8xf32>
    %55 = arith.addf %54, %1 : vector<8x8xf32>
    %cst_38 = arith.constant dense<0xFF800000> : vector<8xf32>
    %56 = vector.multi_reduction <maximumf>, %55, %cst_38 [1] : vector<8x8xf32> to vector<8xf32>
    %57 = vector.shape_cast %56 : vector<8xf32> to vector<8x1xf32>
    %58 = vector.broadcast %57 : vector<8x1xf32> to vector<8x8xf32>
    %59 = arith.subf %55, %58 : vector<8x8xf32>
    %60 = math.exp %59 : vector<8x8xf32>
    %cst_39 = arith.constant dense<0.000000e+00> : vector<8xf32>
    %61 = vector.multi_reduction <add>, %60, %cst_39 [1] : vector<8x8xf32> to vector<8xf32>
    %62 = vector.shape_cast %61 : vector<8xf32> to vector<8x1xf32>
    %63 = tpu.reciprocal %62 {approx = true} : vector<8x1xf32> -> vector<8x1xf32>
    %64 = vector.broadcast %63 : vector<8x1xf32> to vector<8x8xf32>
    %65 = arith.mulf %60, %64 : vector<8x8xf32>
    %66 = arith.truncf %65 : vector<8x8xf32> to vector<8x8xbf16>
    %cst_40 = arith.constant dense<0.000000e+00> : vector<8x32xf32>
    %67 = tpu.matmul %66, %51, %cst_40 {dimension_numbers = #tpu.dot_dimension_numbers<[1], [0], [0], [1], [0, 0, 1, 1], [], []>} : vector<8x8xbf16>, vector<8x32xbf16>, vector<8x32xf32> -> vector<8x32xf32>
    %c0_41 = arith.constant 0 : index
    %c0_42 = arith.constant 0 : index
    %c96 = arith.constant 96 : index
    %68 = vector.load %arg2[%c0_41, %c0_42, %c96] : memref<1x8x128xbf16, #tpu.memory_space<vmem>>, vector<1x8x32xbf16>
    %69 = vector.shape_cast %68 : vector<1x8x32xbf16> to vector<8x32xbf16>
    %c0_43 = arith.constant 0 : index
    %c0_44 = arith.constant 0 : index
    %c96_45 = arith.constant 96 : index
    %70 = vector.load %arg3[%c0_43, %c0_44, %c96_45] : memref<1x8x128xbf16, #tpu.memory_space<vmem>>, vector<1x8x32xbf16>
    %71 = vector.shape_cast %70 : vector<1x8x32xbf16> to vector<8x32xbf16>
    %c0_46 = arith.constant 0 : index
    %c0_47 = arith.constant 0 : index
    %c96_48 = arith.constant 96 : index
    %72 = vector.load %arg4[%c0_46, %c0_47, %c96_48] : memref<1x8x128xbf16, #tpu.memory_space<vmem>>, vector<1x8x32xbf16>
    %73 = vector.shape_cast %72 : vector<1x8x32xbf16> to vector<8x32xbf16>
    %cst_49 = arith.constant dense<0.000000e+00> : vector<8x8xf32>
    %74 = tpu.matmul %69, %71, %cst_49 {dimension_numbers = #tpu.dot_dimension_numbers<[1], [1], [0], [0], [0, 0, 1, 0], [], []>} : vector<8x32xbf16>, vector<8x32xbf16>, vector<8x8xf32> -> vector<8x8xf32>
    %cst_50 = arith.constant 0.176776692 : f32
    %75 = vector.broadcast %cst_50 : f32 to vector<8x8xf32>
    %76 = arith.mulf %74, %75 : vector<8x8xf32>
    %77 = arith.addf %76, %1 : vector<8x8xf32>
    %cst_51 = arith.constant dense<0xFF800000> : vector<8xf32>
    %78 = vector.multi_reduction <maximumf>, %77, %cst_51 [1] : vector<8x8xf32> to vector<8xf32>
    %79 = vector.shape_cast %78 : vector<8xf32> to vector<8x1xf32>
    %80 = vector.broadcast %79 : vector<8x1xf32> to vector<8x8xf32>
    %81 = arith.subf %77, %80 : vector<8x8xf32>
    %82 = math.exp %81 : vector<8x8xf32>
    %cst_52 = arith.constant dense<0.000000e+00> : vector<8xf32>
    %83 = vector.multi_reduction <add>, %82, %cst_52 [1] : vector<8x8xf32> to vector<8xf32>
    %84 = vector.shape_cast %83 : vector<8xf32> to vector<8x1xf32>
    %85 = tpu.reciprocal %84 {approx = true} : vector<8x1xf32> -> vector<8x1xf32>
    %86 = vector.broadcast %85 : vector<8x1xf32> to vector<8x8xf32>
    %87 = arith.mulf %82, %86 : vector<8x8xf32>
    %88 = arith.truncf %87 : vector<8x8xf32> to vector<8x8xbf16>
    %cst_53 = arith.constant dense<0.000000e+00> : vector<8x32xf32>
    %89 = tpu.matmul %88, %73, %cst_53 {dimension_numbers = #tpu.dot_dimension_numbers<[1], [0], [0], [1], [0, 0, 1, 1], [], []>} : vector<8x8xbf16>, vector<8x32xbf16>, vector<8x32xf32> -> vector<8x32xf32>
    %90 = tpu.concatenate %23, %45, %67, %89 in 1 : vector<8x32xf32>, vector<8x32xf32>, vector<8x32xf32>, vector<8x32xf32> -> vector<8x128xf32>
    %91 = arith.truncf %90 : vector<8x128xf32> to vector<8x128xbf16>
    %c0_54 = arith.constant 0 : index
    %c0_55 = arith.constant 0 : index
    %c0_56 = arith.constant 0 : index
    %92 = vector.load %arg6[%c0_54, %c0_55, %c0_56] : memref<1x8x128xbf16, #tpu.memory_space<vmem>>, vector<1x8x128xbf16>
    %93 = vector.shape_cast %92 : vector<1x8x128xbf16> to vector<8x128xbf16>
    %94 = vector.shape_cast %91 : vector<8x128xbf16> to vector<1x8x128xbf16>
    tpu.vector_store %arg6[%c0_54, %c0_55, %c0_56], %94 {strides = array<i32>} : memref<1x8x128xbf16, #tpu.memory_space<vmem>>, vector<1x8x128xbf16>,
    return
  }
  func.func @transform_0(%arg0: i32, %arg1: i32) -> (i32, i32, i32) {
    %c0_i32 = arith.constant 0 : i32
    %c0_i32_0 = arith.constant 0 : i32
    return %arg0, %arg1, %c0_i32 : i32, i32, i32
  }
  func.func @transform_1(%arg0: i32, %arg1: i32) -> (i32, i32, i32) {
    %c0_i32 = arith.constant 0 : i32
    %c1_i32 = arith.constant 1 : i32
    %c0_i32_0 = arith.constant 0 : i32
    return %arg0, %c0_i32, %c1_i32 : i32, i32, i32
  }
  func.func @transform_2(%arg0: i32, %arg1: i32) -> (i32, i32, i32) {
    %c0_i32 = arith.constant 0 : i32
    %c2_i32 = arith.constant 2 : i32
    %c0_i32_0 = arith.constant 0 : i32
    return %arg0, %c0_i32, %c2_i32 : i32, i32, i32
  }
  func.func @transform_3(%arg0: i32, %arg1: i32) -> (i32, i32, i32) {
    %c0_i32 = arith.constant 0 : i32
    %c0_i32_0 = arith.constant 0 : i32
    return %arg0, %arg1, %c0_i32 : i32, i32, i32
  }
  func.func @transform_4(%arg0: i32, %arg1: i32) -> (i32, i32, i32) {
    %c0_i32 = arith.constant 0 : i32
    %c0_i32_0 = arith.constant 0 : i32
    return %arg0, %arg1, %c0_i32 : i32, i32, i32
  }
}

module attributes {stable_mosaic.version = 11 : i64} {
  func.func @_matmul_kernel(%arg0: i32, %arg1: i32, %arg2: i32, %arg3: memref<16x128xbf16, #tpu.memory_space<vmem>>, %arg4: memref<128x256xbf16, #tpu.memory_space<vmem>>, %arg5: memref<1x256xbf16, #tpu.memory_space<vmem>>, %arg6: memref<16x256xbf16, #tpu.memory_space<vmem>>, %arg7: memref<16x256xf32, #tpu.memory_space<vmem>>) attributes {dimension_semantics = [#tpu.dimension_semantics<parallel>, #tpu.dimension_semantics<parallel>, #tpu.dimension_semantics<arbitrary>], iteration_bounds = array<i64: 1, 1, 1>, scalar_prefetch = 0 : i64, scratch_operands = 1 : i64, tpu.core_type = #tpu.core_type<tc>, window_params = [{transform_indices = @transform_0, window_bounds = array<i64: 16, 128>}, {transform_indices = @transform_1, window_bounds = array<i64: 128, 256>}, {transform_indices = @transform_2, window_bounds = array<i64: 1, 256>}, {transform_indices = @transform_3, window_bounds = array<i64: 16, 256>}]} {
    %c0_i32 = arith.constant 0 : i32
    %0 = arith.cmpi eq, %arg2, %c0_i32 : i32
    %1 = arith.extui %0 : i1 to i32
    %c0_i32_0 = arith.constant 0 : i32
    %2 = arith.cmpi ne, %1, %c0_i32_0 : i32
    scf.if %2 {
      %cst_10 = arith.constant 0.000000e+00 : f32
      %12 = vector.broadcast %cst_10 : f32 to vector<16x256xf32>
      %c0_11 = arith.constant 0 : index
      %c0_12 = arith.constant 0 : index
      %13 = vector.load %arg7[%c0_11, %c0_12] : memref<16x256xf32, #tpu.memory_space<vmem>>, vector<16x256xf32>
      tpu.vector_store %arg7[%c0_11, %c0_12], %12 {strides = array<i32>} : memref<16x256xf32, #tpu.memory_space<vmem>>, vector<16x256xf32>,
    } else {
    }
    %c0 = arith.constant 0 : index
    %c0_1 = arith.constant 0 : index
    %3 = vector.load %arg7[%c0, %c0_1] : memref<16x256xf32, #tpu.memory_space<vmem>>, vector<16x256xf32>
    %c0_2 = arith.constant 0 : index
    %c0_3 = arith.constant 0 : index
    %4 = vector.load %arg3[%c0_2, %c0_3] : memref<16x128xbf16, #tpu.memory_space<vmem>>, vector<16x128xbf16>
    %c0_4 = arith.constant 0 : index
    %c0_5 = arith.constant 0 : index
    %5 = vector.load %arg4[%c0_4, %c0_5] : memref<128x256xbf16, #tpu.memory_space<vmem>>, vector<128x256xbf16>
    %cst = arith.constant dense<0.000000e+00> : vector<16x256xf32>
    %6 = tpu.matmul %4, %5, %cst {dimension_numbers = #tpu.dot_dimension_numbers<[1], [0], [0], [1], [0, 0, 1, 1], [], []>} : vector<16x128xbf16>, vector<128x256xbf16>, vector<16x256xf32> -> vector<16x256xf32>
    %7 = arith.addf %3, %6 : vector<16x256xf32>
    %c0_6 = arith.constant 0 : index
    %c0_7 = arith.constant 0 : index
    %8 = vector.load %arg7[%c0_6, %c0_7] : memref<16x256xf32, #tpu.memory_space<vmem>>, vector<16x256xf32>
    tpu.vector_store %arg7[%c0_6, %c0_7], %7 {strides = array<i32>} : memref<16x256xf32, #tpu.memory_space<vmem>>, vector<16x256xf32>,
    %c0_i32_8 = arith.constant 0 : i32
    %9 = arith.cmpi eq, %arg2, %c0_i32_8 : i32
    %10 = arith.extui %9 : i1 to i32
    %c0_i32_9 = arith.constant 0 : i32
    %11 = arith.cmpi ne, %10, %c0_i32_9 : i32
    scf.if %11 {
      %c0_10 = arith.constant 0 : index
      %c0_11 = arith.constant 0 : index
      %12 = vector.load %arg7[%c0_10, %c0_11] : memref<16x256xf32, #tpu.memory_space<vmem>>, vector<16x256xf32>
      %c0_12 = arith.constant 0 : index
      %c0_13 = arith.constant 0 : index
      %13 = vector.load %arg5[%c0_12, %c0_13] : memref<1x256xbf16, #tpu.memory_space<vmem>>, vector<1x256xbf16>
      %14 = arith.extf %13 : vector<1x256xbf16> to vector<1x256xf32>
      %15 = vector.broadcast %14 : vector<1x256xf32> to vector<16x256xf32>
      %16 = arith.addf %12, %15 : vector<16x256xf32>
      %17 = arith.truncf %16 : vector<16x256xf32> to vector<16x256xbf16>
      %c0_14 = arith.constant 0 : index
      %c0_15 = arith.constant 0 : index
      %18 = vector.load %arg6[%c0_14, %c0_15] : memref<16x256xbf16, #tpu.memory_space<vmem>>, vector<16x256xbf16>
      tpu.vector_store %arg6[%c0_14, %c0_15], %17 {strides = array<i32>} : memref<16x256xbf16, #tpu.memory_space<vmem>>, vector<16x256xbf16>,
    } else {
    }
    return
  }
  func.func @transform_0(%arg0: i32, %arg1: i32, %arg2: i32) -> (i32, i32) {
    %c0_i32 = arith.constant 0 : i32
    return %arg0, %arg2 : i32, i32
  }
  func.func @transform_1(%arg0: i32, %arg1: i32, %arg2: i32) -> (i32, i32) {
    %c0_i32 = arith.constant 0 : i32
    return %arg2, %arg1 : i32, i32
  }
  func.func @transform_2(%arg0: i32, %arg1: i32, %arg2: i32) -> (i32, i32) {
    %c0_i32 = arith.constant 0 : i32
    %c0_i32_0 = arith.constant 0 : i32
    return %c0_i32, %arg1 : i32, i32
  }
  func.func @transform_3(%arg0: i32, %arg1: i32, %arg2: i32) -> (i32, i32) {
    %c0_i32 = arith.constant 0 : i32
    return %arg0, %arg1 : i32, i32
  }
}

module attributes {stable_mosaic.version = 11 : i64} {
  func.func @_ln_matmul_kernel(%arg0: i32, %arg1: i32, %arg2: memref<16x128xbf16, #tpu.memory_space<vmem>>, %arg3: memref<1x128xbf16, #tpu.memory_space<vmem>>, %arg4: memref<1x128xbf16, #tpu.memory_space<vmem>>, %arg5: memref<128x128xbf16, #tpu.memory_space<vmem>>, %arg6: memref<1x128xbf16, #tpu.memory_space<vmem>>, %arg7: memref<16x128xbf16, #tpu.memory_space<vmem>>, %arg8: memref<16x128xbf16, #tpu.memory_space<vmem>>) attributes {dimension_semantics = [#tpu.dimension_semantics<parallel>, #tpu.dimension_semantics<arbitrary>], iteration_bounds = array<i64: 1, 1>, scalar_prefetch = 0 : i64, scratch_operands = 1 : i64, tpu.core_type = #tpu.core_type<tc>, window_params = [{transform_indices = @transform_0, window_bounds = array<i64: 16, 128>}, {pipeline_mode = #tpu.pipeline_mode<synchronous>, transform_indices = @transform_1, window_bounds = array<i64: 1, 128>}, {pipeline_mode = #tpu.pipeline_mode<synchronous>, transform_indices = @transform_2, window_bounds = array<i64: 1, 128>}, {transform_indices = @transform_3, window_bounds = array<i64: 128, 128>}, {transform_indices = @transform_4, window_bounds = array<i64: 1, 128>}, {transform_indices = @transform_5, window_bounds = array<i64: 16, 128>}]} {
    %c0_i32 = arith.constant 0 : i32
    %0 = arith.cmpi eq, %arg1, %c0_i32 : i32
    %1 = arith.extui %0 : i1 to i32
    %c0_i32_0 = arith.constant 0 : i32
    %2 = arith.cmpi ne, %1, %c0_i32_0 : i32
    scf.if %2 {
      %c0_8 = arith.constant 0 : index
      %c0_9 = arith.constant 0 : index
      %12 = vector.load %arg2[%c0_8, %c0_9] : memref<16x128xbf16, #tpu.memory_space<vmem>>, vector<16x128xbf16>
      %13 = arith.extf %12 : vector<16x128xbf16> to vector<16x128xf32>
      %cst_10 = arith.constant dense<0.000000e+00> : vector<16xf32>
      %14 = vector.multi_reduction <add>, %13, %cst_10 [1] : vector<16x128xf32> to vector<16xf32>
      %15 = vector.shape_cast %14 : vector<16xf32> to vector<16x1xf32>
      %cst_11 = arith.constant 1.280000e+02 : f32
      %16 = vector.broadcast %cst_11 : f32 to vector<16x1xf32>
      %17 = arith.divf %15, %16 : vector<16x1xf32>
      %18 = vector.broadcast %17 : vector<16x1xf32> to vector<16x128xf32>
      %19 = arith.subf %13, %18 : vector<16x128xf32>
      %20 = arith.mulf %19, %19 : vector<16x128xf32>
      %cst_12 = arith.constant dense<0.000000e+00> : vector<16xf32>
      %21 = vector.multi_reduction <add>, %20, %cst_12 [1] : vector<16x128xf32> to vector<16xf32>
      %22 = vector.shape_cast %21 : vector<16xf32> to vector<16x1xf32>
      %cst_13 = arith.constant 1.280000e+02 : f32
      %23 = vector.broadcast %cst_13 : f32 to vector<16x1xf32>
      %24 = arith.divf %22, %23 : vector<16x1xf32>
      %25 = vector.broadcast %17 : vector<16x1xf32> to vector<16x128xf32>
      %26 = arith.subf %13, %25 : vector<16x128xf32>
      %cst_14 = arith.constant 9.99999997E-7 : f32
      %27 = vector.broadcast %cst_14 : f32 to vector<16x1xf32>
      %28 = arith.addf %24, %27 : vector<16x1xf32>
      %29 = math.rsqrt %28 : vector<16x1xf32>
      %30 = vector.broadcast %29 : vector<16x1xf32> to vector<16x128xf32>
      %31 = arith.mulf %26, %30 : vector<16x128xf32>
      %c0_15 = arith.constant 0 : index
      %c0_16 = arith.constant 0 : index
      %32 = vector.load %arg3[%c0_15, %c0_16] : memref<1x128xbf16, #tpu.memory_space<vmem>>, vector<1x128xbf16>
      %33 = arith.extf %32 : vector<1x128xbf16> to vector<1x128xf32>
      %34 = vector.broadcast %33 : vector<1x128xf32> to vector<16x128xf32>
      %35 = arith.mulf %31, %34 : vector<16x128xf32>
      %c0_17 = arith.constant 0 : index
      %c0_18 = arith.constant 0 : index
      %36 = vector.load %arg4[%c0_17, %c0_18] : memref<1x128xbf16, #tpu.memory_space<vmem>>, vector<1x128xbf16>
      %37 = arith.extf %36 : vector<1x128xbf16> to vector<1x128xf32>
      %38 = vector.broadcast %37 : vector<1x128xf32> to vector<16x128xf32>
      %39 = arith.addf %35, %38 : vector<16x128xf32>
      %40 = arith.truncf %39 : vector<16x128xf32> to vector<16x128xbf16>
      %c0_19 = arith.constant 0 : index
      %c0_20 = arith.constant 0 : index
      %41 = vector.load %arg8[%c0_19, %c0_20] : memref<16x128xbf16, #tpu.memory_space<vmem>>, vector<16x128xbf16>
      tpu.vector_store %arg8[%c0_19, %c0_20], %40 {strides = array<i32>} : memref<16x128xbf16, #tpu.memory_space<vmem>>, vector<16x128xbf16>,
    } else {
    }
    %c0 = arith.constant 0 : index
    %c0_1 = arith.constant 0 : index
    %3 = vector.load %arg8[%c0, %c0_1] : memref<16x128xbf16, #tpu.memory_space<vmem>>, vector<16x128xbf16>
    %c0_2 = arith.constant 0 : index
    %c0_3 = arith.constant 0 : index
    %4 = vector.load %arg5[%c0_2, %c0_3] : memref<128x128xbf16, #tpu.memory_space<vmem>>, vector<128x128xbf16>
    %cst = arith.constant dense<0.000000e+00> : vector<16x128xf32>
    %5 = tpu.matmul %3, %4, %cst {dimension_numbers = #tpu.dot_dimension_numbers<[1], [0], [0], [1], [0, 0, 1, 1], [], []>} : vector<16x128xbf16>, vector<128x128xbf16>, vector<16x128xf32> -> vector<16x128xf32>
    %c0_4 = arith.constant 0 : index
    %c0_5 = arith.constant 0 : index
    %6 = vector.load %arg6[%c0_4, %c0_5] : memref<1x128xbf16, #tpu.memory_space<vmem>>, vector<1x128xbf16>
    %7 = arith.extf %6 : vector<1x128xbf16> to vector<1x128xf32>
    %8 = vector.broadcast %7 : vector<1x128xf32> to vector<16x128xf32>
    %9 = arith.addf %5, %8 : vector<16x128xf32>
    %10 = arith.truncf %9 : vector<16x128xf32> to vector<16x128xbf16>
    %c0_6 = arith.constant 0 : index
    %c0_7 = arith.constant 0 : index
    %11 = vector.load %arg7[%c0_6, %c0_7] : memref<16x128xbf16, #tpu.memory_space<vmem>>, vector<16x128xbf16>
    tpu.vector_store %arg7[%c0_6, %c0_7], %10 {strides = array<i32>} : memref<16x128xbf16, #tpu.memory_space<vmem>>, vector<16x128xbf16>,
    return
  }
  func.func @transform_0(%arg0: i32, %arg1: i32) -> (i32, i32) {
    %c0_i32 = arith.constant 0 : i32
    %c0_i32_0 = arith.constant 0 : i32
    return %arg0, %c0_i32 : i32, i32
  }
  func.func @transform_1(%arg0: i32, %arg1: i32) -> (i32, i32) {
    %c0_i32 = arith.constant 0 : i32
    %c0_i32_0 = arith.constant 0 : i32
    %c0_i32_1 = arith.constant 0 : i32
    return %c0_i32, %c0_i32_0 : i32, i32
  }
  func.func @transform_2(%arg0: i32, %arg1: i32) -> (i32, i32) {
    %c0_i32 = arith.constant 0 : i32
    %c0_i32_0 = arith.constant 0 : i32
    %c0_i32_1 = arith.constant 0 : i32
    return %c0_i32, %c0_i32_0 : i32, i32
  }
  func.func @transform_3(%arg0: i32, %arg1: i32) -> (i32, i32) {
    %c0_i32 = arith.constant 0 : i32
    %c0_i32_0 = arith.constant 0 : i32
    return %c0_i32, %arg1 : i32, i32
  }
  func.func @transform_4(%arg0: i32, %arg1: i32) -> (i32, i32) {
    %c0_i32 = arith.constant 0 : i32
    %c0_i32_0 = arith.constant 0 : i32
    return %c0_i32, %arg1 : i32, i32
  }
  func.func @transform_5(%arg0: i32, %arg1: i32) -> (i32, i32) {
    %c0_i32 = arith.constant 0 : i32
    return %arg0, %arg1 : i32, i32
  }
}

module attributes {stable_mosaic.version = 11 : i64} {
  func.func @_mha_kernel(%arg0: i32, %arg1: i32, %arg2: memref<1x8x128xbf16, #tpu.memory_space<vmem>>, %arg3: memref<1x8x128xbf16, #tpu.memory_space<vmem>>, %arg4: memref<1x8x128xbf16, #tpu.memory_space<vmem>>, %arg5: memref<1x1x8xf32, #tpu.memory_space<vmem>>, %arg6: memref<1x8x128xbf16, #tpu.memory_space<vmem>>) attributes {dimension_semantics = [#tpu.dimension_semantics<parallel>, #tpu.dimension_semantics<parallel>], iteration_bounds = array<i64: 2, 1>, scalar_prefetch = 0 : i64, scratch_operands = 0 : i64, tpu.core_type = #tpu.core_type<tc>, window_params = [{transform_indices = @transform_0, window_bounds = array<i64: 1, 8, 128>}, {transform_indices = @transform_1, window_bounds = array<i64: 1, 8, 128>}, {transform_indices = @transform_2, window_bounds = array<i64: 1, 8, 128>}, {transform_indices = @transform_3, window_bounds = array<i64: 1, 1, 8>}, {transform_indices = @transform_4, window_bounds = array<i64: 1, 8, 128>}]} {
    %c0 = arith.constant 0 : index
    %c0_0 = arith.constant 0 : index
    %c0_1 = arith.constant 0 : index
    %0 = vector.load %arg5[%c0, %c0_0, %c0_1] : memref<1x1x8xf32, #tpu.memory_space<vmem>>, vector<1x1x8xf32>
    %1 = vector.shape_cast %0 : vector<1x1x8xf32> to vector<1x8xf32>
    %c0_2 = arith.constant 0 : index
    %c0_3 = arith.constant 0 : index
    %c0_4 = arith.constant 0 : index
    %2 = vector.load %arg2[%c0_2, %c0_3, %c0_4] : memref<1x8x128xbf16, #tpu.memory_space<vmem>>, vector<1x8x32xbf16>
    %3 = vector.shape_cast %2 : vector<1x8x32xbf16> to vector<8x32xbf16>
    %c0_5 = arith.constant 0 : index
    %c0_6 = arith.constant 0 : index
    %c0_7 = arith.constant 0 : index
    %4 = vector.load %arg3[%c0_5, %c0_6, %c0_7] : memref<1x8x128xbf16, #tpu.memory_space<vmem>>, vector<1x8x32xbf16>
    %5 = vector.shape_cast %4 : vector<1x8x32xbf16> to vector<8x32xbf16>
    %c0_8 = arith.constant 0 : index
    %c0_9 = arith.constant 0 : index
    %c0_10 = arith.constant 0 : index
    %6 = vector.load %arg4[%c0_8, %c0_9, %c0_10] : memref<1x8x128xbf16, #tpu.memory_space<vmem>>, vector<1x8x32xbf16>
    %7 = vector.shape_cast %6 : vector<1x8x32xbf16> to vector<8x32xbf16>
    %cst = arith.constant dense<0.000000e+00> : vector<8x8xf32>
    %8 = tpu.matmul %3, %5, %cst {dimension_numbers = #tpu.dot_dimension_numbers<[1], [1], [0], [0], [0, 0, 1, 0], [], []>} : vector<8x32xbf16>, vector<8x32xbf16>, vector<8x8xf32> -> vector<8x8xf32>
    %cst_11 = arith.constant 0.176776692 : f32
    %9 = vector.broadcast %cst_11 : f32 to vector<8x8xf32>
    %10 = arith.mulf %8, %9 : vector<8x8xf32>
    %11 = vector.broadcast %1 : vector<1x8xf32> to vector<8x8xf32>
    %12 = arith.addf %10, %11 : vector<8x8xf32>
    %cst_12 = arith.constant dense<0xFF800000> : vector<8xf32>
    %13 = vector.multi_reduction <maximumf>, %12, %cst_12 [1] : vector<8x8xf32> to vector<8xf32>
    %14 = vector.shape_cast %13 : vector<8xf32> to vector<8x1xf32>
    %15 = vector.broadcast %14 : vector<8x1xf32> to vector<8x8xf32>
    %16 = arith.subf %12, %15 : vector<8x8xf32>
    %17 = math.exp %16 : vector<8x8xf32>
    %cst_13 = arith.constant dense<0.000000e+00> : vector<8xf32>
    %18 = vector.multi_reduction <add>, %17, %cst_13 [1] : vector<8x8xf32> to vector<8xf32>
    %19 = vector.shape_cast %18 : vector<8xf32> to vector<8x1xf32>
    %20 = tpu.reciprocal %19 {approx = true} : vector<8x1xf32> -> vector<8x1xf32>
    %21 = vector.broadcast %20 : vector<8x1xf32> to vector<8x8xf32>
    %22 = arith.mulf %17, %21 : vector<8x8xf32>
    %23 = arith.truncf %22 : vector<8x8xf32> to vector<8x8xbf16>
    %cst_14 = arith.constant dense<0.000000e+00> : vector<8x32xf32>
    %24 = tpu.matmul %23, %7, %cst_14 {dimension_numbers = #tpu.dot_dimension_numbers<[1], [0], [0], [1], [0, 0, 1, 1], [], []>} : vector<8x8xbf16>, vector<8x32xbf16>, vector<8x32xf32> -> vector<8x32xf32>
    %c0_15 = arith.constant 0 : index
    %c0_16 = arith.constant 0 : index
    %c32 = arith.constant 32 : index
    %25 = vector.load %arg2[%c0_15, %c0_16, %c32] : memref<1x8x128xbf16, #tpu.memory_space<vmem>>, vector<1x8x32xbf16>
    %26 = vector.shape_cast %25 : vector<1x8x32xbf16> to vector<8x32xbf16>
    %c0_17 = arith.constant 0 : index
    %c0_18 = arith.constant 0 : index
    %c32_19 = arith.constant 32 : index
    %27 = vector.load %arg3[%c0_17, %c0_18, %c32_19] : memref<1x8x128xbf16, #tpu.memory_space<vmem>>, vector<1x8x32xbf16>
    %28 = vector.shape_cast %27 : vector<1x8x32xbf16> to vector<8x32xbf16>
    %c0_20 = arith.constant 0 : index
    %c0_21 = arith.constant 0 : index
    %c32_22 = arith.constant 32 : index
    %29 = vector.load %arg4[%c0_20, %c0_21, %c32_22] : memref<1x8x128xbf16, #tpu.memory_space<vmem>>, vector<1x8x32xbf16>
    %30 = vector.shape_cast %29 : vector<1x8x32xbf16> to vector<8x32xbf16>
    %cst_23 = arith.constant dense<0.000000e+00> : vector<8x8xf32>
    %31 = tpu.matmul %26, %28, %cst_23 {dimension_numbers = #tpu.dot_dimension_numbers<[1], [1], [0], [0], [0, 0, 1, 0], [], []>} : vector<8x32xbf16>, vector<8x32xbf16>, vector<8x8xf32> -> vector<8x8xf32>
    %cst_24 = arith.constant 0.176776692 : f32
    %32 = vector.broadcast %cst_24 : f32 to vector<8x8xf32>
    %33 = arith.mulf %31, %32 : vector<8x8xf32>
    %34 = vector.broadcast %1 : vector<1x8xf32> to vector<8x8xf32>
    %35 = arith.addf %33, %34 : vector<8x8xf32>
    %cst_25 = arith.constant dense<0xFF800000> : vector<8xf32>
    %36 = vector.multi_reduction <maximumf>, %35, %cst_25 [1] : vector<8x8xf32> to vector<8xf32>
    %37 = vector.shape_cast %36 : vector<8xf32> to vector<8x1xf32>
    %38 = vector.broadcast %37 : vector<8x1xf32> to vector<8x8xf32>
    %39 = arith.subf %35, %38 : vector<8x8xf32>
    %40 = math.exp %39 : vector<8x8xf32>
    %cst_26 = arith.constant dense<0.000000e+00> : vector<8xf32>
    %41 = vector.multi_reduction <add>, %40, %cst_26 [1] : vector<8x8xf32> to vector<8xf32>
    %42 = vector.shape_cast %41 : vector<8xf32> to vector<8x1xf32>
    %43 = tpu.reciprocal %42 {approx = true} : vector<8x1xf32> -> vector<8x1xf32>
    %44 = vector.broadcast %43 : vector<8x1xf32> to vector<8x8xf32>
    %45 = arith.mulf %40, %44 : vector<8x8xf32>
    %46 = arith.truncf %45 : vector<8x8xf32> to vector<8x8xbf16>
    %cst_27 = arith.constant dense<0.000000e+00> : vector<8x32xf32>
    %47 = tpu.matmul %46, %30, %cst_27 {dimension_numbers = #tpu.dot_dimension_numbers<[1], [0], [0], [1], [0, 0, 1, 1], [], []>} : vector<8x8xbf16>, vector<8x32xbf16>, vector<8x32xf32> -> vector<8x32xf32>
    %c0_28 = arith.constant 0 : index
    %c0_29 = arith.constant 0 : index
    %c64 = arith.constant 64 : index
    %48 = vector.load %arg2[%c0_28, %c0_29, %c64] : memref<1x8x128xbf16, #tpu.memory_space<vmem>>, vector<1x8x32xbf16>
    %49 = vector.shape_cast %48 : vector<1x8x32xbf16> to vector<8x32xbf16>
    %c0_30 = arith.constant 0 : index
    %c0_31 = arith.constant 0 : index
    %c64_32 = arith.constant 64 : index
    %50 = vector.load %arg3[%c0_30, %c0_31, %c64_32] : memref<1x8x128xbf16, #tpu.memory_space<vmem>>, vector<1x8x32xbf16>
    %51 = vector.shape_cast %50 : vector<1x8x32xbf16> to vector<8x32xbf16>
    %c0_33 = arith.constant 0 : index
    %c0_34 = arith.constant 0 : index
    %c64_35 = arith.constant 64 : index
    %52 = vector.load %arg4[%c0_33, %c0_34, %c64_35] : memref<1x8x128xbf16, #tpu.memory_space<vmem>>, vector<1x8x32xbf16>
    %53 = vector.shape_cast %52 : vector<1x8x32xbf16> to vector<8x32xbf16>
    %cst_36 = arith.constant dense<0.000000e+00> : vector<8x8xf32>
    %54 = tpu.matmul %49, %51, %cst_36 {dimension_numbers = #tpu.dot_dimension_numbers<[1], [1], [0], [0], [0, 0, 1, 0], [], []>} : vector<8x32xbf16>, vector<8x32xbf16>, vector<8x8xf32> -> vector<8x8xf32>
    %cst_37 = arith.constant 0.176776692 : f32
    %55 = vector.broadcast %cst_37 : f32 to vector<8x8xf32>
    %56 = arith.mulf %54, %55 : vector<8x8xf32>
    %57 = vector.broadcast %1 : vector<1x8xf32> to vector<8x8xf32>
    %58 = arith.addf %56, %57 : vector<8x8xf32>
    %cst_38 = arith.constant dense<0xFF800000> : vector<8xf32>
    %59 = vector.multi_reduction <maximumf>, %58, %cst_38 [1] : vector<8x8xf32> to vector<8xf32>
    %60 = vector.shape_cast %59 : vector<8xf32> to vector<8x1xf32>
    %61 = vector.broadcast %60 : vector<8x1xf32> to vector<8x8xf32>
    %62 = arith.subf %58, %61 : vector<8x8xf32>
    %63 = math.exp %62 : vector<8x8xf32>
    %cst_39 = arith.constant dense<0.000000e+00> : vector<8xf32>
    %64 = vector.multi_reduction <add>, %63, %cst_39 [1] : vector<8x8xf32> to vector<8xf32>
    %65 = vector.shape_cast %64 : vector<8xf32> to vector<8x1xf32>
    %66 = tpu.reciprocal %65 {approx = true} : vector<8x1xf32> -> vector<8x1xf32>
    %67 = vector.broadcast %66 : vector<8x1xf32> to vector<8x8xf32>
    %68 = arith.mulf %63, %67 : vector<8x8xf32>
    %69 = arith.truncf %68 : vector<8x8xf32> to vector<8x8xbf16>
    %cst_40 = arith.constant dense<0.000000e+00> : vector<8x32xf32>
    %70 = tpu.matmul %69, %53, %cst_40 {dimension_numbers = #tpu.dot_dimension_numbers<[1], [0], [0], [1], [0, 0, 1, 1], [], []>} : vector<8x8xbf16>, vector<8x32xbf16>, vector<8x32xf32> -> vector<8x32xf32>
    %c0_41 = arith.constant 0 : index
    %c0_42 = arith.constant 0 : index
    %c96 = arith.constant 96 : index
    %71 = vector.load %arg2[%c0_41, %c0_42, %c96] : memref<1x8x128xbf16, #tpu.memory_space<vmem>>, vector<1x8x32xbf16>
    %72 = vector.shape_cast %71 : vector<1x8x32xbf16> to vector<8x32xbf16>
    %c0_43 = arith.constant 0 : index
    %c0_44 = arith.constant 0 : index
    %c96_45 = arith.constant 96 : index
    %73 = vector.load %arg3[%c0_43, %c0_44, %c96_45] : memref<1x8x128xbf16, #tpu.memory_space<vmem>>, vector<1x8x32xbf16>
    %74 = vector.shape_cast %73 : vector<1x8x32xbf16> to vector<8x32xbf16>
    %c0_46 = arith.constant 0 : index
    %c0_47 = arith.constant 0 : index
    %c96_48 = arith.constant 96 : index
    %75 = vector.load %arg4[%c0_46, %c0_47, %c96_48] : memref<1x8x128xbf16, #tpu.memory_space<vmem>>, vector<1x8x32xbf16>
    %76 = vector.shape_cast %75 : vector<1x8x32xbf16> to vector<8x32xbf16>
    %cst_49 = arith.constant dense<0.000000e+00> : vector<8x8xf32>
    %77 = tpu.matmul %72, %74, %cst_49 {dimension_numbers = #tpu.dot_dimension_numbers<[1], [1], [0], [0], [0, 0, 1, 0], [], []>} : vector<8x32xbf16>, vector<8x32xbf16>, vector<8x8xf32> -> vector<8x8xf32>
    %cst_50 = arith.constant 0.176776692 : f32
    %78 = vector.broadcast %cst_50 : f32 to vector<8x8xf32>
    %79 = arith.mulf %77, %78 : vector<8x8xf32>
    %80 = vector.broadcast %1 : vector<1x8xf32> to vector<8x8xf32>
    %81 = arith.addf %79, %80 : vector<8x8xf32>
    %cst_51 = arith.constant dense<0xFF800000> : vector<8xf32>
    %82 = vector.multi_reduction <maximumf>, %81, %cst_51 [1] : vector<8x8xf32> to vector<8xf32>
    %83 = vector.shape_cast %82 : vector<8xf32> to vector<8x1xf32>
    %84 = vector.broadcast %83 : vector<8x1xf32> to vector<8x8xf32>
    %85 = arith.subf %81, %84 : vector<8x8xf32>
    %86 = math.exp %85 : vector<8x8xf32>
    %cst_52 = arith.constant dense<0.000000e+00> : vector<8xf32>
    %87 = vector.multi_reduction <add>, %86, %cst_52 [1] : vector<8x8xf32> to vector<8xf32>
    %88 = vector.shape_cast %87 : vector<8xf32> to vector<8x1xf32>
    %89 = tpu.reciprocal %88 {approx = true} : vector<8x1xf32> -> vector<8x1xf32>
    %90 = vector.broadcast %89 : vector<8x1xf32> to vector<8x8xf32>
    %91 = arith.mulf %86, %90 : vector<8x8xf32>
    %92 = arith.truncf %91 : vector<8x8xf32> to vector<8x8xbf16>
    %cst_53 = arith.constant dense<0.000000e+00> : vector<8x32xf32>
    %93 = tpu.matmul %92, %76, %cst_53 {dimension_numbers = #tpu.dot_dimension_numbers<[1], [0], [0], [1], [0, 0, 1, 1], [], []>} : vector<8x8xbf16>, vector<8x32xbf16>, vector<8x32xf32> -> vector<8x32xf32>
    %94 = tpu.concatenate %24, %47, %70, %93 in 1 : vector<8x32xf32>, vector<8x32xf32>, vector<8x32xf32>, vector<8x32xf32> -> vector<8x128xf32>
    %95 = arith.truncf %94 : vector<8x128xf32> to vector<8x128xbf16>
    %c0_54 = arith.constant 0 : index
    %c0_55 = arith.constant 0 : index
    %c0_56 = arith.constant 0 : index
    %96 = vector.load %arg6[%c0_54, %c0_55, %c0_56] : memref<1x8x128xbf16, #tpu.memory_space<vmem>>, vector<1x8x128xbf16>
    %97 = vector.shape_cast %96 : vector<1x8x128xbf16> to vector<8x128xbf16>
    %98 = vector.shape_cast %95 : vector<8x128xbf16> to vector<1x8x128xbf16>
    tpu.vector_store %arg6[%c0_54, %c0_55, %c0_56], %98 {strides = array<i32>} : memref<1x8x128xbf16, #tpu.memory_space<vmem>>, vector<1x8x128xbf16>,
    return
  }
  func.func @transform_0(%arg0: i32, %arg1: i32) -> (i32, i32, i32) {
    %c0_i32 = arith.constant 0 : i32
    %c0_i32_0 = arith.constant 0 : i32
    return %arg0, %arg1, %c0_i32 : i32, i32, i32
  }
  func.func @transform_1(%arg0: i32, %arg1: i32) -> (i32, i32, i32) {
    %c0_i32 = arith.constant 0 : i32
    %c0_i32_0 = arith.constant 0 : i32
    %c0_i32_1 = arith.constant 0 : i32
    return %arg0, %c0_i32, %c0_i32_0 : i32, i32, i32
  }
  func.func @transform_2(%arg0: i32, %arg1: i32) -> (i32, i32, i32) {
    %c0_i32 = arith.constant 0 : i32
    %c1_i32 = arith.constant 1 : i32
    %c0_i32_0 = arith.constant 0 : i32
    return %arg0, %c0_i32, %c1_i32 : i32, i32, i32
  }
  func.func @transform_3(%arg0: i32, %arg1: i32) -> (i32, i32, i32) {
    %c0_i32 = arith.constant 0 : i32
    %c0_i32_0 = arith.constant 0 : i32
    %c0_i32_1 = arith.constant 0 : i32
    return %arg0, %c0_i32, %c0_i32_0 : i32, i32, i32
  }
  func.func @transform_4(%arg0: i32, %arg1: i32) -> (i32, i32, i32) {
    %c0_i32 = arith.constant 0 : i32
    %c0_i32_0 = arith.constant 0 : i32
    return %arg0, %arg1, %c0_i32 : i32, i32, i32
  }
}

module attributes {stable_mosaic.version = 11 : i64} {
  func.func @_layernorm_kernel(%arg0: i32, %arg1: memref<16x128xbf16, #tpu.memory_space<vmem>>, %arg2: memref<1x128xbf16, #tpu.memory_space<vmem>>, %arg3: memref<1x128xbf16, #tpu.memory_space<vmem>>, %arg4: memref<16x128xbf16, #tpu.memory_space<vmem>>) attributes {dimension_semantics = [#tpu.dimension_semantics<parallel>], iteration_bounds = array<i64: 1>, scalar_prefetch = 0 : i64, scratch_operands = 0 : i64, tpu.core_type = #tpu.core_type<tc>, window_params = [{transform_indices = @transform_0, window_bounds = array<i64: 16, 128>}, {pipeline_mode = #tpu.pipeline_mode<synchronous>, transform_indices = @transform_1, window_bounds = array<i64: 1, 128>}, {pipeline_mode = #tpu.pipeline_mode<synchronous>, transform_indices = @transform_2, window_bounds = array<i64: 1, 128>}, {transform_indices = @transform_3, window_bounds = array<i64: 16, 128>}]} {
    %c0 = arith.constant 0 : index
    %c0_0 = arith.constant 0 : index
    %0 = vector.load %arg1[%c0, %c0_0] : memref<16x128xbf16, #tpu.memory_space<vmem>>, vector<16x128xbf16>
    %1 = arith.extf %0 : vector<16x128xbf16> to vector<16x128xf32>
    %cst = arith.constant dense<0.000000e+00> : vector<16xf32>
    %2 = vector.multi_reduction <add>, %1, %cst [1] : vector<16x128xf32> to vector<16xf32>
    %3 = vector.shape_cast %2 : vector<16xf32> to vector<16x1xf32>
    %cst_1 = arith.constant 1.280000e+02 : f32
    %4 = vector.broadcast %cst_1 : f32 to vector<16x1xf32>
    %5 = arith.divf %3, %4 : vector<16x1xf32>
    %6 = vector.broadcast %5 : vector<16x1xf32> to vector<16x128xf32>
    %7 = arith.subf %1, %6 : vector<16x128xf32>
    %8 = arith.mulf %7, %7 : vector<16x128xf32>
    %cst_2 = arith.constant dense<0.000000e+00> : vector<16xf32>
    %9 = vector.multi_reduction <add>, %8, %cst_2 [1] : vector<16x128xf32> to vector<16xf32>
    %10 = vector.shape_cast %9 : vector<16xf32> to vector<16x1xf32>
    %cst_3 = arith.constant 1.280000e+02 : f32
    %11 = vector.broadcast %cst_3 : f32 to vector<16x1xf32>
    %12 = arith.divf %10, %11 : vector<16x1xf32>
    %13 = vector.broadcast %5 : vector<16x1xf32> to vector<16x128xf32>
    %14 = arith.subf %1, %13 : vector<16x128xf32>
    %cst_4 = arith.constant 9.99999997E-7 : f32
    %15 = vector.broadcast %cst_4 : f32 to vector<16x1xf32>
    %16 = arith.addf %12, %15 : vector<16x1xf32>
    %17 = math.rsqrt %16 : vector<16x1xf32>
    %18 = vector.broadcast %17 : vector<16x1xf32> to vector<16x128xf32>
    %19 = arith.mulf %14, %18 : vector<16x128xf32>
    %c0_5 = arith.constant 0 : index
    %c0_6 = arith.constant 0 : index
    %20 = vector.load %arg2[%c0_5, %c0_6] : memref<1x128xbf16, #tpu.memory_space<vmem>>, vector<1x128xbf16>
    %21 = arith.extf %20 : vector<1x128xbf16> to vector<1x128xf32>
    %22 = vector.broadcast %21 : vector<1x128xf32> to vector<16x128xf32>
    %23 = arith.mulf %19, %22 : vector<16x128xf32>
    %c0_7 = arith.constant 0 : index
    %c0_8 = arith.constant 0 : index
    %24 = vector.load %arg3[%c0_7, %c0_8] : memref<1x128xbf16, #tpu.memory_space<vmem>>, vector<1x128xbf16>
    %25 = arith.extf %24 : vector<1x128xbf16> to vector<1x128xf32>
    %26 = vector.broadcast %25 : vector<1x128xf32> to vector<16x128xf32>
    %27 = arith.addf %23, %26 : vector<16x128xf32>
    %28 = arith.truncf %27 : vector<16x128xf32> to vector<16x128xbf16>
    %c0_9 = arith.constant 0 : index
    %c0_10 = arith.constant 0 : index
    %29 = vector.load %arg4[%c0_9, %c0_10] : memref<16x128xbf16, #tpu.memory_space<vmem>>, vector<16x128xbf16>
    tpu.vector_store %arg4[%c0_9, %c0_10], %28 {strides = array<i32>} : memref<16x128xbf16, #tpu.memory_space<vmem>>, vector<16x128xbf16>,
    return
  }
  func.func @transform_0(%arg0: i32) -> (i32, i32) {
    %c0_i32 = arith.constant 0 : i32
    %c0_i32_0 = arith.constant 0 : i32
    return %arg0, %c0_i32 : i32, i32
  }
  func.func @transform_1(%arg0: i32) -> (i32, i32) {
    %c0_i32 = arith.constant 0 : i32
    %c0_i32_0 = arith.constant 0 : i32
    %c0_i32_1 = arith.constant 0 : i32
    return %c0_i32, %c0_i32_0 : i32, i32
  }
  func.func @transform_2(%arg0: i32) -> (i32, i32) {
    %c0_i32 = arith.constant 0 : i32
    %c0_i32_0 = arith.constant 0 : i32
    %c0_i32_1 = arith.constant 0 : i32
    return %c0_i32, %c0_i32_0 : i32, i32
  }
  func.func @transform_3(%arg0: i32) -> (i32, i32) {
    %c0_i32 = arith.constant 0 : i32
    %c0_i32_0 = arith.constant 0 : i32
    return %arg0, %c0_i32 : i32, i32
  }
}

</mosaic_0001>

<bundles_post_ra>
// kernel: transformer_forward.26
= control target key start
LH: loop header
LB: loop body
LE: loop exit
PB: predicated region body
PF: predicated region fallthrough
CT: control target
= control target key end

     0   :  { %s961_s18 = smov 0   ;;  %s963_s19 = smov 0   ;;  %s1113_s0 = inlined_call_operand.vmem [shape: bf16[16,128], index: 0, kind: input, shape index: {}]   ;;  %s1114_s1 = inlined_call_operand.vmem [shape: bf16[1,128], index: 1, kind: input, shape index: {}]   ;;  %s1115_s2 = inlined_call_operand.vmem [shape: bf16[1,128], index: 2, kind: input, shape index: {}]   ;;  %s1116_s3 = inlined_call_operand.vmem [shape: bf16[128,512], index: 3, kind: input, shape index: {}]   ;;  %s1117_s4 = inlined_call_operand.vmem [shape: bf16[1,512], index: 4, kind: input, shape index: {}]   ;;  %s1118_s5 = inlined_call_operand.vmem [shape: bf16[16,512], index: 5, kind: output, shape index: {}]  }
   0x1   :  { %s965_s20 = smov 0   ;;  %s967_s21 = smov 0  }
   0x2   :  { %s969_s22 = smov 0  }
   0x3 LB: > { %s24_s23 = sadd.s32 1, %s924_s21  ;;  %s729_s24 = sadd.s32 4294967295, %s928_s22   ;;  %s928_s22 = sphi %s969_s22, %s15_s22   ;;  %s924_s21 = sphi %s967_s21, %s1123_s21   ;;  %s920_s20 = sphi %s965_s20, %s1122_s20   ;;  %s916_s19 = sphi %s963_s19, %s1121_s19   ;;  %s912_s18 = sphi %s961_s18, %s1120_s18  }
   0x4   : > { %p25_p0 = scmp.ge.s32.totalorder %s24_s23, 2  ;;  %p109_p1 = scmp.ne.s32.totalorder %s916_s19, %s912_s18 }
   0x5   : > { %p110_p2 = scmp.eq.s32.totalorder %s928_s22, 0  ;;  %p167_p4 = scmp.eq.s32.totalorder %s729_s24, 1 }
   0x6   : > { %s1125_s23 = smov (%p25_p0, %s24_s23), 0  ;;  %s102_s26 = sadd.s32 1, %s916_s19 }
   0x7   : > { %p111_p3 = por %p110_p2, %p109_p1  ;;  %s99_s25 = ssub.s32 %s924_s21, %s1125_s23 }
   0x8   : > { %p100_p5 = scmp.eq.s32.totalorder %s99_s25, 0  ;;  %p996_p6 = por %p167_p4, %p109_p1 }
   0x9   : > { %p733_p7 = scmp.ge.s32.totalorder %s928_s22, 2 }
   0xa   : > { %s1001_s28 = scalar_select %p100_p5, %s916_s19, %s102_s26  }
   0xb   : > { %204 = sbr.rel (%p733_p7) target bundleno = 36 (0x24), region = 28 }
  0x10   : > { %207 = sbr.rel (!%p111_p3) target bundleno = 36 (0x24), region = 32  ;;  %s209_s29 = sand.u32 (%p111_p3), 1, %s916_s19  }
  0x11   : > { %s815_s30 = sshll.u32 (%p111_p3), %s924_s21, 3  ;;  %s734_s6 = sshll.u32 (%p111_p3), %s209_s29, 7 }
  0x12   : > { %s1009_s9 = scalar_lea.vmem (%p111_p3), %s1116_s3, %s815_s30  ;;  %s211_s10 = scalar_lea.vmem (%p111_p3), [#allocation3], %s734_s6 }
  0x13   : > { %v273_v0 = vld [vmem:[%s1009_s9] sm:$0xff] (%p111_p3)  ;;  %v275_v1 = vld [vmem:[%s1009_s9 + $0x10] sm:$0xff] (%p111_p3) }
  0x14   : > { %v277_v2 = vld [vmem:[%s1009_s9 + $0x20] sm:$0xff] (%p111_p3)  ;;  %274 = vst [vmem:[%s211_s10] sm:$0xff] (%p111_p3), %v273_v0  ;;  %v279_v3 = vld [vmem:[%s1009_s9 + $0x30] sm:$0xff] (%p111_p3) }
  0x15   : > { %276 = vst [vmem:[%s211_s10 + $0x8] sm:$0xff] %v275_v1  ;;  %v281_v4 = vld [vmem:[%s1009_s9 + $0x40] sm:$0xff]  ;;  %v283_v5 = vld [vmem:[%s1009_s9 + $0x50] sm:$0xff] }
  0x16   : > { %278 = vst [vmem:[%s211_s10 + $0x10] sm:$0xff] %v277_v2  ;;  %v285_v6 = vld [vmem:[%s1009_s9 + $0x60] sm:$0xff]  ;;  %v287_v7 = vld [vmem:[%s1009_s9 + $0x70] sm:$0xff] }
  0x17   : > { %280 = vst [vmem:[%s211_s10 + $0x18] sm:$0xff] %v279_v3  ;;  %v289_v8 = vld [vmem:[%s1009_s9 + $0x80] sm:$0xff]  ;;  %v291_v9 = vld [vmem:[%s1009_s9 + $0x90] sm:$0xff] }
  0x18   : > { %282 = vst [vmem:[%s211_s10 + $0x20] sm:$0xff] %v281_v4  ;;  %v293_v10 = vld [vmem:[%s1009_s9 + $0xa0] sm:$0xff]  ;;  %v295_v11 = vld [vmem:[%s1009_s9 + $0xb0] sm:$0xff] }
  0x19   : > { %284 = vst [vmem:[%s211_s10 + $0x28] sm:$0xff] %v283_v5  ;;  %v297_v12 = vld [vmem:[%s1009_s9 + $0xc0] sm:$0xff]  ;;  %v299_v13 = vld [vmem:[%s1009_s9 + $0xd0] sm:$0xff] }
  0x1a   : > { %286 = vst [vmem:[%s211_s10 + $0x30] sm:$0xff] %v285_v6  ;;  %v301_v14 = vld [vmem:[%s1009_s9 + $0xe0] sm:$0xff]  ;;  %v303_v15 = vld [vmem:[%s1009_s9 + $0xf0] sm:$0xff] }
  0x1b   : > { %288 = vst [vmem:[%s211_s10 + $0x38] sm:$0xff] %v287_v7 }
  0x1c   : > { %290 = vst [vmem:[%s211_s10 + $0x40] sm:$0xff] %v289_v8 }
  0x1d   : > { %292 = vst [vmem:[%s211_s10 + $0x48] sm:$0xff] %v291_v9 }
  0x1e   : > { %294 = vst [vmem:[%s211_s10 + $0x50] sm:$0xff] %v293_v10 }
  0x1f   : > { %296 = vst [vmem:[%s211_s10 + $0x58] sm:$0xff] %v295_v11 }
  0x20   : > { %298 = vst [vmem:[%s211_s10 + $0x60] sm:$0xff] %v297_v12 }
  0x21   : > { %300 = vst [vmem:[%s211_s10 + $0x68] sm:$0xff] %v299_v13 }
  0x22   : > { %302 = vst [vmem:[%s211_s10 + $0x70] sm:$0xff] %v301_v14 }
  0x23   : > { %304 = vst [vmem:[%s211_s10 + $0x78] sm:$0xff] %v303_v15 }
  0x24 PF: > { %p737_p8 = scmp.ge.s32.totalorder %s928_s22, 1  ;;  %p317_p9 = scmp.lt.s32.totalorder %s928_s22, 3 }
  0x26   : > { %p318_p10 = pnand %p737_p8, %p317_p9 }
  0x27   : > { %s324_s11 = sand.u32 (!%p318_p10), 1, %s912_s18   ;;  %s740_s12 = sshll.u32 (!%p318_p10), %s920_s20, 1 }
  0x28   : > { %321 = sbr.rel (%p318_p10) target bundleno = 512 (0x200), region = 74  ;;  %s738_s13 = sshll.u32 (!%p318_p10), %s324_s11, 7 }
  0x29   : > { %s739_s14 = sshll.u32 (!%p318_p10), %s324_s11, 4  ;;  %p367_p11 = scmp.lt.s32.totalorder (!%p318_p10), %s740_s12, 3 }
  0x2a   : > { %s1037_s24 = scalar_lea.vmem (!%p318_p10), [#allocation3], %s738_s13  ;;  %s1039_s25 = scalar_lea.vmem (!%p318_p10), [#allocation4], %s739_s14 }
  0x2b   : > { %p741_p12 = scmp.ne.s32.totalorder (!%p318_p10), %s920_s20, 0 }
  0x2d   : > { %s1127_s12 = smov (!%p367_p11, %s740_s12), 3  ;;  %376 = sbr.rel (%p741_p12) target bundleno = 330 (0x14a), region = 82 }
  0x2e   : > { %s369_s17 = scalar_lea.vmem %s1117_s4, %s1127_s12 }
  0x32   : > { %v835_v16 = vld [vmem:[%s1113_s0] sm:$0xff]   ;;  %v930_v19 = vmov 128.0  }
  0x33   : > { %v836_v17 = vunpack.c.l.bf16 %v835_v16  ;;  %v837_v18 = vunpack.c.h.bf16 %v835_v16  ;;  %884 = vrcp.f32 %v930_v19  ;;  %v428_v46 = vld [vmem:[%s1114_s1] sm:$0x1] }
  0x34   : > { %v429_v50 = vunpack.c.l.bf16 %v428_v46  ;;  %v433_v51 = vld [vmem:[%s1115_s2] sm:$0x1] }
  0x35   : > { %381 = vadd.xlane.f32.xlu0 %v836_v17  ;;  %v434_v56 = vunpack.c.l.bf16 %v433_v51 }
  0x36   : > { %v430_v55 = vperm.slane %v429_v50, 0 }
  0x37   : > { %v435_v60 = vperm.slane %v434_v56, 0 }
  0x39   : > { %v885_v20 = vpop.eup %884 }
  0x3a   : > { %v386_v21 = vmul.f32 128.0, %v885_v20  ;;  %vm390_vm0 = vweird.f32 %v885_v20 }
  0x3c   : > { %v387_v22 = vsub.f32 1.0, %v386_v21 }
  0x3d   : > { %383 = vadd.xlane.f32.xlu0 %v837_v18 }
  0x3e   : > { %v388_v23 = vmul.f32 %v885_v20, %v387_v22 }
  0x40   : > { %v389_v24 = vadd.f32 %v885_v20, %v388_v23 }
  0x42   : > { %v391_v25 = vsel %vm390_vm0, %v885_v20, %v389_v24 }
  0xa8   : > { %v382_v26 = vpop.xlane.xlu0 %381 }
  0xa9   : > { %v392_v27 = vmul.f32 %v391_v25, %v382_v26 }
  0xab   : > { %v394_v28 = vsub.f32 %v836_v17, %v392_v27 }
  0xad   : > { %v396_v29 = vmul.f32 %v394_v28, %v394_v28 }
  0xaf   : > { %398 = vadd.xlane.f32.xlu1 %v396_v29 }
  0xb0   : > { %v384_v30 = vpop.xlane.xlu0 %383 }
  0xb1   : > { %v393_v31 = vmul.f32 %v391_v25, %v384_v30 }
  0xb3   : > { %v395_v32 = vsub.f32 %v837_v18, %v393_v31 }
  0xb5   : > { %v397_v33 = vmul.f32 %v395_v32, %v395_v32 }
  0xb7   : > { %400 = vadd.xlane.f32.xlu1 %v397_v33 }
 0x122   : > { %v399_v34 = vpop.xlane.xlu1 %398 }
 0x123   : > { %v402_v35 = vmul.f32 %v399_v34, %v391_v25 }
 0x125   : > { %v404_v36 = vadd.f32 1e-06, %v402_v35 }
 0x127   : > { %886 = vrsqrt.f32 %v404_v36  ;;  %vm412_vm2 = vweird.f32 %v404_v36 }
 0x12a   : > { %v401_v37 = vpop.xlane.xlu1 %400 }
 0x12b   : > { %v403_v38 = vmul.f32 %v401_v37, %v391_v25 }
 0x12d   : > { %v887_v39 = vpop.eup %886  ;;  %v405_v40 = vadd.f32 1e-06, %v403_v38 }
 0x12e   : > { %v407_v41 = vmul.f32 %v887_v39, %v404_v36  ;;  %vm413_vm1 = vweird.f32 %v887_v39 }
 0x12f   : > { %888 = vrsqrt.f32 %v405_v40  ;;  %vm414_vm3 = vmor %vm412_vm2, %vm413_vm1  ;;  %vm422_vm5 = vweird.f32 %v405_v40 }
 0x130   : > { %v408_v42 = vmul.f32 %v887_v39, %v407_v41 }
 0x132   : > { %v409_v43 = vmul.f32 0.5, %v408_v42 }
 0x134   : > { %v410_v44 = vsub.f32 1.5, %v409_v43 }
 0x135   : > { %v889_v45 = vpop.eup %888 }
 0x136   : > { %v411_v47 = vmul.f32 %v887_v39, %v410_v44  ;;  %v417_v48 = vmul.f32 %v889_v45, %v405_v40  ;;  %vm423_vm4 = vweird.f32 %v889_v45 }
 0x137   : > { %vm424_vm6 = vmor %vm422_vm5, %vm423_vm4 }
 0x138   : > { %v418_v49 = vmul.f32 %v889_v45, %v417_v48  ;;  %v415_v52 = vsel %vm414_vm3, %v887_v39, %v411_v47 }
 0x139   : > { %v426_v57 = vmul.f32 %v415_v52, %v394_v28 }
 0x13a   : > { %v419_v53 = vmul.f32 0.5, %v418_v49 }
 0x13b   : > { %v431_v61 = vmul.f32 %v430_v55, %v426_v57 }
 0x13c   : > { %v420_v54 = vsub.f32 1.5, %v419_v53 }
 0x13d   : > { %v436_v0 = vadd.f32 %v435_v60, %v431_v61 }
 0x13e   : > { %v421_v58 = vmul.f32 %v889_v45, %v420_v54 }
 0x140   : > { %v425_v59 = vsel %vm424_vm6, %v889_v45, %v421_v58 }
 0x141   : > { %v427_v62 = vmul.f32 %v425_v59, %v395_v32 }
 0x143   : > { %v432_v63 = vmul.f32 %v430_v55, %v427_v62 }
 0x145   : > { %v437_v1 = vadd.f32 %v435_v60, %v432_v63 }
 0x147   : > { %v841_v2 = vpack.c.bf16 %v437_v1, %v436_v0 }
 0x149   : > { %842 = vst [vmem:[#allocation2] sm:$0xff] %v841_v2  }
 0x14a PF: > { %v804_v3 = vld [vmem:[%s1037_s24 + $0x70] sm:$0xf]  ;;  %v832_v4 = vld [vmem:[%s1037_s24 + $0x74] sm:$0xf0]  ;;  %v831_v5 = vld [vmem:[%s1037_s24 + $0x74] sm:$0xf] }
 0x14b   : > { %v805_v6 = vor.u32 %v832_v4, %v804_v3  ;;  %v806_v7 = vld [vmem:[%s1037_s24 + $0x78] sm:$0xf0]  ;;  %v796_v8 = vld [vmem:[%s1037_s24 + $0x60] sm:$0xf]  ;;  %v830_v9 = vld [vmem:[%s1037_s24 + $0x64] sm:$0xf0] }
 0x14c   : > { %v809_v10 = vor.u32 %v831_v5, %v806_v7  ;;  %v829_v11 = vld [vmem:[%s1037_s24 + $0x64] sm:$0xf]  ;;  %v798_v12 = vld [vmem:[%s1037_s24 + $0x68] sm:$0xf0]  ;;  %v797_v13 = vor.u32 %v830_v9, %v796_v8  ;;  %v788_v15 = vld [vmem:[%s1037_s24 + $0x50] sm:$0xf] }
 0x14d   : > { %555 = vmatpush.bf16.msra.mxu0 %v805_v6  ;;  %v801_v14 = vor.u32 %v829_v11, %v798_v12  ;;  %v828_v16 = vld [vmem:[%s1037_s24 + $0x54] sm:$0xf0]  ;;  %v827_v17 = vld [vmem:[%s1037_s24 + $0x54] sm:$0xf]  ;;  %v790_v18 = vld [vmem:[%s1037_s24 + $0x58] sm:$0xf0] }
 0x14e   : > { %569 = vmatpush.bf16.msra.mxu1 %v809_v10  ;;  %v789_v19 = vor.u32 %v828_v16, %v788_v15  ;;  %v793_v20 = vor.u32 %v827_v17, %v790_v18  ;;  %v780_v21 = vld [vmem:[%s1037_s24 + $0x40] sm:$0xf]  ;;  %v826_v22 = vld [vmem:[%s1037_s24 + $0x44] sm:$0xf0]  ;;  %v825_v23 = vld [vmem:[%s1037_s24 + $0x44] sm:$0xf] }
 0x14f   : > { %v782_v24 = vld [vmem:[%s1037_s24 + $0x48] sm:$0xf0]  ;;  %v781_v25 = vor.u32 %v826_v22, %v780_v21  ;;  %v772_v27 = vld [vmem:[%s1037_s24 + $0x30] sm:$0xf]  ;;  %v824_v28 = vld [vmem:[%s1037_s24 + $0x34] sm:$0xf0] }
 0x150   : > { %v785_v26 = vor.u32 %v825_v23, %v782_v24  ;;  %v823_v29 = vld [vmem:[%s1037_s24 + $0x34] sm:$0xf]  ;;  %v774_v30 = vld [vmem:[%s1037_s24 + $0x38] sm:$0xf0]  ;;  %v773_v31 = vor.u32 %v824_v28, %v772_v27  ;;  %v764_v33 = vld [vmem:[%s1037_s24 + $0x20] sm:$0xf] }
 0x151   : > { %556 = vmatpush.bf16.msra.mxu0 %v797_v13  ;;  %v777_v32 = vor.u32 %v823_v29, %v774_v30  ;;  %v822_v34 = vld [vmem:[%s1037_s24 + $0x24] sm:$0xf0]  ;;  %v821_v35 = vld [vmem:[%s1037_s24 + $0x24] sm:$0xf]  ;;  %v766_v36 = vld [vmem:[%s1037_s24 + $0x28] sm:$0xf0] }
 0x152   : > { %570 = vmatpush.bf16.msra.mxu1 %v801_v14  ;;  %v765_v37 = vor.u32 %v822_v34, %v764_v33  ;;  %v769_v38 = vor.u32 %v821_v35, %v766_v36  ;;  %v756_v39 = vld [vmem:[%s1037_s24 + $0x10] sm:$0xf]  ;;  %v820_v40 = vld [vmem:[%s1037_s24 + $0x14] sm:$0xf0]  ;;  %v819_v41 = vld [vmem:[%s1037_s24 + $0x14] sm:$0xf] }
 0x153   : > { %v758_v42 = vld [vmem:[%s1037_s24 + $0x18] sm:$0xf0]  ;;  %v757_v43 = vor.u32 %v820_v40, %v756_v39  ;;  %v748_v45 = vld [vmem:[%s1037_s24] sm:$0xf]  ;;  %v818_v46 = vld [vmem:[%s1037_s24 + $0x4] sm:$0xf0] }
 0x154   : > { %v761_v44 = vor.u32 %v819_v41, %v758_v42  ;;  %v817_v47 = vld [vmem:[%s1037_s24 + $0x4] sm:$0xf]  ;;  %v750_v48 = vld [vmem:[%s1037_s24 + $0x8] sm:$0xf0]  ;;  %v749_v49 = vor.u32 %v818_v46, %v748_v45  ;;  %v816_v51 = vld [vmem:[#allocation2] sm:$0xff]  ;;  %s833_s10 = sshll.u32 (%p996_p6), %s920_s20, 3 }
 0x155   : > { %557 = vmatpush.bf16.msra.mxu0 %v789_v19  ;;  %v753_v50 = vor.u32 %v817_v47, %v750_v48  ;;  %v460_v52 = vld [vmem:[%s369_s17] sm:$0x3]  ;;  %s599_s13 = scalar_lea.vmem (%p996_p6), %s1118_s5, %s833_s10 }
 0x156   : > { %571 = vmatpush.bf16.msra.mxu1 %v793_v20  ;;  %v461_v53 = vunpack.c.l.bf16 %v460_v52 }
 0x158   : > { %v463_v54 = vperm.slane %v461_v53, 0  ;;  %v464_v55 = vperm.slane %v461_v53, 2 }
 0x159   : > { %558 = vmatpush.bf16.msra.mxu0 %v781_v25 }
 0x15a   : > { %572 = vmatpush.bf16.msra.mxu1 %v785_v26  ;;  %v467_v56 = vperm.slane %v463_v54, 0  ;;  %v468_v57 = vperm.slane %v464_v55, 0 }
 0x15d   : > { %559 = vmatpush.bf16.msra.mxu0 %v773_v31 }
 0x15e   : > { %573 = vmatpush.bf16.msra.mxu1 %v777_v32 }
 0x161   : > { %560 = vmatpush.bf16.msra.mxu0 %v765_v37 }
 0x162   : > { %574 = vmatpush.bf16.msra.mxu1 %v769_v38 }
 0x165   : > { %561 = vmatpush.bf16.msra.mxu0 %v757_v43 }
 0x166   : > { %575 = vmatpush.bf16.msra.mxu1 %v761_v44 }
 0x169   : > { %562 = vmatpush.bf16.msra.mxu0 %v749_v49 }
 0x16a   : > { %576 = vmatpush.bf16.msra.mxu1 %v753_v50 }
 0x16c   : > { %563 = vmatmul.bf16.vlgmr.msra.gmra.mxu0 %v816_v51 }
 0x16d   : > { %577 = vmatmul.bf16.vlgmr.msra.gmra.mxu1 %v816_v51 }
 0x1e9   : > { %v564_v58 = vpop.f32.mrf.mxu0 }
 0x1ea   : > { %v565_v59 = vadd.f32 %v564_v58, %v467_v56  ;;  %v578_v60 = vpop.f32.mrf.mxu1 }
 0x1eb   : > { %v579_v61 = vadd.f32 %v578_v60, %v468_v57 }
 0x1ed   : > { %v583_v62 = vpack.c.bf16 %v579_v61, %v565_v59 }
 0x1ef   : > { %585 = vst [vmem:[%s1039_s25] sm:$0xff] %v583_v62 }
 0x1f1   : > { %v566_v63 = vpop.f32.mrf.mxu0 }
 0x1f2   : > { %v567_v0 = vadd.f32 %v566_v63, %v467_v56  ;;  %v580_v1 = vpop.f32.mrf.mxu1 }
 0x1f3   : > { %v581_v2 = vadd.f32 %v580_v1, %v468_v57  ;;  %593 = sbr.rel (!%p996_p6) target bundleno = 512 (0x200), region = 86 }
 0x1f5   : > { %v584_v3 = vpack.c.bf16 %v581_v2, %v567_v0 }
 0x1f6   : > { %v630_v4 = vld [vmem:[%s1039_s25] sm:$0xff] (%p996_p6) }
 0x1f7   : > { %586 = vst [vmem:[%s1039_s25 + $0x8] sm:$0xff] %v584_v3 }
 0x1f8   : > { %631 = vst [vmem:[%s599_s13] sm:$0xff] %v630_v4 }
 0x1fe   : > { %v632_v5 = vld [vmem:[%s1039_s25 + $0x8] sm:$0xff] }
 0x1ff   : > { %633 = vst [vmem:[%s599_s13 + $0x10] sm:$0xff] %v632_v5 }
 0x200 PF: > { %s15_s22 = sadd.s32 1, %s928_s22   ;;  %s1120_s18 = smov %s916_s19 }
 0x201   : > { %p12_p13 = scmp.ge.s32.totalorder %s15_s22, 4   ;;  %s1121_s19 = smov %s1001_s28 }
 0x202   : > { %s1122_s20 = smov %s924_s21  ;;  %s1123_s21 = smov %s1125_s23 }
 0x203   :  { %14 = sbr.rel (!%p12_p13) target bundleno = 3 (0x3), region = 161 }

// kernel: transformer_forward.28
= control target key start
LH: loop header
LB: loop body
LE: loop exit
PB: predicated region body
PF: predicated region fallthrough
CT: control target
= control target key end

     0   :  { %s254_s1 = inlined_call_operand.vmem [shape: bf16[128,128], index: 1, kind: input, shape index: {}]   ;;  %s255_s0 = inlined_call_operand.vmem [shape: bf16[16,128], index: 0, kind: input, shape index: {}]   ;;  %s256_s2 = inlined_call_operand.vmem [shape: bf16[1,128], index: 2, kind: input, shape index: {}]   ;;  %s257_s3 = inlined_call_operand.vmem [shape: bf16[16,128], index: 3, kind: input, shape index: {}]   ;;  %s258_s4 = inlined_call_operand.vmem [shape: bf16[16,128], index: 4, kind: output, shape index: {}]  }
   0x1   :  { %v183_v0 = vld [vmem:[%s254_s1 + $0x38] sm:$0xff]  ;;  %v182_v1 = vld [vmem:[%s254_s1 + $0x30] sm:$0xff]  ;;  %v181_v2 = vld [vmem:[%s254_s1 + $0x28] sm:$0xff] }
   0x2   :  { %97 = vmatpush.bf16.msra.mxu0 %v183_v0  ;;  %v180_v3 = vld [vmem:[%s254_s1 + $0x20] sm:$0xff]  ;;  %v179_v4 = vld [vmem:[%s254_s1 + $0x18] sm:$0xff]  ;;  %v178_v5 = vld [vmem:[%s254_s1 + $0x10] sm:$0xff] }
   0x3   :  { %v177_v6 = vld [vmem:[%s254_s1 + $0x8] sm:$0xff]  ;;  %v176_v7 = vld [vmem:[%s254_s1] sm:$0xff] }
   0x4   :  { %v175_v8 = vld [vmem:[%s255_s0] sm:$0xff] }
   0x5   :  { %v120_v9 = vld [vmem:[%s256_s2] sm:$0x1] }
   0x6   :  { %98 = vmatpush.bf16.msra.mxu0 %v182_v1  ;;  %v121_v10 = vunpack.c.l.bf16 %v120_v9  ;;  %v185_v13 = vld [vmem:[%s257_s3] sm:$0xff]  }
   0x7   :  { %v186_v15 = vunpack.c.l.bf16 %v185_v13  ;;  %v187_v16 = vunpack.c.h.bf16 %v185_v13 }
   0x8   :  { %v122_v12 = vperm.slane %v121_v10, 0 }
   0xa   :  { %99 = vmatpush.bf16.msra.mxu0 %v181_v2 }
   0xe   :  { %100 = vmatpush.bf16.msra.mxu0 %v180_v3 }
  0x12   :  { %101 = vmatpush.bf16.msra.mxu0 %v179_v4 }
  0x16   :  { %102 = vmatpush.bf16.msra.mxu0 %v178_v5 }
  0x1a   :  { %103 = vmatpush.bf16.msra.mxu0 %v177_v6 }
  0x1e   :  { %104 = vmatpush.bf16.msra.mxu0 %v176_v7 }
  0x21   :  { %105 = vmatmul.bf16.vlgmr.msra.gmra.mxu0 %v175_v8 }
  0x9e   :  { %v106_v11 = vpop.f32.mrf.mxu0 }
  0x9f   :  { %v123_v14 = vadd.f32 %v122_v12, %v106_v11 }
  0xa1   :  { %v129_v19 = vadd.f32 %v186_v15, %v123_v14 }
  0xa6   :  { %v108_v17 = vpop.f32.mrf.mxu0 }
  0xa7   :  { %v124_v18 = vadd.f32 %v122_v12, %v108_v17 }
  0xa9   :  { %v130_v20 = vadd.f32 %v187_v16, %v124_v18 }
  0xab   :  { %v191_v21 = vpack.c.bf16 %v130_v20, %v129_v19 }
  0xad   :  { %192 = vst [vmem:[%s258_s4] sm:$0xff] %v191_v21  }

// kernel: transformer_forward.27
= control target key start
LH: loop header
LB: loop body
LE: loop exit
PB: predicated region body
PF: predicated region fallthrough
CT: control target
= control target key end

     0   :  { %s798_s15 = smov 0   ;;  %s800_s16 = smov 0   ;;  %s890_s0 = inlined_call_operand.vmem [shape: bf16[2,8,384], index: 0, kind: input, shape index: {}, may-alias: {0,1,2}]   ;;  %s891_s1 = inlined_call_operand.vmem [shape: bf16[2,8,384], index: 1, kind: input, shape index: {}, may-alias: {0,1,2}]   ;;  %s892_s2 = inlined_call_operand.vmem [shape: bf16[2,8,384], index: 2, kind: input, shape index: {}, may-alias: {0,1,2}]   ;;  %s893_s3 = inlined_call_operand.vmem [shape: f32[2,1,8], index: 3, kind: input, shape index: {}]   ;;  %s894_s4 = inlined_call_operand.vmem [shape: bf16[2,8,128], index: 4, kind: output, shape index: {}]  }
   0x1   :  { %s802_s17 = smov 0  }
   0x2 LB: > { %s26_s18 = sadd.s32 1, %s764_s16  ;;  %p684_p0 = scmp.ge.s32.totalorder %s768_s17, 1  ;;  %s768_s17 = sphi %s802_s17, %s14_s17   ;;  %s764_s16 = sphi %s800_s16, %s896_s16   ;;  %s760_s15 = sphi %s798_s15, %s895_s15  }
   0x3   : > { %p28_p1 = scmp.ge.s32.totalorder %s26_s18, 2  ;;  %p212_p2 = scmp.lt.s32.totalorder %s768_s17, 3 }
   0x5   : > { %s898_s18 = smov (%p28_p1, %s26_s18), 0  ;;  %p213_p3 = pnand %p684_p0, %p212_p2 }
   0x6   : > { %p259_p4 = scmp.lt.s32.totalorder (!%p213_p3), %s760_s15, 1  ;;  %s770_s29 = smov (!%p213_p3), 64  }
   0x7   : > { %216 = sbr.rel (%p213_p3) target bundleno = 1087 (0x43f), region = 36  ;;  %s771_s30 = smov (!%p213_p3), 32  }
   0x8   : > { %s772_s5 = smov (!%p213_p3), 96  }
   0xc   : > { %s900_s15 = smov (!%p259_p4, %s760_s15), 1  ;;  %vm295_vm0 = vcmask 261120   ;;  %vm320_vm1 = vcmask 64512   ;;  %vm336_vm2 = vcmask 1043456   ;;  %vm549_vm3 = vcmask 523264  }
   0xd   : > { %s819_s19 = smul.u32 12, %s900_s15  ;;  %s282_s28 = scalar_lea.vmem %s893_s3, %s900_s15  ;;  %vm551_vm4 = vcmask 785408  }
   0xe   : > { %v729_v7 = vld [vmem:[%s282_s28] ss:$0 sm:$0xff]  ;;  %s688_s9 = sshll.u32 %s900_s15, 2 }
   0xf   : > { %s618_s22 = scalar_lea.vmem %s891_s1, %s819_s19  ;;  %s267_s25 = scalar_lea.vmem %s890_s0, %s819_s19 }
  0x10   : > { %v689_v0 = vld [vmem:[%s618_s22 + $0x4] sm:$0xf]  ;;  %v292_v2 = vld [vmem:[%s267_s25] sm:$0xf]  ;;  %s622_s8 = scalar_lea.vmem %s892_s2, %s819_s19  ;;  %s289_s12 = scalar_lea.vmem %s894_s4, %s688_s9 }
  0x11   : > { %v300_v1 = vsel %vm295_vm0, %v689_v0, 0  ;;  %v359_v3 = vunpack.c.l.b16 %v689_v0  ;;  %v354_v5 = vunpack.c.l.b16 %v292_v2  ;;  %v690_v23 = vld [vmem:[%s622_s8 + $0x8] sm:$0xf] }
  0x12   : > { %309 = vmatpush.bf16.xpose.msra.mxu0 %v300_v1  ;;  %v338_v24 = vsel %vm336_vm2, %v690_v23, 0  ;;  %v397_v50 = vunpack.c.l.b16 %v690_v23 }
  0x13   : > { %v360_v4 = vpack.c.b16 %v359_v3, %v359_v3  ;;  %v355_v6 = vpack.c.b16 %v354_v5, %v354_v5  ;;  %347 = vmatpush.bf16.msra.mxu1 %v338_v24 }
  0x14   : > { %v398_v51 = vpack.c.b16 %v397_v50, %v397_v50 }
  0x15   : > { %422 = vrot.lane.b32.xlu2 %v360_v4, %s770_s29 }
  0x19   : > { %691 = vmatmul.msk.bf16.vlgmr.msra.gmra.mxu0 %vm295_vm0, %v292_v2 }
  0x1d   : > { %480 = vrot.lane.b32.xlu2 %v360_v4, %s771_s30 }
  0x25   : > { %420 = vrot.lane.b32.xlu2 %v355_v6, %s770_s29 }
  0x2d   : > { %478 = vrot.lane.b32.xlu2 %v355_v6, %s771_s30 }
  0x6f   : > { %v423_v13 = vpop.permute.xlu2 %422 }
  0x70   : > { %v428_v25 = vsel %vm295_vm0, %v423_v13, 0 }
  0x71   : > { %437 = vmatpush.bf16.xpose.msrb.mxu1 %v428_v25 }
  0x77   : > { %v481_v14 = vpop.permute.xlu2 %480 }
  0x78   : > { %v486_v19 = vsel %vm295_vm0, %v481_v14, 0 }
  0x79   : > { %495 = vmatpush.bf16.xpose.msrb.mxu0 %v486_v19 }
  0x7f   : > { %v421_v18 = vpop.permute.xlu2 %420 }
  0x87   : > { %v479_v22 = vpop.permute.xlu2 %478 }
  0x88   : > { %697 = vmatmul.msk.bf16.vlgmr.msrb.gmra.mxu0 %vm295_vm0, %v479_v22 }
  0x96   : > { %v311_v8 = vpop.f32.mrf.mxu0 }
  0x97   : > { %v315_v9 = vmul.f32 0.17677669, %v311_v8 }
  0x99   : > { %v319_v10 = vadd.f32 %v729_v7, %v315_v9 }
  0x9b   : > { %v321_v11 = vsel %vm320_vm1, %v319_v10, -inf }
  0x9c   : > { %322 = vmax.xlane.f32.xlu0 %v321_v11 }
  0x9e   : > { %v313_v12 = vpop.f32.mrf.mxu0 }
  0xb0   : > { %361 = vrot.lane.b32.xlu0 %v360_v4, %s772_s5 }
 0x105   : > { %v497_v32 = vpop.f32.mrf.mxu0 }
 0x106   : > { %v501_v33 = vmul.f32 0.17677669, %v497_v32 }
 0x108   : > { %v502_v34 = vadd.f32 %v729_v7, %v501_v33 }
 0x10a   : > { %v503_v35 = vsel %vm320_vm1, %v502_v34, -inf }
 0x10d   : > { %v499_v36 = vpop.f32.mrf.mxu0 }
 0x10f   : > { %v323_v15 = vpop.xlane.xlu0 %322 }
 0x110   : > { %v324_v16 = vsub.f32 %v319_v10, %v323_v15 }
 0x112   : > { %v325_v17 = vmul.f32 1.442695, %v324_v16 }
 0x114   : > { %730 = vpow2.f32 %v325_v17 }
 0x11a   : > { %v731_v20 = vpop.eup %730 }
 0x11b   : > { %v327_v21 = vsel %vm320_vm1, %v731_v20, 0.0 }
 0x11c   : > { %328 = vadd.xlane.f32.xlu1 %v327_v21 }
 0x122   : > { %v362_v26 = vpop.permute.xlu0 %361 }
 0x123   : > { %v367_v27 = vsel %vm295_vm0, %v362_v26, 0 }
 0x124   : > { %376 = vmatpush.bf16.xpose.msra.mxu2 %v367_v27 }
 0x135   : > { %356 = vrot.lane.b32.xlu1 %v355_v6, %s772_s5 }
 0x15f   : > { %504 = vmax.xlane.f32.xlu1 %v503_v35 }
 0x18f   : > { %v329_v28 = vpop.xlane.xlu1 %328 }
 0x190   : > { %732 = vrcp.f32 %v329_v28 }
 0x196   : > { %v733_v29 = vpop.eup %732 }
 0x197   : > { %v331_v30 = vmul.f32 %v733_v29, %v731_v20 }
 0x199   : > { %v332_v31 = vpack.c.bf16 %v331_v30, %v331_v30 }
 0x19b   : > { %692 = vmatmul.msk.bf16.vlgmr.msra.gmra.mxu1 %vm320_vm1, %v332_v31 }
 0x1a7   : > { %v357_v37 = vpop.permute.xlu1 %356 }
 0x1a8   : > { %693 = vmatmul.msk.bf16.vlgmr.msra.gmra.mxu2 %vm295_vm0, %v357_v37 }
 0x1ab   : > { %695 = vmatmul.msk.bf16.vlgmr.msrb.gmra.mxu1 %vm295_vm0, %v421_v18 }
 0x1d2   : > { %v505_v54 = vpop.xlane.xlu1 %504 }
 0x1d3   : > { %v506_v58 = vsub.f32 %v502_v34, %v505_v54 }
 0x1d5   : > { %v507_v60 = vmul.f32 1.442695, %v506_v58 }
 0x218   : > { %v856_v38 = vpop.f32.mrf.mxu1 }
 0x220   : > { %v351_v39 = vpop.f32.mrf.mxu1 }
 0x228   : > { %v439_v40 = vpop.f32.mrf.mxu1 }
 0x229   : > { %v443_v41 = vmul.f32 0.17677669, %v439_v40 }
 0x22b   : > { %v378_v42 = vpop.f32.mrf.mxu2  ;;  %v444_v43 = vadd.f32 %v729_v7, %v443_v41 }
 0x22c   : > { %v382_v44 = vmul.f32 0.17677669, %v378_v42 }
 0x22d   : > { %v445_v45 = vsel %vm320_vm1, %v444_v43, -inf }
 0x22e   : > { %446 = vmax.xlane.f32.xlu2 %v445_v45  ;;  %v383_v46 = vadd.f32 %v729_v7, %v382_v44 }
 0x230   : > { %v441_v47 = vpop.f32.mrf.mxu1  ;;  %v384_v48 = vsel %vm320_vm1, %v383_v46, -inf }
 0x231   : > { %385 = vmax.xlane.f32.xlu0 %v384_v48 }
 0x233   : > { %v380_v49 = vpop.f32.mrf.mxu2 }
 0x246   : > { %399 = vrot.lane.b32.xlu2 %v398_v51, %s772_s5 }
 0x2a1   : > { %v447_v52 = vpop.xlane.xlu2 %446 }
 0x2a2   : > { %v448_v53 = vsub.f32 %v444_v43, %v447_v52 }
 0x2a4   : > { %v449_v55 = vmul.f32 1.442695, %v448_v53  ;;  %v386_v56 = vpop.xlane.xlu0 %385 }
 0x2a5   : > { %v387_v57 = vsub.f32 %v383_v46, %v386_v56 }
 0x2a6   : > { %734 = vpow2.f32 %v449_v55 }
 0x2a7   : > { %v388_v59 = vmul.f32 1.442695, %v387_v57 }
 0x2a9   : > { %736 = vpow2.f32 %v388_v59  ;;  %v400_v3 = vpop.permute.xlu2 %399 }
 0x2aa   : > { %738 = vpow2.f32 %v507_v60  ;;  %v405_v4 = vsel %vm336_vm2, %v400_v3, 0 }
 0x2ab   : > { %414 = vmatpush.bf16.msra.mxu3 %v405_v4 }
 0x2ac   : > { %v735_v61 = vpop.eup %734 }
 0x2ad   : > { %v451_v62 = vsel %vm320_vm1, %v735_v61, 0.0 }
 0x2ae   : > { %452 = vadd.xlane.f32.xlu1 %v451_v62 }
 0x2af   : > { %v737_v63 = vpop.eup %736 }
 0x2b0   : > { %v390_v0 = vsel %vm320_vm1, %v737_v63, 0.0  ;;  %v739_v1 = vpop.eup %738 }
 0x2b1   : > { %391 = vadd.xlane.f32.xlu0 %v390_v0  ;;  %v509_v2 = vsel %vm320_vm1, %v739_v1, 0.0 }
 0x2b9   : > { %510 = vadd.xlane.f32.xlu0 %v509_v2 }
 0x2c7   : > { %457 = vrot.lane.b32.xlu1 %v398_v51, %s770_s29 }
 0x2cd   : > { %515 = vrot.lane.b32.xlu0 %v398_v51, %s771_s30 }
 0x321   : > { %v453_v8 = vpop.xlane.xlu1 %452 }
 0x324   : > { %v392_v5 = vpop.xlane.xlu0 %391 }
 0x325   : > { %740 = vrcp.f32 %v392_v5 }
 0x326   : > { %742 = vrcp.f32 %v453_v8 }
 0x32b   : > { %v741_v6 = vpop.eup %740 }
 0x32c   : > { %v394_v7 = vmul.f32 %v741_v6, %v737_v63  ;;  %v511_v10 = vpop.xlane.xlu0 %510  ;;  %v743_v11 = vpop.eup %742 }
 0x32d   : > { %744 = vrcp.f32 %v511_v10  ;;  %v455_v13 = vmul.f32 %v743_v11, %v735_v61 }
 0x32e   : > { %v395_v9 = vpack.c.bf16 %v394_v7, %v394_v7 }
 0x32f   : > { %v456_v17 = vpack.c.bf16 %v455_v13, %v455_v13 }
 0x330   : > { %694 = vmatmul.msk.bf16.vlgmr.msra.gmra.mxu3 %vm320_vm1, %v395_v9 }
 0x333   : > { %v745_v15 = vpop.eup %744 }
 0x334   : > { %v513_v16 = vmul.f32 %v745_v15, %v739_v1 }
 0x336   : > { %v514_v20 = vpack.c.bf16 %v513_v16, %v513_v16 }
 0x339   : > { %v458_v12 = vpop.permute.xlu1 %457 }
 0x33a   : > { %v463_v14 = vsel %vm336_vm2, %v458_v12, 0 }
 0x33b   : > { %472 = vmatpush.bf16.msrb.mxu3 %v463_v14 }
 0x33f   : > { %v516_v18 = vpop.permute.xlu0 %515 }
 0x340   : > { %696 = vmatmul.msk.bf16.vlgmr.msrb.gmra.mxu3 %vm320_vm1, %v456_v17  ;;  %v521_v19 = vsel %vm336_vm2, %v516_v18, 0 }
 0x341   : > { %530 = vmatpush.bf16.msrb.mxu2 %v521_v19 }
 0x344   : > { %698 = vmatmul.msk.bf16.vlgmr.msrb.gmra.mxu2 %vm320_vm1, %v514_v20 }
 0x3b3   : > { %v416_v21 = vpop.f32.mrf.mxu3 }
 0x3b4   : > { %537 = vrot.lane.b32.xlu2 %v416_v21, %s771_s30 }
 0x3bb   : > { %v418_v22 = vpop.f32.mrf.mxu3 }
 0x3c3   : > { %v474_v23 = vpop.f32.mrf.mxu3 }
 0x3c4   : > { %541 = vrot.lane.b32.xlu2 %v474_v23, %s770_s29 }
 0x3c7   : > { %v532_v24 = vpop.f32.mrf.mxu2 }
 0x3c8   : > { %545 = vrot.lane.b32.xlu0 %v532_v24, %s772_s5 }
 0x3cb   : > { %v476_v25 = vpop.f32.mrf.mxu3 }
 0x3cf   : > { %v534_v26 = vpop.f32.mrf.mxu2 }
 0x40e   : > { %v538_v27 = vpop.permute.xlu2 %537 }
 0x40f   : > { %v548_v29 = vsel %vm295_vm0, %v856_v38, %v538_v27 }
 0x41e   : > { %v542_v28 = vpop.permute.xlu2 %541 }
 0x41f   : > { %v550_v30 = vsel %vm549_vm3, %v548_v29, %v542_v28 }
 0x43a   : > { %v546_v31 = vpop.permute.xlu0 %545 }
 0x43b   : > { %v552_v32 = vsel %vm551_vm4, %v550_v30, %v546_v31 }
 0x43c   : > { %v553_v33 = vpack.c.bf16 %v552_v32, %v552_v32 }
 0x43e   : > { %554 = vst [vmem:[%s289_s12] sm:$0xf] %v553_v33 }
 0x43f PF: > { %s14_s17 = sadd.s32 1, %s768_s17   ;;  %s895_s15 = smov %s764_s16 }
 0x440   : > { %p11_p5 = scmp.ge.s32.totalorder %s14_s17, 4   ;;  %s896_s16 = smov %s898_s18 }
 0x442   :  { %13 = sbr.rel (!%p11_p5) target bundleno = 2 (0x2), region = 75 }

// kernel: transformer_forward.29
= control target key start
LH: loop header
LB: loop body
LE: loop exit
PB: predicated region body
PF: predicated region fallthrough
CT: control target
= control target key end

     0   :  { %v620_v3 = vmov 128.0   ;;  %s849_s0 = inlined_call_operand.vmem [shape: bf16[16,128], index: 0, kind: input, shape index: {}]   ;;  %s850_s3 = inlined_call_operand.vmem [shape: bf16[128,256], index: 3, kind: input, shape index: {}]   ;;  %s851_s5 = inlined_call_operand.vmem [shape: bf16[256,128], index: 5, kind: input, shape index: {}]   ;;  %s852_s1 = inlined_call_operand.vmem [shape: bf16[1,128], index: 1, kind: input, shape index: {}]   ;;  %s853_s2 = inlined_call_operand.vmem [shape: bf16[1,128], index: 2, kind: input, shape index: {}]   ;;  %s854_s4 = inlined_call_operand.vmem [shape: bf16[1,256], index: 4, kind: input, shape index: {}]   ;;  %s855_s6 = inlined_call_operand.vmem [shape: bf16[1,128], index: 6, kind: input, shape index: {}]   ;;  %s856_s7 = inlined_call_operand.vmem [shape: bf16[16,128], index: 7, kind: output, shape index: {}]  }
   0x1   :  { %v596_v0 = vld [vmem:[%s849_s0] sm:$0xff]   ;;  %614 = vrcp.f32 %v620_v3  ;;  %v492_v18 = vld [vmem:[%s850_s3 + $0x70] sm:$0xf]  ;;  %v578_v19 = vld [vmem:[%s850_s3 + $0x74] sm:$0xf0] }
   0x2   :  { %v664_v1 = vunpack.c.l.bf16 %v596_v0  ;;  %v667_v2 = vunpack.c.h.bf16 %v596_v0  ;;  %v577_v20 = vld [vmem:[%s850_s3 + $0x74] sm:$0xf]  ;;  %v493_v21 = vor.u32 %v578_v19, %v492_v18  ;;  %v494_v22 = vld [vmem:[%s850_s3 + $0x78] sm:$0xf0]  ;;  %v484_v24 = vld [vmem:[%s850_s3 + $0x60] sm:$0xf] }
   0x3   :  { %v497_v23 = vor.u32 %v577_v20, %v494_v22  ;;  %v576_v25 = vld [vmem:[%s850_s3 + $0x64] sm:$0xf0]  ;;  %v575_v26 = vld [vmem:[%s850_s3 + $0x64] sm:$0xf]  ;;  %v486_v28 = vld [vmem:[%s850_s3 + $0x68] sm:$0xf0] }
   0x4   :  { %34 = vadd.xlane.f32.xlu0 %v664_v1  ;;  %210 = vmatpush.bf16.msra.mxu0 %v493_v21  ;;  %v485_v27 = vor.u32 %v576_v25, %v484_v24  ;;  %v489_v29 = vor.u32 %v575_v26, %v486_v28  ;;  %v476_v30 = vld [vmem:[%s850_s3 + $0x50] sm:$0xf]  ;;  %v574_v31 = vld [vmem:[%s850_s3 + $0x54] sm:$0xf0]  ;;  %v573_v32 = vld [vmem:[%s850_s3 + $0x54] sm:$0xf] }
   0x5   :  { %224 = vmatpush.bf16.msra.mxu1 %v497_v23  ;;  %v477_v33 = vor.u32 %v574_v31, %v476_v30  ;;  %v478_v34 = vld [vmem:[%s850_s3 + $0x58] sm:$0xf0]  ;;  %v468_v36 = vld [vmem:[%s850_s3 + $0x40] sm:$0xf]  ;;  %v572_v37 = vld [vmem:[%s850_s3 + $0x44] sm:$0xf0] }
   0x6   :  { %v481_v35 = vor.u32 %v573_v32, %v478_v34  ;;  %v571_v38 = vld [vmem:[%s850_s3 + $0x44] sm:$0xf]  ;;  %v469_v39 = vor.u32 %v572_v37, %v468_v36  ;;  %v470_v40 = vld [vmem:[%s850_s3 + $0x48] sm:$0xf0]  ;;  %v460_v42 = vld [vmem:[%s850_s3 + $0x30] sm:$0xf] }
   0x7   :  { %v615_v4 = vpop.eup %614  ;;  %v473_v41 = vor.u32 %v571_v38, %v470_v40  ;;  %v570_v43 = vld [vmem:[%s850_s3 + $0x34] sm:$0xf0]  ;;  %v569_v44 = vld [vmem:[%s850_s3 + $0x34] sm:$0xf]  ;;  %v462_v46 = vld [vmem:[%s850_s3 + $0x38] sm:$0xf0] }
   0x8   :  { %v39_v5 = vmul.f32 128.0, %v615_v4  ;;  %vm43_vm0 = vweird.f32 %v615_v4  ;;  %211 = vmatpush.bf16.msra.mxu0 %v485_v27  ;;  %v461_v45 = vor.u32 %v570_v43, %v460_v42  ;;  %v465_v48 = vor.u32 %v569_v44, %v462_v46  ;;  %v452_v50 = vld [vmem:[%s850_s3 + $0x20] sm:$0xf]  ;;  %v568_v51 = vld [vmem:[%s850_s3 + $0x24] sm:$0xf0]  ;;  %v585_v19 = vld [vmem:[%s851_s5 + $0x30] sm:$0xff] }
   0x9   :  { %225 = vmatpush.bf16.msra.mxu1 %v489_v29  ;;  %v567_v52 = vld [vmem:[%s850_s3 + $0x24] sm:$0xf]  ;;  %v453_v54 = vor.u32 %v568_v51, %v452_v50  ;;  %v454_v55 = vld [vmem:[%s850_s3 + $0x28] sm:$0xf0]  ;;  %v444_v57 = vld [vmem:[%s850_s3 + $0x10] sm:$0xf] }
   0xa   :  { %v40_v6 = vsub.f32 1.0, %v39_v5  ;;  %v457_v56 = vor.u32 %v567_v52, %v454_v55  ;;  %v566_v58 = vld [vmem:[%s850_s3 + $0x14] sm:$0xf0]  ;;  %v565_v59 = vld [vmem:[%s850_s3 + $0x14] sm:$0xf]  ;;  %v584_v26 = vld [vmem:[%s851_s5 + $0x28] sm:$0xff] }
   0xb   :  { %v445_v60 = vor.u32 %v566_v58, %v444_v57  ;;  %v446_v61 = vld [vmem:[%s850_s3 + $0x18] sm:$0xf0]  ;;  %v436_v62 = vld [vmem:[%s850_s3] sm:$0xf]  ;;  %v564_v63 = vld [vmem:[%s850_s3 + $0x4] sm:$0xf0] }
   0xc   :  { %36 = vadd.xlane.f32.xlu0 %v667_v2  ;;  %v41_v7 = vmul.f32 %v615_v4, %v40_v6  ;;  %212 = vmatpush.bf16.msra.mxu0 %v477_v33  ;;  %v449_v3 = vor.u32 %v565_v59, %v446_v61  ;;  %v438_v5 = vld [vmem:[%s850_s3 + $0x8] sm:$0xf0]  ;;  %v593_v20 = vld [vmem:[%s851_s5 + $0x70] sm:$0xff]  ;;  %v81_v22 = vld [vmem:[%s852_s1] sm:$0x1] }
   0xd   :  { %226 = vmatpush.bf16.msra.mxu1 %v481_v35  ;;  %v592_v27 = vld [vmem:[%s851_s5 + $0x68] sm:$0xff]  ;;  %v82_v28 = vunpack.c.l.bf16 %v81_v22  ;;  %v86_v29 = vld [vmem:[%s853_s2] sm:$0x1] }
   0xe   :  { %v42_v8 = vadd.f32 %v615_v4, %v41_v7  ;;  %v437_v7 = vor.u32 %v564_v63, %v436_v62  ;;  %v583_v33 = vld [vmem:[%s851_s5 + $0x20] sm:$0xff]  ;;  %v87_v36 = vunpack.c.l.bf16 %v86_v29  ;;  %v580_v50 = vld [vmem:[%s851_s5 + $0x8] sm:$0xff] }
   0xf   :  { %v591_v34 = vld [vmem:[%s851_s5 + $0x60] sm:$0xff]  ;;  %v83_v35 = vperm.slane %v82_v28, 0  ;;  %v588_v51 = vld [vmem:[%s851_s5 + $0x48] sm:$0xff] }
  0x10   :  { %v670_v9 = vsel %vm43_vm0, %v615_v4, %v42_v8  ;;  %213 = vmatpush.bf16.msra.mxu0 %v469_v39  ;;  %v563_v4 = vld [vmem:[%s850_s3 + $0x4] sm:$0xf]  ;;  %v88_v40 = vperm.slane %v87_v36, 0 }
  0x11   :  { %227 = vmatpush.bf16.msra.mxu1 %v473_v41  ;;  %v441_v8 = vor.u32 %v563_v4, %v438_v5  ;;  %v579_v52 = vld [vmem:[%s851_s5] sm:$0xff] }
  0x14   :  { %214 = vmatpush.bf16.msra.mxu0 %v461_v45 }
  0x15   :  { %228 = vmatpush.bf16.msra.mxu1 %v465_v48  ;;  %v590_v48 = vld [vmem:[%s851_s5 + $0x58] sm:$0xff] }
  0x18   :  { %215 = vmatpush.bf16.msra.mxu0 %v453_v54  ;;  %v115_v54 = vld [vmem:[%s854_s4] sm:$0x3] }
  0x19   :  { %229 = vmatpush.bf16.msra.mxu1 %v457_v56  ;;  %v116_v55 = vunpack.c.l.bf16 %v115_v54 }
  0x1b   :  { %v118_v56 = vperm.slane %v116_v55, 0  ;;  %v119_v57 = vperm.slane %v116_v55, 2 }
  0x1c   :  { %216 = vmatpush.bf16.msra.mxu0 %v445_v60 }
  0x1d   :  { %230 = vmatpush.bf16.msra.mxu1 %v449_v3  ;;  %v122_v60 = vperm.slane %v118_v56, 0  ;;  %v123_v61 = vperm.slane %v119_v57, 0 }
  0x20   :  { %217 = vmatpush.bf16.msra.mxu0 %v437_v7 }
  0x21   :  { %231 = vmatpush.bf16.msra.mxu1 %v441_v8 }
  0x77   :  { %v35_v10 = vpop.xlane.xlu0 %34 }
  0x78   :  { %v45_v11 = vmul.f32 %v670_v9, %v35_v10 }
  0x7a   :  { %v674_v12 = vsub.f32 %v664_v1, %v45_v11 }
  0x7c   :  { %v49_v13 = vmul.f32 %v674_v12, %v674_v12 }
  0x7e   :  { %51 = vadd.xlane.f32.xlu1 %v49_v13 }
  0x7f   :  { %v37_v14 = vpop.xlane.xlu0 %36 }
  0x80   :  { %v46_v15 = vmul.f32 %v670_v9, %v37_v14 }
  0x82   :  { %v680_v16 = vsub.f32 %v667_v2, %v46_v15 }
  0x84   :  { %v50_v17 = vmul.f32 %v680_v16, %v680_v16 }
  0x86   :  { %53 = vadd.xlane.f32.xlu1 %v50_v17  ;;  %v586_v17 = vld [vmem:[%s851_s5 + $0x38] sm:$0xff] }
  0x87   :  { %374 = vmatpush.bf16.msra.mxu2 %v586_v17 }
  0x8b   :  { %375 = vmatpush.bf16.msra.mxu2 %v585_v19 }
  0x8f   :  { %376 = vmatpush.bf16.msra.mxu2 %v584_v26 }
  0x93   :  { %377 = vmatpush.bf16.msra.mxu2 %v583_v33 }
  0xf1   :  { %v52_v47 = vpop.xlane.xlu1 %51 }
  0xf2   :  { %v55_v49 = vmul.f32 %v52_v47, %v670_v9 }
  0xf4   :  { %v57_v53 = vadd.f32 1e-06, %v55_v49  ;;  %v589_v49 = vld [vmem:[%s851_s5 + $0x50] sm:$0xff] }
  0xf6   :  { %616 = vrsqrt.f32 %v57_v53  ;;  %vm65_vm2 = vweird.f32 %v57_v53 }
  0xf9   :  { %v54_v0 = vpop.xlane.xlu1 %53 }
  0xfa   :  { %v56_v6 = vmul.f32 %v54_v0, %v670_v9  ;;  %v594_v9 = vld [vmem:[%s851_s5 + $0x78] sm:$0xff] }
  0xfb   :  { %388 = vmatpush.bf16.msra.mxu3 %v594_v9 }
  0xfc   :  { %v617_v10 = vpop.eup %616  ;;  %v58_v11 = vadd.f32 1e-06, %v56_v6 }
  0xfd   :  { %v60_v13 = vmul.f32 %v617_v10, %v57_v53  ;;  %vm66_vm1 = vweird.f32 %v617_v10  ;;  %v587_v53 = vld [vmem:[%s851_s5 + $0x40] sm:$0xff] }
  0xfe   :  { %618 = vrsqrt.f32 %v58_v11  ;;  %vm67_vm3 = vmor %vm65_vm2, %vm66_vm1  ;;  %vm75_vm5 = vweird.f32 %v58_v11 }
  0xff   :  { %v61_v14 = vmul.f32 %v617_v10, %v60_v13  ;;  %389 = vmatpush.bf16.msra.mxu3 %v593_v20 }
 0x101   :  { %v62_v15 = vmul.f32 0.5, %v61_v14  ;;  %v411_v14 = vld [vmem:[%s855_s6] sm:$0x1] }
 0x102   :  { %v412_v9 = vunpack.c.l.bf16 %v411_v14 }
 0x103   :  { %v63_v18 = vsub.f32 1.5, %v62_v15  ;;  %390 = vmatpush.bf16.msra.mxu3 %v592_v27 }
 0x104   :  { %v619_v21 = vpop.eup %618  ;;  %v413_v19 = vperm.slane %v412_v9, 0 }
 0x105   :  { %v64_v23 = vmul.f32 %v617_v10, %v63_v18  ;;  %v70_v24 = vmul.f32 %v619_v21, %v58_v11  ;;  %vm76_vm4 = vweird.f32 %v619_v21 }
 0x106   :  { %vm77_vm6 = vmor %vm75_vm5, %vm76_vm4 }
 0x107   :  { %v71_v25 = vmul.f32 %v619_v21, %v70_v24  ;;  %v68_v30 = vsel %vm67_vm3, %v617_v10, %v64_v23  ;;  %391 = vmatpush.bf16.msra.mxu3 %v591_v34 }
 0x108   :  { %v79_v37 = vmul.f32 %v68_v30, %v674_v12  ;;  %v582_v12 = vld [vmem:[%s851_s5 + $0x18] sm:$0xff] }
 0x109   :  { %v72_v31 = vmul.f32 0.5, %v71_v25  ;;  %378 = vmatpush.bf16.msra.mxu2 %v582_v12 }
 0x10a   :  { %v84_v41 = vmul.f32 %v83_v35, %v79_v37 }
 0x10b   :  { %v73_v32 = vsub.f32 1.5, %v72_v31  ;;  %392 = vmatpush.bf16.msra.mxu3 %v590_v48 }
 0x10c   :  { %v89_v44 = vadd.f32 %v88_v40, %v84_v41 }
 0x10d   :  { %v74_v38 = vmul.f32 %v619_v21, %v73_v32 }
 0x10f   :  { %v78_v39 = vsel %vm77_vm6, %v619_v21, %v74_v38  ;;  %393 = vmatpush.bf16.msra.mxu3 %v589_v49 }
 0x110   :  { %v80_v42 = vmul.f32 %v78_v39, %v680_v16  ;;  %v581_v16 = vld [vmem:[%s851_s5 + $0x10] sm:$0xff] }
 0x111   :  { %379 = vmatpush.bf16.msra.mxu2 %v581_v16 }
 0x112   :  { %v85_v43 = vmul.f32 %v83_v35, %v80_v42 }
 0x113   :  { %394 = vmatpush.bf16.msra.mxu3 %v588_v51 }
 0x114   :  { %v90_v45 = vadd.f32 %v88_v40, %v85_v43 }
 0x115   :  { %380 = vmatpush.bf16.msra.mxu2 %v580_v50 }
 0x116   :  { %v602_v46 = vpack.c.bf16 %v90_v45, %v89_v44 }
 0x117   :  { %395 = vmatpush.bf16.msra.mxu3 %v587_v53 }
 0x118   :  { %603 = vst [vmem:[#allocation2] sm:$0xff] %v602_v46  }
 0x119   :  { %381 = vmatpush.bf16.msra.mxu2 %v579_v52 }
 0x11f   :  { %v562_v47 = vld [vmem:[#allocation2] sm:$0xff] }
 0x120   :  { %218 = vmatmul.bf16.vlgmr.msra.gmra.mxu0 %v562_v47  ;;  %232 = vmatmul.bf16.vlgmr.msra.gmra.mxu1 %v562_v47 }
 0x19d   :  { %v219_v58 = vpop.f32.mrf.mxu0  ;;  %v233_v59 = vpop.f32.mrf.mxu1 }
 0x19e   :  { %v220_v62 = vadd.f32 %v219_v58, %v122_v60  ;;  %v234_v63 = vadd.f32 %v233_v59, %v123_v61 }
 0x1a0   :  { %v238_v6 = vmax.f32 %v220_v62, 0.0  ;;  %v239_v7 = vmax.f32 %v234_v63, 0.0 }
 0x1a5   :  { %v221_v0 = vpop.f32.mrf.mxu0  ;;  %v235_v3 = vpop.f32.mrf.mxu1 }
 0x1a6   :  { %v222_v4 = vadd.f32 %v221_v0, %v122_v60  ;;  %v236_v5 = vadd.f32 %v235_v3, %v123_v61 }
 0x1a8   :  { %v240_v8 = vmax.f32 %v222_v4, 0.0  ;;  %v241_v10 = vmax.f32 %v236_v5, 0.0 }
 0x1aa   :  { %v244_v11 = vpack.c.bf16 %v240_v8, %v238_v6  ;;  %v245_v13 = vpack.c.bf16 %v241_v10, %v239_v7 }
 0x1ac   :  { %382 = vmatmul.bf16.vlgmr.msra.gmra.mxu2 %v244_v11  ;;  %396 = vmatmul.bf16.vlgmr.msra.gmra.mxu3 %v245_v13 }
 0x22f   :  { %v383_v15 = vpop.f32.mrf.mxu2  ;;  %v397_v17 = vpop.f32.mrf.mxu3 }
 0x230   :  { %v398_v18 = vadd.f32 %v397_v17, %v383_v15 }
 0x232   :  { %v414_v22 = vadd.f32 %v413_v19, %v398_v18 }
 0x234   :  { %v420_v25 = vadd.f32 %v664_v1, %v414_v22 }
 0x237   :  { %v385_v20 = vpop.f32.mrf.mxu2  ;;  %v399_v21 = vpop.f32.mrf.mxu3 }
 0x238   :  { %v400_v23 = vadd.f32 %v399_v21, %v385_v20 }
 0x23a   :  { %v415_v24 = vadd.f32 %v413_v19, %v400_v23 }
 0x23c   :  { %v421_v26 = vadd.f32 %v667_v2, %v415_v24 }
 0x23e   :  { %v611_v27 = vpack.c.bf16 %v421_v26, %v420_v25 }
 0x240   :  { %612 = vst [vmem:[%s856_s7] sm:$0xff] %v611_v27  }

// kernel: transformer_forward.34
= control target key start
LH: loop header
LB: loop body
LE: loop exit
PB: predicated region body
PF: predicated region fallthrough
CT: control target
= control target key end

     0   :  { %v99_v3 = vmov 128.0   ;;  %s132_s0 = inlined_call_operand.vmem [shape: bf16[16,128], index: 0, kind: input, shape index: {}]   ;;  %s133_s1 = inlined_call_operand.vmem [shape: bf16[1,128], index: 1, kind: input, shape index: {}]   ;;  %s134_s2 = inlined_call_operand.vmem [shape: bf16[1,128], index: 2, kind: input, shape index: {}]   ;;  %s135_s3 = inlined_call_operand.vmem [shape: bf16[16,128], index: 3, kind: output, shape index: {}]  }
   0x1   :  { %v84_v0 = vld [vmem:[%s132_s0] sm:$0xff]   ;;  %93 = vrcp.f32 %v99_v3 }
   0x2   :  { %v85_v1 = vunpack.c.l.bf16 %v84_v0  ;;  %v86_v2 = vunpack.c.h.bf16 %v84_v0  ;;  %v65_v30 = vld [vmem:[%s133_s1] sm:$0x1] }
   0x3   :  { %v66_v34 = vunpack.c.l.bf16 %v65_v30  ;;  %v70_v35 = vld [vmem:[%s134_s2] sm:$0x1] }
   0x4   :  { %18 = vadd.xlane.f32.xlu0 %v85_v1  ;;  %v71_v40 = vunpack.c.l.bf16 %v70_v35 }
   0x5   :  { %v67_v39 = vperm.slane %v66_v34, 0 }
   0x6   :  { %v72_v44 = vperm.slane %v71_v40, 0 }
   0x7   :  { %v94_v4 = vpop.eup %93 }
   0x8   :  { %v23_v5 = vmul.f32 128.0, %v94_v4  ;;  %vm27_vm0 = vweird.f32 %v94_v4 }
   0xa   :  { %v24_v6 = vsub.f32 1.0, %v23_v5 }
   0xc   :  { %20 = vadd.xlane.f32.xlu0 %v86_v2  ;;  %v25_v7 = vmul.f32 %v94_v4, %v24_v6 }
   0xe   :  { %v26_v8 = vadd.f32 %v94_v4, %v25_v7 }
  0x10   :  { %v28_v9 = vsel %vm27_vm0, %v94_v4, %v26_v8 }
  0x77   :  { %v19_v10 = vpop.xlane.xlu0 %18 }
  0x78   :  { %v29_v11 = vmul.f32 %v28_v9, %v19_v10 }
  0x7a   :  { %v31_v12 = vsub.f32 %v85_v1, %v29_v11 }
  0x7c   :  { %v33_v13 = vmul.f32 %v31_v12, %v31_v12 }
  0x7e   :  { %35 = vadd.xlane.f32.xlu1 %v33_v13 }
  0x7f   :  { %v21_v14 = vpop.xlane.xlu0 %20 }
  0x80   :  { %v30_v15 = vmul.f32 %v28_v9, %v21_v14 }
  0x82   :  { %v32_v16 = vsub.f32 %v86_v2, %v30_v15 }
  0x84   :  { %v34_v17 = vmul.f32 %v32_v16, %v32_v16 }
  0x86   :  { %37 = vadd.xlane.f32.xlu1 %v34_v17 }
  0xf1   :  { %v36_v18 = vpop.xlane.xlu1 %35 }
  0xf2   :  { %v39_v19 = vmul.f32 %v36_v18, %v28_v9 }
  0xf4   :  { %v41_v20 = vadd.f32 1e-06, %v39_v19 }
  0xf6   :  { %95 = vrsqrt.f32 %v41_v20  ;;  %vm49_vm2 = vweird.f32 %v41_v20 }
  0xf9   :  { %v38_v21 = vpop.xlane.xlu1 %37 }
  0xfa   :  { %v40_v22 = vmul.f32 %v38_v21, %v28_v9 }
  0xfc   :  { %v96_v23 = vpop.eup %95  ;;  %v42_v24 = vadd.f32 1e-06, %v40_v22 }
  0xfd   :  { %v44_v25 = vmul.f32 %v96_v23, %v41_v20  ;;  %vm50_vm1 = vweird.f32 %v96_v23 }
  0xfe   :  { %97 = vrsqrt.f32 %v42_v24  ;;  %vm51_vm3 = vmor %vm49_vm2, %vm50_vm1  ;;  %vm59_vm5 = vweird.f32 %v42_v24 }
  0xff   :  { %v45_v26 = vmul.f32 %v96_v23, %v44_v25 }
 0x101   :  { %v46_v27 = vmul.f32 0.5, %v45_v26 }
 0x103   :  { %v47_v28 = vsub.f32 1.5, %v46_v27 }
 0x104   :  { %v98_v29 = vpop.eup %97 }
 0x105   :  { %v48_v31 = vmul.f32 %v96_v23, %v47_v28  ;;  %v54_v32 = vmul.f32 %v98_v29, %v42_v24  ;;  %vm60_vm4 = vweird.f32 %v98_v29 }
 0x106   :  { %vm61_vm6 = vmor %vm59_vm5, %vm60_vm4 }
 0x107   :  { %v55_v33 = vmul.f32 %v98_v29, %v54_v32  ;;  %v52_v36 = vsel %vm51_vm3, %v96_v23, %v48_v31 }
 0x108   :  { %v63_v41 = vmul.f32 %v52_v36, %v31_v12 }
 0x109   :  { %v56_v37 = vmul.f32 0.5, %v55_v33 }
 0x10a   :  { %v68_v45 = vmul.f32 %v67_v39, %v63_v41 }
 0x10b   :  { %v57_v38 = vsub.f32 1.5, %v56_v37 }
 0x10c   :  { %v73_v48 = vadd.f32 %v72_v44, %v68_v45 }
 0x10d   :  { %v58_v42 = vmul.f32 %v98_v29, %v57_v38 }
 0x10f   :  { %v62_v43 = vsel %vm61_vm6, %v98_v29, %v58_v42 }
 0x110   :  { %v64_v46 = vmul.f32 %v62_v43, %v32_v16 }
 0x112   :  { %v69_v47 = vmul.f32 %v67_v39, %v64_v46 }
 0x114   :  { %v74_v49 = vadd.f32 %v72_v44, %v69_v47 }
 0x116   :  { %v90_v50 = vpack.c.bf16 %v74_v49, %v73_v48 }
 0x118   :  { %91 = vst [vmem:[%s135_s3] sm:$0xff] %v90_v50  }

// kernel: transformer_forward.36
= control target key start
LH: loop header
LB: loop body
LE: loop exit
PB: predicated region body
PF: predicated region fallthrough
CT: control target
= control target key end

     0   :  { %s815_s15 = smov 0   ;;  %s817_s16 = smov 0   ;;  %s907_s0 = inlined_call_operand.vmem [shape: bf16[2,8,384], index: 0, kind: input, shape index: {}, may-alias: {0,1,2}]   ;;  %s908_s1 = inlined_call_operand.vmem [shape: bf16[2,8,384], index: 1, kind: input, shape index: {}, may-alias: {0,1,2}]   ;;  %s909_s2 = inlined_call_operand.vmem [shape: bf16[2,8,384], index: 2, kind: input, shape index: {}, may-alias: {0,1,2}]   ;;  %s910_s3 = inlined_call_operand.vmem [shape: f32[2,8,8], index: 3, kind: input, shape index: {}]   ;;  %s911_s4 = inlined_call_operand.vmem [shape: bf16[2,8,128], index: 4, kind: output, shape index: {}]  }
   0x1   :  { %s819_s17 = smov 0  }
   0x2 LB: > { %s26_s18 = sadd.s32 1, %s781_s16  ;;  %p701_p0 = scmp.ge.s32.totalorder %s785_s17, 1  ;;  %s785_s17 = sphi %s819_s17, %s14_s17   ;;  %s781_s16 = sphi %s817_s16, %s913_s16   ;;  %s777_s15 = sphi %s815_s15, %s912_s15  }
   0x3   : > { %p28_p1 = scmp.ge.s32.totalorder %s26_s18, 2  ;;  %p218_p2 = scmp.lt.s32.totalorder %s785_s17, 3 }
   0x5   : > { %s915_s18 = smov (%p28_p1, %s26_s18), 0  ;;  %p219_p3 = pnand %p701_p0, %p218_p2 }
   0x6   : > { %p269_p4 = scmp.lt.s32.totalorder (!%p219_p3), %s777_s15, 1  ;;  %s787_s26 = smov (!%p219_p3), 64  }
   0x7   : > { %222 = sbr.rel (%p219_p3) target bundleno = 1087 (0x43f), region = 36  ;;  %s788_s27 = smov (!%p219_p3), 32  }
   0x8   : > { %s789_s6 = smov (!%p219_p3), 96  }
   0xc   : > { %s917_s15 = smov (!%p269_p4, %s777_s15), 1  ;;  %vm309_vm0 = vcmask 261120   ;;  %vm331_vm1 = vcmask 64512   ;;  %vm347_vm2 = vcmask 1043456   ;;  %vm560_vm3 = vcmask 523264  }
   0xd   : > { %s836_s19 = smul.u32 12, %s917_s15  ;;  %s705_s28 = sshll.u32 %s917_s15, 3  ;;  %vm562_vm4 = vcmask 785408  }
   0xe   : > { %s296_s5 = scalar_lea.vmem %s910_s3, %s705_s28  ;;  %s706_s10 = sshll.u32 %s917_s15, 2 }
   0xf   : > { %s633_s22 = scalar_lea.vmem %s908_s1, %s836_s19  ;;  %s277_s25 = scalar_lea.vmem %s907_s0, %s836_s19  ;;  %v305_v8 = vld [vmem:[%s296_s5] sm:$0xff] }
  0x10   : > { %v707_v0 = vld [vmem:[%s633_s22 + $0x4] sm:$0xf]  ;;  %v306_v2 = vld [vmem:[%s277_s25] sm:$0xf]  ;;  %s637_s9 = scalar_lea.vmem %s909_s2, %s836_s19  ;;  %s303_s13 = scalar_lea.vmem %s911_s4, %s706_s10 }
  0x11   : > { %v314_v1 = vsel %vm309_vm0, %v707_v0, 0  ;;  %v370_v3 = vunpack.c.l.b16 %v707_v0  ;;  %v365_v5 = vunpack.c.l.b16 %v306_v2  ;;  %v708_v23 = vld [vmem:[%s637_s9 + $0x8] sm:$0xf] }
  0x12   : > { %323 = vmatpush.bf16.xpose.msra.mxu0 %v314_v1  ;;  %v349_v24 = vsel %vm347_vm2, %v708_v23, 0  ;;  %v408_v50 = vunpack.c.l.b16 %v708_v23 }
  0x13   : > { %v371_v4 = vpack.c.b16 %v370_v3, %v370_v3  ;;  %v366_v6 = vpack.c.b16 %v365_v5, %v365_v5  ;;  %358 = vmatpush.bf16.msra.mxu1 %v349_v24 }
  0x14   : > { %v409_v51 = vpack.c.b16 %v408_v50, %v408_v50 }
  0x15   : > { %433 = vrot.lane.b32.xlu2 %v371_v4, %s787_s26 }
  0x19   : > { %709 = vmatmul.msk.bf16.vlgmr.msra.gmra.mxu0 %vm309_vm0, %v306_v2 }
  0x1d   : > { %491 = vrot.lane.b32.xlu2 %v371_v4, %s788_s27 }
  0x25   : > { %431 = vrot.lane.b32.xlu2 %v366_v6, %s787_s26 }
  0x2d   : > { %489 = vrot.lane.b32.xlu2 %v366_v6, %s788_s27 }
  0x6f   : > { %v434_v13 = vpop.permute.xlu2 %433 }
  0x70   : > { %v439_v25 = vsel %vm309_vm0, %v434_v13, 0 }
  0x71   : > { %448 = vmatpush.bf16.xpose.msrb.mxu1 %v439_v25 }
  0x77   : > { %v492_v14 = vpop.permute.xlu2 %491 }
  0x78   : > { %v497_v19 = vsel %vm309_vm0, %v492_v14, 0 }
  0x79   : > { %506 = vmatpush.bf16.xpose.msrb.mxu0 %v497_v19 }
  0x7f   : > { %v432_v18 = vpop.permute.xlu2 %431 }
  0x87   : > { %v490_v22 = vpop.permute.xlu2 %489 }
  0x88   : > { %715 = vmatmul.msk.bf16.vlgmr.msrb.gmra.mxu0 %vm309_vm0, %v490_v22 }
  0x96   : > { %v325_v7 = vpop.f32.mrf.mxu0 }
  0x97   : > { %v329_v9 = vmul.f32 0.17677669, %v325_v7 }
  0x99   : > { %v330_v10 = vadd.f32 %v329_v9, %v305_v8 }
  0x9b   : > { %v332_v11 = vsel %vm331_vm1, %v330_v10, -inf }
  0x9c   : > { %333 = vmax.xlane.f32.xlu0 %v332_v11 }
  0x9e   : > { %v327_v12 = vpop.f32.mrf.mxu0 }
  0xb0   : > { %372 = vrot.lane.b32.xlu0 %v371_v4, %s789_s6 }
 0x105   : > { %v508_v32 = vpop.f32.mrf.mxu0 }
 0x106   : > { %v512_v33 = vmul.f32 0.17677669, %v508_v32 }
 0x108   : > { %v513_v34 = vadd.f32 %v512_v33, %v305_v8 }
 0x10a   : > { %v514_v35 = vsel %vm331_vm1, %v513_v34, -inf }
 0x10d   : > { %v510_v36 = vpop.f32.mrf.mxu0 }
 0x10f   : > { %v334_v15 = vpop.xlane.xlu0 %333 }
 0x110   : > { %v335_v16 = vsub.f32 %v330_v10, %v334_v15 }
 0x112   : > { %v336_v17 = vmul.f32 1.442695, %v335_v16 }
 0x114   : > { %747 = vpow2.f32 %v336_v17 }
 0x11a   : > { %v748_v20 = vpop.eup %747 }
 0x11b   : > { %v338_v21 = vsel %vm331_vm1, %v748_v20, 0.0 }
 0x11c   : > { %339 = vadd.xlane.f32.xlu1 %v338_v21 }
 0x122   : > { %v373_v26 = vpop.permute.xlu0 %372 }
 0x123   : > { %v378_v27 = vsel %vm309_vm0, %v373_v26, 0 }
 0x124   : > { %387 = vmatpush.bf16.xpose.msra.mxu2 %v378_v27 }
 0x135   : > { %367 = vrot.lane.b32.xlu1 %v366_v6, %s789_s6 }
 0x15f   : > { %515 = vmax.xlane.f32.xlu1 %v514_v35 }
 0x18f   : > { %v340_v28 = vpop.xlane.xlu1 %339 }
 0x190   : > { %749 = vrcp.f32 %v340_v28 }
 0x196   : > { %v750_v29 = vpop.eup %749 }
 0x197   : > { %v342_v30 = vmul.f32 %v750_v29, %v748_v20 }
 0x199   : > { %v343_v31 = vpack.c.bf16 %v342_v30, %v342_v30 }
 0x19b   : > { %710 = vmatmul.msk.bf16.vlgmr.msra.gmra.mxu1 %vm331_vm1, %v343_v31 }
 0x1a7   : > { %v368_v37 = vpop.permute.xlu1 %367 }
 0x1a8   : > { %711 = vmatmul.msk.bf16.vlgmr.msra.gmra.mxu2 %vm309_vm0, %v368_v37 }
 0x1ab   : > { %713 = vmatmul.msk.bf16.vlgmr.msrb.gmra.mxu1 %vm309_vm0, %v432_v18 }
 0x1d2   : > { %v516_v54 = vpop.xlane.xlu1 %515 }
 0x1d3   : > { %v517_v58 = vsub.f32 %v513_v34, %v516_v54 }
 0x1d5   : > { %v518_v60 = vmul.f32 1.442695, %v517_v58 }
 0x218   : > { %v873_v38 = vpop.f32.mrf.mxu1 }
 0x220   : > { %v362_v39 = vpop.f32.mrf.mxu1 }
 0x228   : > { %v450_v40 = vpop.f32.mrf.mxu1 }
 0x229   : > { %v454_v41 = vmul.f32 0.17677669, %v450_v40 }
 0x22b   : > { %v389_v42 = vpop.f32.mrf.mxu2  ;;  %v455_v43 = vadd.f32 %v454_v41, %v305_v8 }
 0x22c   : > { %v393_v44 = vmul.f32 0.17677669, %v389_v42 }
 0x22d   : > { %v456_v45 = vsel %vm331_vm1, %v455_v43, -inf }
 0x22e   : > { %457 = vmax.xlane.f32.xlu2 %v456_v45  ;;  %v394_v46 = vadd.f32 %v393_v44, %v305_v8 }
 0x230   : > { %v452_v47 = vpop.f32.mrf.mxu1  ;;  %v395_v48 = vsel %vm331_vm1, %v394_v46, -inf }
 0x231   : > { %396 = vmax.xlane.f32.xlu0 %v395_v48 }
 0x233   : > { %v391_v49 = vpop.f32.mrf.mxu2 }
 0x246   : > { %410 = vrot.lane.b32.xlu2 %v409_v51, %s789_s6 }
 0x2a1   : > { %v458_v52 = vpop.xlane.xlu2 %457 }
 0x2a2   : > { %v459_v53 = vsub.f32 %v455_v43, %v458_v52 }
 0x2a4   : > { %v460_v55 = vmul.f32 1.442695, %v459_v53  ;;  %v397_v56 = vpop.xlane.xlu0 %396 }
 0x2a5   : > { %v398_v57 = vsub.f32 %v394_v46, %v397_v56 }
 0x2a6   : > { %751 = vpow2.f32 %v460_v55 }
 0x2a7   : > { %v399_v59 = vmul.f32 1.442695, %v398_v57 }
 0x2a9   : > { %753 = vpow2.f32 %v399_v59  ;;  %v411_v3 = vpop.permute.xlu2 %410 }
 0x2aa   : > { %755 = vpow2.f32 %v518_v60  ;;  %v416_v4 = vsel %vm347_vm2, %v411_v3, 0 }
 0x2ab   : > { %425 = vmatpush.bf16.msra.mxu3 %v416_v4 }
 0x2ac   : > { %v752_v61 = vpop.eup %751 }
 0x2ad   : > { %v462_v62 = vsel %vm331_vm1, %v752_v61, 0.0 }
 0x2ae   : > { %463 = vadd.xlane.f32.xlu1 %v462_v62 }
 0x2af   : > { %v754_v63 = vpop.eup %753 }
 0x2b0   : > { %v401_v0 = vsel %vm331_vm1, %v754_v63, 0.0  ;;  %v756_v1 = vpop.eup %755 }
 0x2b1   : > { %402 = vadd.xlane.f32.xlu0 %v401_v0  ;;  %v520_v2 = vsel %vm331_vm1, %v756_v1, 0.0 }
 0x2b9   : > { %521 = vadd.xlane.f32.xlu0 %v520_v2 }
 0x2c7   : > { %468 = vrot.lane.b32.xlu1 %v409_v51, %s787_s26 }
 0x2cd   : > { %526 = vrot.lane.b32.xlu0 %v409_v51, %s788_s27 }
 0x321   : > { %v464_v8 = vpop.xlane.xlu1 %463 }
 0x324   : > { %v403_v5 = vpop.xlane.xlu0 %402 }
 0x325   : > { %757 = vrcp.f32 %v403_v5 }
 0x326   : > { %759 = vrcp.f32 %v464_v8 }
 0x32b   : > { %v758_v6 = vpop.eup %757 }
 0x32c   : > { %v405_v7 = vmul.f32 %v758_v6, %v754_v63  ;;  %v522_v10 = vpop.xlane.xlu0 %521  ;;  %v760_v11 = vpop.eup %759 }
 0x32d   : > { %761 = vrcp.f32 %v522_v10  ;;  %v466_v13 = vmul.f32 %v760_v11, %v752_v61 }
 0x32e   : > { %v406_v9 = vpack.c.bf16 %v405_v7, %v405_v7 }
 0x32f   : > { %v467_v17 = vpack.c.bf16 %v466_v13, %v466_v13 }
 0x330   : > { %712 = vmatmul.msk.bf16.vlgmr.msra.gmra.mxu3 %vm331_vm1, %v406_v9 }
 0x333   : > { %v762_v15 = vpop.eup %761 }
 0x334   : > { %v524_v16 = vmul.f32 %v762_v15, %v756_v1 }
 0x336   : > { %v525_v20 = vpack.c.bf16 %v524_v16, %v524_v16 }
 0x339   : > { %v469_v12 = vpop.permute.xlu1 %468 }
 0x33a   : > { %v474_v14 = vsel %vm347_vm2, %v469_v12, 0 }
 0x33b   : > { %483 = vmatpush.bf16.msrb.mxu3 %v474_v14 }
 0x33f   : > { %v527_v18 = vpop.permute.xlu0 %526 }
 0x340   : > { %714 = vmatmul.msk.bf16.vlgmr.msrb.gmra.mxu3 %vm331_vm1, %v467_v17  ;;  %v532_v19 = vsel %vm347_vm2, %v527_v18, 0 }
 0x341   : > { %541 = vmatpush.bf16.msrb.mxu2 %v532_v19 }
 0x344   : > { %716 = vmatmul.msk.bf16.vlgmr.msrb.gmra.mxu2 %vm331_vm1, %v525_v20 }
 0x3b3   : > { %v427_v21 = vpop.f32.mrf.mxu3 }
 0x3b4   : > { %548 = vrot.lane.b32.xlu2 %v427_v21, %s788_s27 }
 0x3bb   : > { %v429_v22 = vpop.f32.mrf.mxu3 }
 0x3c3   : > { %v485_v23 = vpop.f32.mrf.mxu3 }
 0x3c4   : > { %552 = vrot.lane.b32.xlu2 %v485_v23, %s787_s26 }
 0x3c7   : > { %v543_v24 = vpop.f32.mrf.mxu2 }
 0x3c8   : > { %556 = vrot.lane.b32.xlu0 %v543_v24, %s789_s6 }
 0x3cb   : > { %v487_v25 = vpop.f32.mrf.mxu3 }
 0x3cf   : > { %v545_v26 = vpop.f32.mrf.mxu2 }
 0x40e   : > { %v549_v27 = vpop.permute.xlu2 %548 }
 0x40f   : > { %v559_v29 = vsel %vm309_vm0, %v873_v38, %v549_v27 }
 0x41e   : > { %v553_v28 = vpop.permute.xlu2 %552 }
 0x41f   : > { %v561_v30 = vsel %vm560_vm3, %v559_v29, %v553_v28 }
 0x43a   : > { %v557_v31 = vpop.permute.xlu0 %556 }
 0x43b   : > { %v563_v32 = vsel %vm562_vm4, %v561_v30, %v557_v31 }
 0x43c   : > { %v564_v33 = vpack.c.bf16 %v563_v32, %v563_v32 }
 0x43e   : > { %565 = vst [vmem:[%s303_s13] sm:$0xf] %v564_v33 }
 0x43f PF: > { %s14_s17 = sadd.s32 1, %s785_s17   ;;  %s912_s15 = smov %s781_s16 }
 0x440   : > { %p11_p5 = scmp.ge.s32.totalorder %s14_s17, 4   ;;  %s913_s16 = smov %s915_s18 }
 0x442   :  { %13 = sbr.rel (!%p11_p5) target bundleno = 2 (0x2), region = 75 }

// kernel: transformer_forward.39
= control target key start
LH: loop header
LB: loop body
LE: loop exit
PB: predicated region body
PF: predicated region fallthrough
CT: control target
= control target key end

     0   :  { %s407_s1 = inlined_call_operand.vmem [shape: bf16[128,256], index: 1, kind: input, shape index: {}]   ;;  %s408_s0 = inlined_call_operand.vmem [shape: bf16[16,128], index: 0, kind: input, shape index: {}]   ;;  %s409_s2 = inlined_call_operand.vmem [shape: bf16[1,256], index: 2, kind: input, shape index: {}]   ;;  %s410_s3 = inlined_call_operand.vmem [shape: bf16[16,256], index: 3, kind: output, shape index: {}]  }
   0x1   :  { %v256_v0 = vld [vmem:[%s407_s1 + $0x70] sm:$0xf]  ;;  %v278_v1 = vld [vmem:[%s407_s1 + $0x74] sm:$0xf0]  ;;  %v277_v2 = vld [vmem:[%s407_s1 + $0x74] sm:$0xf] }
   0x2   :  { %v257_v3 = vor.u32 %v278_v1, %v256_v0  ;;  %v258_v4 = vld [vmem:[%s407_s1 + $0x78] sm:$0xf0]  ;;  %v248_v5 = vld [vmem:[%s407_s1 + $0x60] sm:$0xf]  ;;  %v276_v6 = vld [vmem:[%s407_s1 + $0x64] sm:$0xf0] }
   0x3   :  { %v261_v7 = vor.u32 %v277_v2, %v258_v4  ;;  %v275_v8 = vld [vmem:[%s407_s1 + $0x64] sm:$0xf]  ;;  %v250_v9 = vld [vmem:[%s407_s1 + $0x68] sm:$0xf0]  ;;  %v249_v10 = vor.u32 %v276_v6, %v248_v5  ;;  %v240_v12 = vld [vmem:[%s407_s1 + $0x50] sm:$0xf] }
   0x4   :  { %130 = vmatpush.bf16.msra.mxu0 %v257_v3  ;;  %v253_v11 = vor.u32 %v275_v8, %v250_v9  ;;  %v274_v13 = vld [vmem:[%s407_s1 + $0x54] sm:$0xf0]  ;;  %v273_v14 = vld [vmem:[%s407_s1 + $0x54] sm:$0xf]  ;;  %v242_v15 = vld [vmem:[%s407_s1 + $0x58] sm:$0xf0] }
   0x5   :  { %144 = vmatpush.bf16.msra.mxu1 %v261_v7  ;;  %v241_v16 = vor.u32 %v274_v13, %v240_v12  ;;  %v245_v17 = vor.u32 %v273_v14, %v242_v15  ;;  %v232_v18 = vld [vmem:[%s407_s1 + $0x40] sm:$0xf]  ;;  %v272_v19 = vld [vmem:[%s407_s1 + $0x44] sm:$0xf0]  ;;  %v271_v20 = vld [vmem:[%s407_s1 + $0x44] sm:$0xf] }
   0x6   :  { %v234_v21 = vld [vmem:[%s407_s1 + $0x48] sm:$0xf0]  ;;  %v233_v22 = vor.u32 %v272_v19, %v232_v18  ;;  %v224_v24 = vld [vmem:[%s407_s1 + $0x30] sm:$0xf]  ;;  %v270_v25 = vld [vmem:[%s407_s1 + $0x34] sm:$0xf0] }
   0x7   :  { %v237_v23 = vor.u32 %v271_v20, %v234_v21  ;;  %v269_v26 = vld [vmem:[%s407_s1 + $0x34] sm:$0xf]  ;;  %v226_v27 = vld [vmem:[%s407_s1 + $0x38] sm:$0xf0]  ;;  %v225_v28 = vor.u32 %v270_v25, %v224_v24  ;;  %v216_v30 = vld [vmem:[%s407_s1 + $0x20] sm:$0xf] }
   0x8   :  { %131 = vmatpush.bf16.msra.mxu0 %v249_v10  ;;  %v229_v29 = vor.u32 %v269_v26, %v226_v27  ;;  %v268_v31 = vld [vmem:[%s407_s1 + $0x24] sm:$0xf0]  ;;  %v267_v32 = vld [vmem:[%s407_s1 + $0x24] sm:$0xf]  ;;  %v218_v33 = vld [vmem:[%s407_s1 + $0x28] sm:$0xf0] }
   0x9   :  { %145 = vmatpush.bf16.msra.mxu1 %v253_v11  ;;  %v217_v34 = vor.u32 %v268_v31, %v216_v30  ;;  %v221_v35 = vor.u32 %v267_v32, %v218_v33  ;;  %v208_v36 = vld [vmem:[%s407_s1 + $0x10] sm:$0xf]  ;;  %v266_v37 = vld [vmem:[%s407_s1 + $0x14] sm:$0xf0]  ;;  %v265_v38 = vld [vmem:[%s407_s1 + $0x14] sm:$0xf] }
   0xa   :  { %v210_v39 = vld [vmem:[%s407_s1 + $0x18] sm:$0xf0]  ;;  %v209_v40 = vor.u32 %v266_v37, %v208_v36  ;;  %v200_v42 = vld [vmem:[%s407_s1] sm:$0xf]  ;;  %v264_v43 = vld [vmem:[%s407_s1 + $0x4] sm:$0xf0] }
   0xb   :  { %v213_v41 = vor.u32 %v265_v38, %v210_v39  ;;  %v263_v44 = vld [vmem:[%s407_s1 + $0x4] sm:$0xf]  ;;  %v202_v45 = vld [vmem:[%s407_s1 + $0x8] sm:$0xf0]  ;;  %v201_v46 = vor.u32 %v264_v43, %v200_v42  ;;  %v173_v49 = vld [vmem:[%s409_s2] sm:$0x3] }
   0xc   :  { %132 = vmatpush.bf16.msra.mxu0 %v241_v16  ;;  %v205_v47 = vor.u32 %v263_v44, %v202_v45  ;;  %v262_v48 = vld [vmem:[%s408_s0] sm:$0xff]  ;;  %v174_v50 = vunpack.c.l.bf16 %v173_v49 }
   0xd   :  { %146 = vmatpush.bf16.msra.mxu1 %v245_v17 }
   0xe   :  { %v176_v51 = vperm.slane %v174_v50, 0  ;;  %v177_v52 = vperm.slane %v174_v50, 2 }
  0x10   :  { %133 = vmatpush.bf16.msra.mxu0 %v233_v22  ;;  %v180_v53 = vperm.slane %v176_v51, 0  ;;  %v181_v54 = vperm.slane %v177_v52, 0 }
  0x11   :  { %147 = vmatpush.bf16.msra.mxu1 %v237_v23 }
  0x14   :  { %134 = vmatpush.bf16.msra.mxu0 %v225_v28 }
  0x15   :  { %148 = vmatpush.bf16.msra.mxu1 %v229_v29 }
  0x18   :  { %135 = vmatpush.bf16.msra.mxu0 %v217_v34 }
  0x19   :  { %149 = vmatpush.bf16.msra.mxu1 %v221_v35 }
  0x1c   :  { %136 = vmatpush.bf16.msra.mxu0 %v209_v40 }
  0x1d   :  { %150 = vmatpush.bf16.msra.mxu1 %v213_v41 }
  0x20   :  { %137 = vmatpush.bf16.msra.mxu0 %v201_v46 }
  0x21   :  { %151 = vmatpush.bf16.msra.mxu1 %v205_v47 }
  0x23   :  { %138 = vmatmul.bf16.vlgmr.msra.gmra.mxu0 %v262_v48 }
  0x24   :  { %152 = vmatmul.bf16.vlgmr.msra.gmra.mxu1 %v262_v48 }
  0xa0   :  { %v139_v55 = vpop.f32.mrf.mxu0 }
  0xa1   :  { %v182_v56 = vadd.f32 %v180_v53, %v139_v55  ;;  %v153_v57 = vpop.f32.mrf.mxu1 }
  0xa2   :  { %v183_v58 = vadd.f32 %v181_v54, %v153_v57 }
  0xa4   :  { %v186_v59 = vpack.c.bf16 %v183_v58, %v182_v56 }
  0xa6   :  { %188 = vst [vmem:[%s410_s3] sm:$0xff] %v186_v59 }
  0xa8   :  { %v141_v60 = vpop.f32.mrf.mxu0 }
  0xa9   :  { %v184_v61 = vadd.f32 %v180_v53, %v141_v60  ;;  %v155_v62 = vpop.f32.mrf.mxu1 }
  0xaa   :  { %v185_v63 = vadd.f32 %v181_v54, %v155_v62 }
  0xac   :  { %v187_v0 = vpack.c.bf16 %v185_v63, %v184_v61 }
  0xae   :  { %189 = vst [vmem:[%s410_s3 + $0x8] sm:$0xff] %v187_v0 }

// kernel: transformer_forward.38
= control target key start
LH: loop header
LB: loop body
LE: loop exit
PB: predicated region body
PF: predicated region fallthrough
CT: control target
= control target key end

     0   :  { %v252_v3 = vmov 128.0   ;;  %s322_s0 = inlined_call_operand.vmem [shape: bf16[16,128], index: 0, kind: input, shape index: {}]   ;;  %s323_s3 = inlined_call_operand.vmem [shape: bf16[128,128], index: 3, kind: input, shape index: {}]   ;;  %s324_s1 = inlined_call_operand.vmem [shape: bf16[1,128], index: 1, kind: input, shape index: {}]   ;;  %s325_s2 = inlined_call_operand.vmem [shape: bf16[1,128], index: 2, kind: input, shape index: {}]   ;;  %s326_s4 = inlined_call_operand.vmem [shape: bf16[1,128], index: 4, kind: input, shape index: {}]   ;;  %s327_s5 = inlined_call_operand.vmem [shape: bf16[16,128], index: 5, kind: output, shape index: {}]  }
   0x1   :  { %v232_v0 = vld [vmem:[%s322_s0] sm:$0xff]   ;;  %246 = vrcp.f32 %v252_v3  ;;  %v230_v18 = vld [vmem:[%s323_s3 + $0x38] sm:$0xff]  ;;  %v229_v19 = vld [vmem:[%s323_s3 + $0x30] sm:$0xff] }
   0x2   :  { %v233_v1 = vunpack.c.l.bf16 %v232_v0  ;;  %v234_v2 = vunpack.c.h.bf16 %v232_v0  ;;  %164 = vmatpush.bf16.msra.mxu0 %v230_v18  ;;  %v228_v20 = vld [vmem:[%s323_s3 + $0x28] sm:$0xff]  ;;  %v227_v21 = vld [vmem:[%s323_s3 + $0x20] sm:$0xff]  ;;  %v226_v22 = vld [vmem:[%s323_s3 + $0x18] sm:$0xff] }
   0x3   :  { %v225_v26 = vld [vmem:[%s323_s3 + $0x10] sm:$0xff]  ;;  %v224_v27 = vld [vmem:[%s323_s3 + $0x8] sm:$0xff]  ;;  %v223_v30 = vld [vmem:[%s323_s3] sm:$0xff] }
   0x4   :  { %28 = vadd.xlane.f32.xlu0 %v233_v1  ;;  %v75_v38 = vld [vmem:[%s324_s1] sm:$0x1] }
   0x5   :  { %v76_v42 = vunpack.c.l.bf16 %v75_v38  ;;  %v80_v43 = vld [vmem:[%s325_s2] sm:$0x1] }
   0x6   :  { %165 = vmatpush.bf16.msra.mxu0 %v229_v19  ;;  %v81_v48 = vunpack.c.l.bf16 %v80_v43  ;;  %v107_v60 = vld [vmem:[%s326_s4] sm:$0x1] }
   0x7   :  { %v247_v4 = vpop.eup %246  ;;  %v77_v47 = vperm.slane %v76_v42, 0  ;;  %v108_v62 = vunpack.c.l.bf16 %v107_v60 }
   0x8   :  { %v33_v5 = vmul.f32 128.0, %v247_v4  ;;  %vm37_vm0 = vweird.f32 %v247_v4  ;;  %v82_v52 = vperm.slane %v81_v48, 0 }
   0x9   :  { %v109_v63 = vperm.slane %v108_v62, 0 }
   0xa   :  { %v34_v6 = vsub.f32 1.0, %v33_v5  ;;  %166 = vmatpush.bf16.msra.mxu0 %v228_v20 }
   0xc   :  { %30 = vadd.xlane.f32.xlu0 %v234_v2  ;;  %v35_v7 = vmul.f32 %v247_v4, %v34_v6 }
   0xe   :  { %v36_v8 = vadd.f32 %v247_v4, %v35_v7  ;;  %167 = vmatpush.bf16.msra.mxu0 %v227_v21 }
  0x10   :  { %v38_v9 = vsel %vm37_vm0, %v247_v4, %v36_v8 }
  0x12   :  { %168 = vmatpush.bf16.msra.mxu0 %v226_v22 }
  0x16   :  { %169 = vmatpush.bf16.msra.mxu0 %v225_v26 }
  0x1a   :  { %170 = vmatpush.bf16.msra.mxu0 %v224_v27 }
  0x1e   :  { %171 = vmatpush.bf16.msra.mxu0 %v223_v30 }
  0x77   :  { %v29_v10 = vpop.xlane.xlu0 %28 }
  0x78   :  { %v39_v11 = vmul.f32 %v38_v9, %v29_v10 }
  0x7a   :  { %v41_v12 = vsub.f32 %v233_v1, %v39_v11 }
  0x7c   :  { %v43_v13 = vmul.f32 %v41_v12, %v41_v12 }
  0x7e   :  { %45 = vadd.xlane.f32.xlu1 %v43_v13 }
  0x7f   :  { %v31_v14 = vpop.xlane.xlu0 %30 }
  0x80   :  { %v40_v15 = vmul.f32 %v38_v9, %v31_v14 }
  0x82   :  { %v42_v16 = vsub.f32 %v234_v2, %v40_v15 }
  0x84   :  { %v44_v17 = vmul.f32 %v42_v16, %v42_v16 }
  0x86   :  { %47 = vadd.xlane.f32.xlu1 %v44_v17 }
  0xf1   :  { %v46_v23 = vpop.xlane.xlu1 %45 }
  0xf2   :  { %v49_v24 = vmul.f32 %v46_v23, %v38_v9 }
  0xf4   :  { %v51_v25 = vadd.f32 1e-06, %v49_v24 }
  0xf6   :  { %248 = vrsqrt.f32 %v51_v25  ;;  %vm59_vm2 = vweird.f32 %v51_v25 }
  0xf9   :  { %v48_v28 = vpop.xlane.xlu1 %47 }
  0xfa   :  { %v50_v29 = vmul.f32 %v48_v28, %v38_v9 }
  0xfc   :  { %v249_v31 = vpop.eup %248  ;;  %v52_v32 = vadd.f32 1e-06, %v50_v29 }
  0xfd   :  { %v54_v33 = vmul.f32 %v249_v31, %v51_v25  ;;  %vm60_vm1 = vweird.f32 %v249_v31 }
  0xfe   :  { %250 = vrsqrt.f32 %v52_v32  ;;  %vm61_vm3 = vmor %vm59_vm2, %vm60_vm1  ;;  %vm69_vm5 = vweird.f32 %v52_v32 }
  0xff   :  { %v55_v34 = vmul.f32 %v249_v31, %v54_v33 }
 0x101   :  { %v56_v35 = vmul.f32 0.5, %v55_v34 }
 0x103   :  { %v57_v36 = vsub.f32 1.5, %v56_v35 }
 0x104   :  { %v251_v37 = vpop.eup %250 }
 0x105   :  { %v58_v39 = vmul.f32 %v249_v31, %v57_v36  ;;  %v64_v40 = vmul.f32 %v251_v37, %v52_v32  ;;  %vm70_vm4 = vweird.f32 %v251_v37 }
 0x106   :  { %vm71_vm6 = vmor %vm69_vm5, %vm70_vm4 }
 0x107   :  { %v65_v41 = vmul.f32 %v251_v37, %v64_v40  ;;  %v62_v44 = vsel %vm61_vm3, %v249_v31, %v58_v39 }
 0x108   :  { %v73_v49 = vmul.f32 %v62_v44, %v41_v12 }
 0x109   :  { %v66_v45 = vmul.f32 0.5, %v65_v41 }
 0x10a   :  { %v78_v53 = vmul.f32 %v77_v47, %v73_v49 }
 0x10b   :  { %v67_v46 = vsub.f32 1.5, %v66_v45 }
 0x10c   :  { %v83_v56 = vadd.f32 %v82_v52, %v78_v53 }
 0x10d   :  { %v68_v50 = vmul.f32 %v251_v37, %v67_v46 }
 0x10f   :  { %v72_v51 = vsel %vm71_vm6, %v251_v37, %v68_v50 }
 0x110   :  { %v74_v54 = vmul.f32 %v72_v51, %v42_v16 }
 0x112   :  { %v79_v55 = vmul.f32 %v77_v47, %v74_v54 }
 0x114   :  { %v84_v57 = vadd.f32 %v82_v52, %v79_v55 }
 0x116   :  { %v238_v58 = vpack.c.bf16 %v84_v57, %v83_v56 }
 0x118   :  { %239 = vst [vmem:[#allocation2] sm:$0xff] %v238_v58  }
 0x11f   :  { %v222_v59 = vld [vmem:[#allocation2] sm:$0xff] }
 0x120   :  { %172 = vmatmul.bf16.vlgmr.msra.gmra.mxu0 %v222_v59 }
 0x19d   :  { %v173_v61 = vpop.f32.mrf.mxu0 }
 0x19e   :  { %v174_v1 = vadd.f32 %v173_v61, %v109_v63 }
 0x1a5   :  { %v175_v0 = vpop.f32.mrf.mxu0 }
 0x1a6   :  { %v176_v2 = vadd.f32 %v175_v0, %v109_v63 }
 0x1a8   :  { %v243_v3 = vpack.c.bf16 %v176_v2, %v174_v1 }
 0x1aa   :  { %244 = vst [vmem:[%s327_s5] sm:$0xff] %v243_v3  }

// kernel: transformer_forward.40
= control target key start
LH: loop header
LB: loop body
LE: loop exit
PB: predicated region body
PF: predicated region fallthrough
CT: control target
= control target key end

     0   :  { %s779_s15 = smov 0   ;;  %s781_s16 = smov 0   ;;  %s874_s0 = inlined_call_operand.vmem [shape: bf16[2,8,128], index: 0, kind: input, shape index: {}]   ;;  %s875_s1 = inlined_call_operand.vmem [shape: bf16[2,8,256], index: 1, kind: input, shape index: {}, may-alias: {1,2}]   ;;  %s876_s2 = inlined_call_operand.vmem [shape: bf16[2,8,256], index: 2, kind: input, shape index: {}, may-alias: {1,2}]   ;;  %s877_s3 = inlined_call_operand.vmem [shape: f32[2,1,8], index: 3, kind: input, shape index: {}]   ;;  %s878_s4 = inlined_call_operand.vmem [shape: bf16[2,8,128], index: 4, kind: output, shape index: {}]  }
   0x1   :  { %s783_s17 = smov 0  }
   0x2 LB: > { %s26_s18 = sadd.s32 1, %s745_s16  ;;  %p663_p0 = scmp.ge.s32.totalorder %s749_s17, 1  ;;  %s749_s17 = sphi %s783_s17, %s14_s17   ;;  %s745_s16 = sphi %s781_s16, %s880_s16   ;;  %s741_s15 = sphi %s779_s15, %s879_s15  }
   0x3   : > { %p28_p1 = scmp.ge.s32.totalorder %s26_s18, 2  ;;  %p209_p2 = scmp.lt.s32.totalorder %s749_s17, 3 }
   0x5   : > { %s882_s18 = smov (%p28_p1, %s26_s18), 0  ;;  %p210_p3 = pnand %p663_p0, %p209_p2 }
   0x6   : > { %p253_p4 = scmp.lt.s32.totalorder (!%p210_p3), %s741_s15, 1  ;;  %s751_s30 = smov (!%p210_p3), 64  }
   0x7   : > { %213 = sbr.rel (%p210_p3) target bundleno = 1086 (0x43e), region = 36  ;;  %s752_s5 = smov (!%p210_p3), 32  }
   0x8   : > { %s753_s6 = smov (!%p210_p3), 96  }
   0xc   : > { %s884_s15 = smov (!%p253_p4, %s741_s15), 1  ;;  %vm286_vm0 = vcmask 261120   ;;  %vm311_vm1 = vcmask 64512   ;;  %vm327_vm2 = vcmask 1043456   ;;  %vm540_vm3 = vcmask 523264  }
   0xd   : > { %s681_s19 = sshll.u32 %s884_s15, 3  ;;  %s664_s23 = sshll.u32 %s884_s15, 2  ;;  %vm542_vm4 = vcmask 785408  }
   0xe   : > { %s264_s22 = scalar_lea.vmem %s875_s1, %s681_s19  ;;  %s259_s26 = scalar_lea.vmem %s874_s0, %s664_s23 }
   0xf   : > { %v284_v0 = vld [vmem:[%s264_s22] sm:$0xf]  ;;  %s273_s29 = scalar_lea.vmem %s877_s3, %s884_s15  ;;  %s601_s9 = scalar_lea.vmem %s876_s2, %s681_s19 }
  0x10   : > { %v291_v1 = vsel %vm286_vm0, %v284_v0, 0  ;;  %v283_v2 = vld [vmem:[%s259_s26] sm:$0xf]  ;;  %v350_v3 = vunpack.c.l.b16 %v284_v0  ;;  %v670_v23 = vld [vmem:[%s601_s9 + $0x4] sm:$0xf]  ;;  %s280_s12 = scalar_lea.vmem %s878_s4, %s664_s23 }
  0x11   : > { %300 = vmatpush.bf16.xpose.msra.mxu0 %v291_v1  ;;  %v345_v5 = vunpack.c.l.b16 %v283_v2  ;;  %v710_v7 = vld [vmem:[%s273_s29] ss:$0 sm:$0xff]  ;;  %v329_v24 = vsel %vm327_vm2, %v670_v23, 0  ;;  %v388_v50 = vunpack.c.l.b16 %v670_v23 }
  0x12   : > { %v351_v4 = vpack.c.b16 %v350_v3, %v350_v3  ;;  %338 = vmatpush.bf16.msra.mxu1 %v329_v24 }
  0x13   : > { %v346_v6 = vpack.c.b16 %v345_v5, %v345_v5  ;;  %v389_v51 = vpack.c.b16 %v388_v50, %v388_v50 }
  0x14   : > { %413 = vrot.lane.b32.xlu2 %v351_v4, %s751_s30 }
  0x18   : > { %671 = vmatmul.msk.bf16.vlgmr.msra.gmra.mxu0 %vm286_vm0, %v283_v2 }
  0x1c   : > { %471 = vrot.lane.b32.xlu2 %v351_v4, %s752_s5 }
  0x24   : > { %411 = vrot.lane.b32.xlu2 %v346_v6, %s751_s30 }
  0x2c   : > { %469 = vrot.lane.b32.xlu2 %v346_v6, %s752_s5 }
  0x6e   : > { %v414_v13 = vpop.permute.xlu2 %413 }
  0x6f   : > { %v419_v25 = vsel %vm286_vm0, %v414_v13, 0 }
  0x70   : > { %428 = vmatpush.bf16.xpose.msrb.mxu1 %v419_v25 }
  0x76   : > { %v472_v14 = vpop.permute.xlu2 %471 }
  0x77   : > { %v477_v19 = vsel %vm286_vm0, %v472_v14, 0 }
  0x78   : > { %486 = vmatpush.bf16.xpose.msrb.mxu0 %v477_v19 }
  0x7e   : > { %v412_v18 = vpop.permute.xlu2 %411 }
  0x86   : > { %v470_v22 = vpop.permute.xlu2 %469 }
  0x87   : > { %677 = vmatmul.msk.bf16.vlgmr.msrb.gmra.mxu0 %vm286_vm0, %v470_v22 }
  0x95   : > { %v302_v8 = vpop.f32.mrf.mxu0 }
  0x96   : > { %v306_v9 = vmul.f32 0.17677669, %v302_v8 }
  0x98   : > { %v310_v10 = vadd.f32 %v710_v7, %v306_v9 }
  0x9a   : > { %v312_v11 = vsel %vm311_vm1, %v310_v10, -inf }
  0x9b   : > { %313 = vmax.xlane.f32.xlu0 %v312_v11 }
  0x9d   : > { %v304_v12 = vpop.f32.mrf.mxu0 }
  0xaf   : > { %352 = vrot.lane.b32.xlu0 %v351_v4, %s753_s6 }
 0x104   : > { %v488_v32 = vpop.f32.mrf.mxu0 }
 0x105   : > { %v492_v33 = vmul.f32 0.17677669, %v488_v32 }
 0x107   : > { %v493_v34 = vadd.f32 %v710_v7, %v492_v33 }
 0x109   : > { %v494_v35 = vsel %vm311_vm1, %v493_v34, -inf }
 0x10c   : > { %v490_v36 = vpop.f32.mrf.mxu0 }
 0x10e   : > { %v314_v15 = vpop.xlane.xlu0 %313 }
 0x10f   : > { %v315_v16 = vsub.f32 %v310_v10, %v314_v15 }
 0x111   : > { %v316_v17 = vmul.f32 1.442695, %v315_v16 }
 0x113   : > { %711 = vpow2.f32 %v316_v17 }
 0x119   : > { %v712_v20 = vpop.eup %711 }
 0x11a   : > { %v318_v21 = vsel %vm311_vm1, %v712_v20, 0.0 }
 0x11b   : > { %319 = vadd.xlane.f32.xlu1 %v318_v21 }
 0x121   : > { %v353_v26 = vpop.permute.xlu0 %352 }
 0x122   : > { %v358_v27 = vsel %vm286_vm0, %v353_v26, 0 }
 0x123   : > { %367 = vmatpush.bf16.xpose.msra.mxu2 %v358_v27 }
 0x134   : > { %347 = vrot.lane.b32.xlu1 %v346_v6, %s753_s6 }
 0x15e   : > { %495 = vmax.xlane.f32.xlu1 %v494_v35 }
 0x18e   : > { %v320_v28 = vpop.xlane.xlu1 %319 }
 0x18f   : > { %713 = vrcp.f32 %v320_v28 }
 0x195   : > { %v714_v29 = vpop.eup %713 }
 0x196   : > { %v322_v30 = vmul.f32 %v714_v29, %v712_v20 }
 0x198   : > { %v323_v31 = vpack.c.bf16 %v322_v30, %v322_v30 }
 0x19a   : > { %672 = vmatmul.msk.bf16.vlgmr.msra.gmra.mxu1 %vm311_vm1, %v323_v31 }
 0x1a6   : > { %v348_v37 = vpop.permute.xlu1 %347 }
 0x1a7   : > { %673 = vmatmul.msk.bf16.vlgmr.msra.gmra.mxu2 %vm286_vm0, %v348_v37 }
 0x1aa   : > { %675 = vmatmul.msk.bf16.vlgmr.msrb.gmra.mxu1 %vm286_vm0, %v412_v18 }
 0x1d1   : > { %v496_v54 = vpop.xlane.xlu1 %495 }
 0x1d2   : > { %v497_v58 = vsub.f32 %v493_v34, %v496_v54 }
 0x1d4   : > { %v498_v60 = vmul.f32 1.442695, %v497_v58 }
 0x217   : > { %v839_v38 = vpop.f32.mrf.mxu1 }
 0x21f   : > { %v342_v39 = vpop.f32.mrf.mxu1 }
 0x227   : > { %v430_v40 = vpop.f32.mrf.mxu1 }
 0x228   : > { %v434_v41 = vmul.f32 0.17677669, %v430_v40 }
 0x22a   : > { %v369_v42 = vpop.f32.mrf.mxu2  ;;  %v435_v43 = vadd.f32 %v710_v7, %v434_v41 }
 0x22b   : > { %v373_v44 = vmul.f32 0.17677669, %v369_v42 }
 0x22c   : > { %v436_v45 = vsel %vm311_vm1, %v435_v43, -inf }
 0x22d   : > { %437 = vmax.xlane.f32.xlu2 %v436_v45  ;;  %v374_v46 = vadd.f32 %v710_v7, %v373_v44 }
 0x22f   : > { %v432_v47 = vpop.f32.mrf.mxu1  ;;  %v375_v48 = vsel %vm311_vm1, %v374_v46, -inf }
 0x230   : > { %376 = vmax.xlane.f32.xlu0 %v375_v48 }
 0x232   : > { %v371_v49 = vpop.f32.mrf.mxu2 }
 0x245   : > { %390 = vrot.lane.b32.xlu2 %v389_v51, %s753_s6 }
 0x2a0   : > { %v438_v52 = vpop.xlane.xlu2 %437 }
 0x2a1   : > { %v439_v53 = vsub.f32 %v435_v43, %v438_v52 }
 0x2a3   : > { %v440_v55 = vmul.f32 1.442695, %v439_v53  ;;  %v377_v56 = vpop.xlane.xlu0 %376 }
 0x2a4   : > { %v378_v57 = vsub.f32 %v374_v46, %v377_v56 }
 0x2a5   : > { %715 = vpow2.f32 %v440_v55 }
 0x2a6   : > { %v379_v59 = vmul.f32 1.442695, %v378_v57 }
 0x2a8   : > { %717 = vpow2.f32 %v379_v59  ;;  %v391_v3 = vpop.permute.xlu2 %390 }
 0x2a9   : > { %719 = vpow2.f32 %v498_v60  ;;  %v396_v4 = vsel %vm327_vm2, %v391_v3, 0 }
 0x2aa   : > { %405 = vmatpush.bf16.msra.mxu3 %v396_v4 }
 0x2ab   : > { %v716_v61 = vpop.eup %715 }
 0x2ac   : > { %v442_v62 = vsel %vm311_vm1, %v716_v61, 0.0 }
 0x2ad   : > { %443 = vadd.xlane.f32.xlu1 %v442_v62 }
 0x2ae   : > { %v718_v63 = vpop.eup %717 }
 0x2af   : > { %v381_v0 = vsel %vm311_vm1, %v718_v63, 0.0  ;;  %v720_v1 = vpop.eup %719 }
 0x2b0   : > { %382 = vadd.xlane.f32.xlu0 %v381_v0  ;;  %v500_v2 = vsel %vm311_vm1, %v720_v1, 0.0 }
 0x2b8   : > { %501 = vadd.xlane.f32.xlu0 %v500_v2 }
 0x2c6   : > { %448 = vrot.lane.b32.xlu1 %v389_v51, %s751_s30 }
 0x2cc   : > { %506 = vrot.lane.b32.xlu0 %v389_v51, %s752_s5 }
 0x320   : > { %v444_v8 = vpop.xlane.xlu1 %443 }
 0x323   : > { %v383_v5 = vpop.xlane.xlu0 %382 }
 0x324   : > { %721 = vrcp.f32 %v383_v5 }
 0x325   : > { %723 = vrcp.f32 %v444_v8 }
 0x32a   : > { %v722_v6 = vpop.eup %721 }
 0x32b   : > { %v385_v7 = vmul.f32 %v722_v6, %v718_v63  ;;  %v502_v10 = vpop.xlane.xlu0 %501  ;;  %v724_v11 = vpop.eup %723 }
 0x32c   : > { %725 = vrcp.f32 %v502_v10  ;;  %v446_v13 = vmul.f32 %v724_v11, %v716_v61 }
 0x32d   : > { %v386_v9 = vpack.c.bf16 %v385_v7, %v385_v7 }
 0x32e   : > { %v447_v17 = vpack.c.bf16 %v446_v13, %v446_v13 }
 0x32f   : > { %674 = vmatmul.msk.bf16.vlgmr.msra.gmra.mxu3 %vm311_vm1, %v386_v9 }
 0x332   : > { %v726_v15 = vpop.eup %725 }
 0x333   : > { %v504_v16 = vmul.f32 %v726_v15, %v720_v1 }
 0x335   : > { %v505_v20 = vpack.c.bf16 %v504_v16, %v504_v16 }
 0x338   : > { %v449_v12 = vpop.permute.xlu1 %448 }
 0x339   : > { %v454_v14 = vsel %vm327_vm2, %v449_v12, 0 }
 0x33a   : > { %463 = vmatpush.bf16.msrb.mxu3 %v454_v14 }
 0x33e   : > { %v507_v18 = vpop.permute.xlu0 %506 }
 0x33f   : > { %676 = vmatmul.msk.bf16.vlgmr.msrb.gmra.mxu3 %vm311_vm1, %v447_v17  ;;  %v512_v19 = vsel %vm327_vm2, %v507_v18, 0 }
 0x340   : > { %521 = vmatpush.bf16.msrb.mxu2 %v512_v19 }
 0x343   : > { %678 = vmatmul.msk.bf16.vlgmr.msrb.gmra.mxu2 %vm311_vm1, %v505_v20 }
 0x3b2   : > { %v407_v21 = vpop.f32.mrf.mxu3 }
 0x3b3   : > { %528 = vrot.lane.b32.xlu2 %v407_v21, %s752_s5 }
 0x3ba   : > { %v409_v22 = vpop.f32.mrf.mxu3 }
 0x3c2   : > { %v465_v23 = vpop.f32.mrf.mxu3 }
 0x3c3   : > { %532 = vrot.lane.b32.xlu2 %v465_v23, %s751_s30 }
 0x3c6   : > { %v523_v24 = vpop.f32.mrf.mxu2 }
 0x3c7   : > { %536 = vrot.lane.b32.xlu0 %v523_v24, %s753_s6 }
 0x3ca   : > { %v467_v25 = vpop.f32.mrf.mxu3 }
 0x3ce   : > { %v525_v26 = vpop.f32.mrf.mxu2 }
 0x40d   : > { %v529_v27 = vpop.permute.xlu2 %528 }
 0x40e   : > { %v539_v29 = vsel %vm286_vm0, %v839_v38, %v529_v27 }
 0x41d   : > { %v533_v28 = vpop.permute.xlu2 %532 }
 0x41e   : > { %v541_v30 = vsel %vm540_vm3, %v539_v29, %v533_v28 }
 0x439   : > { %v537_v31 = vpop.permute.xlu0 %536 }
 0x43a   : > { %v543_v32 = vsel %vm542_vm4, %v541_v30, %v537_v31 }
 0x43b   : > { %v544_v33 = vpack.c.bf16 %v543_v32, %v543_v32 }
 0x43d   : > { %545 = vst [vmem:[%s280_s12] sm:$0xf] %v544_v33 }
 0x43e PF: > { %s14_s17 = sadd.s32 1, %s749_s17   ;;  %s879_s15 = smov %s745_s16 }
 0x43f   : > { %p11_p5 = scmp.ge.s32.totalorder %s14_s17, 4   ;;  %s880_s16 = smov %s882_s18 }
 0x441   :  { %13 = sbr.rel (!%p11_p5) target bundleno = 2 (0x2), region = 75 }

// kernel: transformer_forward.51
= control target key start
LH: loop header
LB: loop body
LE: loop exit
PB: predicated region body
PF: predicated region fallthrough
CT: control target
= control target key end

     0   :  { %8 = vsyncpa [#allocation3], 0  ;;  %s222_s0 = inlined_call_operand.vmem [shape: bf16[16,128], index: 0, kind: input, shape index: {}]   ;;  %s223_s1 = inlined_call_operand.vmem [shape: bf16[1,128], index: 1, kind: input, shape index: {}]   ;;  %s224_s2 = inlined_call_operand.hbm [shape: bf16[1,128], index: 2, kind: input, shape index: {}]   ;;  %s225_s3 = inlined_call_operand.hbm [shape: bf16[16,128], index: 3, kind: output, shape index: {}]  }
   0x1   :  { %9 = vsyncpa [#allocation4], 0  ;;  %s19_s14 = sshll.u32 %s224_s2, 4  ;;  %s185_s15 = smov [#allocation2]   ;;  %s20_s14 = int_to_ptr.hbm [resolvable:$true] %s19_s14 }
   0x2   :  { %s21_s16 = sshll.u32 %s185_s15, 4  ;;  %s22_s16 = int_to_ptr.vmem [resolvable:$true] %s21_s16 }
   0x3   :  { %24 = dma.hbm_to_vmem [thread:$0]  %s20_s14, 16, %s22_s16, [#allocation3]  }
   0x4   :  { %181 = dma.done.wait [#allocation3], 16  }
   0x5   :  { %182 = vsyncadd [#allocation3], 4294967280  ;;  %v114_v0 = vld [vmem:[%s222_s0] sm:$0xff]   ;;  %v186_v3 = vmov 128.0   ;;  %s100_s22 = sshll.u32 %s225_s3, 4  ;;  %s188_s23 = smov 64   ;;  %s101_s22 = int_to_ptr.hbm [resolvable:$true] %s100_s22 }
   0x6   :  { %v115_v1 = vunpack.c.l.bf16 %v114_v0  ;;  %v116_v2 = vunpack.c.h.bf16 %v114_v0  ;;  %127 = vrcp.f32 %v186_v3  ;;  %v80_v30 = vld [vmem:[%s223_s1] sm:$0x1]  ;;  %s187_s1 = smov [#allocation5]   ;;  %s189_s24 = smov 4  }
   0x7   :  { %v81_v34 = vunpack.c.l.bf16 %v80_v30  ;;  %v85_v37 = vld [vmem:[#allocation2] sm:$0x1]  ;;  %s98_s19 = sshll.u32 %s187_s1, 4  ;;  %s99_s19 = int_to_ptr.vmem [resolvable:$true] %s98_s19 }
   0x8   :  { %33 = vadd.xlane.f32.xlu0 %v115_v1  ;;  %v86_v41 = vunpack.c.l.bf16 %v85_v37 }
   0x9   :  { %v82_v39 = vperm.slane %v81_v34, 0 }
   0xa   :  { %v87_v46 = vperm.slane %v86_v41, 0 }
   0xc   :  { %v128_v4 = vpop.eup %127 }
   0xd   :  { %v38_v5 = vmul.f32 128.0, %v128_v4  ;;  %vm42_vm0 = vweird.f32 %v128_v4 }
   0xf   :  { %v39_v6 = vsub.f32 1.0, %v38_v5 }
  0x10   :  { %35 = vadd.xlane.f32.xlu0 %v116_v2 }
  0x11   :  { %v40_v7 = vmul.f32 %v128_v4, %v39_v6 }
  0x13   :  { %v41_v8 = vadd.f32 %v128_v4, %v40_v7 }
  0x15   :  { %v43_v9 = vsel %vm42_vm0, %v128_v4, %v41_v8 }
  0x7b   :  { %v34_v10 = vpop.xlane.xlu0 %33 }
  0x7c   :  { %v44_v11 = vmul.f32 %v43_v9, %v34_v10 }
  0x7e   :  { %v46_v12 = vsub.f32 %v115_v1, %v44_v11 }
  0x80   :  { %v48_v13 = vmul.f32 %v46_v12, %v46_v12 }
  0x82   :  { %50 = vadd.xlane.f32.xlu1 %v48_v13 }
  0x83   :  { %v36_v14 = vpop.xlane.xlu0 %35 }
  0x84   :  { %v45_v15 = vmul.f32 %v43_v9, %v36_v14 }
  0x86   :  { %v47_v16 = vsub.f32 %v116_v2, %v45_v15 }
  0x88   :  { %v49_v17 = vmul.f32 %v47_v16, %v47_v16 }
  0x8a   :  { %52 = vadd.xlane.f32.xlu1 %v49_v17 }
  0xf5   :  { %v51_v18 = vpop.xlane.xlu1 %50 }
  0xf6   :  { %v54_v19 = vmul.f32 %v51_v18, %v43_v9 }
  0xf8   :  { %v56_v20 = vadd.f32 1e-06, %v54_v19 }
  0xfa   :  { %129 = vrsqrt.f32 %v56_v20  ;;  %vm64_vm2 = vweird.f32 %v56_v20 }
  0xfd   :  { %v53_v21 = vpop.xlane.xlu1 %52 }
  0xfe   :  { %v55_v22 = vmul.f32 %v53_v21, %v43_v9 }
 0x100   :  { %v130_v23 = vpop.eup %129  ;;  %v57_v24 = vadd.f32 1e-06, %v55_v22 }
 0x101   :  { %v59_v25 = vmul.f32 %v130_v23, %v56_v20  ;;  %vm65_vm1 = vweird.f32 %v130_v23 }
 0x102   :  { %131 = vrsqrt.f32 %v57_v24  ;;  %vm66_vm3 = vmor %vm64_vm2, %vm65_vm1  ;;  %vm74_vm5 = vweird.f32 %v57_v24 }
 0x103   :  { %v60_v26 = vmul.f32 %v130_v23, %v59_v25 }
 0x105   :  { %v61_v27 = vmul.f32 0.5, %v60_v26 }
 0x107   :  { %v62_v28 = vsub.f32 1.5, %v61_v27 }
 0x108   :  { %v132_v29 = vpop.eup %131 }
 0x109   :  { %v63_v31 = vmul.f32 %v130_v23, %v62_v28  ;;  %v69_v32 = vmul.f32 %v132_v29, %v57_v24  ;;  %vm75_vm4 = vweird.f32 %v132_v29 }
 0x10a   :  { %vm76_vm6 = vmor %vm74_vm5, %vm75_vm4 }
 0x10b   :  { %v70_v33 = vmul.f32 %v132_v29, %v69_v32  ;;  %v67_v35 = vsel %vm66_vm3, %v130_v23, %v63_v31 }
 0x10c   :  { %v78_v40 = vmul.f32 %v67_v35, %v46_v12 }
 0x10d   :  { %v71_v36 = vmul.f32 0.5, %v70_v33 }
 0x10e   :  { %v83_v44 = vmul.f32 %v82_v39, %v78_v40 }
 0x10f   :  { %v72_v38 = vsub.f32 1.5, %v71_v36 }
 0x110   :  { %v88_v48 = vadd.f32 %v87_v46, %v83_v44 }
 0x111   :  { %v73_v42 = vmul.f32 %v132_v29, %v72_v38 }
 0x113   :  { %v77_v43 = vsel %vm76_vm6, %v132_v29, %v73_v42 }
 0x114   :  { %v79_v45 = vmul.f32 %v77_v43, %v47_v16 }
 0x116   :  { %v84_v47 = vmul.f32 %v82_v39, %v79_v45 }
 0x118   :  { %v89_v49 = vadd.f32 %v87_v46, %v84_v47 }
 0x11a   :  { %v120_v50 = vpack.c.bf16 %v89_v49, %v88_v48 }
 0x11c   :  { %121 = vst [vmem:[#allocation5] sm:$0xff] %v120_v50  }
 0x11d   :  { %106 = dma.vmem_to_hbm [thread:$0]  %s99_s19, 128, %s101_s22, [#allocation4], %s188_s23, %s188_s23, %s189_s24  }
 0x11e   :  { %183 = dma.done.wait [#allocation4], 128  }
 0x11f   :  { %184 = vsyncadd [#allocation4], 4294967168 }
 0x120   :  { %111 = vsyncpa [#allocation3], 1 }
 0x121   :  { %112 = vsyncpa [#allocation4], 1 }

</bundles_post_ra>
